<compile_context>
chip_gen: v7x
topology: tpu7x:2x2x1
jax: 0.10.0
libtpu: 0.0.40
codegen_flags: <defaults>
</compile_context>

<pallas_src>
import jax
import jax.numpy as jnp
from jax import lax
from jax.experimental import pallas as pl
from jax.experimental.pallas import tpu as pltpu


def _make_aff_kernel(H, W):
    HW = H * W

    def kernel(x1_ref, x2_ref, x4_ref, w1_ref, w2_ref, b_ref, m_ref, o_ref):
        # torch.cat([x1, x2, x4], dim=1)  ->  lane-axis concat in VMEM.
        x = jnp.concatenate([x1_ref[0], x2_ref[0], x4_ref[0]], axis=-1)   # (HW, Cin) f32

        # BasicConv #1: 1x1 conv == channel-mixing matmul (+ bias, ReLU).
        # bf16 MXU operands, f32 accumulation.
        h = jnp.dot(x.astype(jnp.bfloat16), w1_ref[...],
                    preferred_element_type=jnp.float32)
        h = jnp.maximum(h + b_ref[0:1, :], 0.0)                           # (HW, Cout) f32

        # BasicConv #2: 3x3 'SAME' conv as ONE fused matmul over all 9 taps.
        # Each tap is a sublane rotation of h; wrap-around / zero padding is handled by a
        # precomputed per-tap (HW, 1) validity mask (passed in, built once in the wrapper).
        m = m_ref[...]                                                    # (HW, 9) f32
        taps = []
        t = 0
        for dy in (-1, 0, 1):
            for dx in (-1, 0, 1):
                if dy == 0 and dx == 0:
                    taps.append(h)                                        # center tap: no mask
                else:
                    shift = (-(dy * W + dx)) % HW
                    r = pltpu.roll(h, shift, axis=0)                      # tap[f] = h[f + dy*W + dx]
                    taps.append(r * m[:, t:t + 1])
                t += 1
        im2col = jnp.concatenate(taps, axis=-1).astype(jnp.bfloat16)      # (HW, 9*Cout)

        y = jnp.dot(im2col, w2_ref[...], preferred_element_type=jnp.float32)
        o_ref[0] = (y + b_ref[1:2, :]).astype(o_ref.dtype)

    return kernel


def aff_forward(x1, x2, x4, w1, b1, w2, b2):
    """x*: NCHW f32. w1: (1,1,Cin,Cout) HWIO. w2: (3,3,Cout,Cout) HWIO. b1,b2: (Cout,)."""
    N, C1, H, W = x1.shape
    C2, C4 = x2.shape[1], x4.shape[1]
    Cin = C1 + C2 + C4
    Cout = w2.shape[-1]
    HW = H * W

    def to_flat(x):
        return jnp.transpose(x, (0, 2, 3, 1)).reshape(N, HW, -1).astype(jnp.float32)

    x1f, x2f, x4f = to_flat(x1), to_flat(x2), to_flat(x4)
    w1_flat = w1.reshape(Cin, Cout).astype(jnp.bfloat16)        # bf16 weights: half DMA/VMEM
    w2_flat = w2.reshape(9 * Cout, Cout).astype(jnp.bfloat16)   # row = (ky*3 + kx)*Cout + ci
    b = jnp.stack([b1, b2]).astype(jnp.float32)                 # (2, Cout)

    # Zero-padding validity mask of the 9 taps (tiny, computed once outside the kernel).
    yy, xx = jnp.meshgrid(jnp.arange(H), jnp.arange(W), indexing="ij")
    yy, xx = yy.reshape(-1), xx.reshape(-1)
    mask = jnp.stack(
        [((yy + dy >= 0) & (yy + dy < H) & (xx + dx >= 0) & (xx + dx < W))
         for dy in (-1, 0, 1) for dx in (-1, 0, 1)],
        axis=-1).astype(jnp.float32)                            # (HW, 9)

    out_flat = pl.pallas_call(
        _make_aff_kernel(H, W),
        out_shape=jax.ShapeDtypeStruct((N, HW, Cout), jnp.float32),
        grid=(N,),
        in_specs=[
            pl.BlockSpec((1, HW, C1), lambda n: (n, 0, 0)),
            pl.BlockSpec((1, HW, C2), lambda n: (n, 0, 0)),
            pl.BlockSpec((1, HW, C4), lambda n: (n, 0, 0)),
            pl.BlockSpec((Cin, Cout), lambda n: (0, 0)),        # VMEM-resident across grid
            pl.BlockSpec((9 * Cout, Cout), lambda n: (0, 0)),
            pl.BlockSpec((2, Cout), lambda n: (0, 0)),
            pl.BlockSpec((HW, 9), lambda n: (0, 0)),
        ],
        out_specs=pl.BlockSpec((1, HW, Cout), lambda n: (n, 0, 0)),
        compiler_params=pltpu.CompilerParams(
            dimension_semantics=("parallel",),
            vmem_limit_bytes=32 * 1024 * 1024),
    )(x1f, x2f, x4f, w1_flat, w2_flat, b, mask)

    return jnp.transpose(out_flat.reshape(N, H, W, Cout), (0, 3, 1, 2))


def aff_reference(x1, x2, x4, w1, b1, w2, b2, matmul_dtype=jnp.float32):
    """Pure-JAX reference (same math as the PyTorch module).

    matmul_dtype=bfloat16 mirrors the kernel's MXU precision policy (bf16 operands,
    f32 accumulation); matmul_dtype=float32 is the strict f32 module math.
    """
    x = jnp.concatenate([x1, x2, x4], axis=1)                   # torch.cat(dim=1)
    a = jnp.transpose(x, (0, 2, 3, 1))                          # NHWC
    dn = ("NHWC", "HWIO", "NHWC")
    h = lax.conv_general_dilated(
        a.astype(matmul_dtype), w1.astype(matmul_dtype), (1, 1), "SAME",
        dimension_numbers=dn, precision=lax.Precision.HIGHEST,
        preferred_element_type=jnp.float32)
    h = jnp.maximum(h + b1[None, None, None, :], 0.0)
    y = lax.conv_general_dilated(
        h.astype(matmul_dtype), w2.astype(matmul_dtype), (1, 1), "SAME",
        dimension_numbers=dn, precision=lax.Precision.HIGHEST,
        preferred_element_type=jnp.float32)
    return jnp.transpose(y + b2[None, None, None, :], (0, 3, 1, 2))


if __name__ == "__main__":
    # MIMO-UNet-like small shapes: AFF(in_channel=56, out_channel=16) with base_channel=8.
    N, H, W = 2, 16, 16
    C1, C2, C4, Cout = 8, 16, 32, 16
    Cin = C1 + C2 + C4

    key = jax.random.PRNGKey(0)
    k1, k2, k4, kw1, kw2, kb1, kb2 = jax.random.split(key, 7)
    x1 = jax.random.normal(k1, (N, C1, H, W), jnp.float32)
    x2 = jax.random.normal(k2, (N, C2, H, W), jnp.float32)
    x4 = jax.random.normal(k4, (N, C4, H, W), jnp.float32)
    # HWIO weights (ky, kx, ci, co); equivalent PyTorch Conv2d weight is w[co, ci, ky, kx].
    w1 = jax.random.normal(kw1, (1, 1, Cin, Cout), jnp.float32) / (Cin ** 0.5)
    w2 = jax.random.normal(kw2, (3, 3, Cout, Cout), jnp.float32) / ((9 * Cout) ** 0.5)
    b1 = 0.05 * jax.random.normal(kb1, (Cout,), jnp.float32)
    b2 = 0.05 * jax.random.normal(kb2, (Cout,), jnp.float32)

    out = jax.block_until_ready(aff_forward(x1, x2, x4, w1, b1, w2, b2))
    assert out.shape == (N, Cout, H, W)

    # 1) exact structural check against a reference with the same MXU precision policy
    #    (bf16 operands, f32 accumulation) -> differences are only accumulation order.
    ref_bf16 = jax.block_until_ready(
        aff_reference(x1, x2, x4, w1, b1, w2, b2, matmul_dtype=jnp.bfloat16))
    assert jnp.allclose(out, ref_bf16, rtol=2e-3, atol=2e-3), \
        f"max abs err (bf16-policy ref) = {float(jnp.max(jnp.abs(out - ref_bf16)))}"

    # 2) end-to-end fidelity vs. the strict f32 module math (tolerance reflects bf16
    #    MXU operands, which the performance review asked for).
    ref_f32 = jax.block_until_ready(
        aff_reference(x1, x2, x4, w1, b1, w2, b2, matmul_dtype=jnp.float32))
    assert jnp.allclose(out, ref_f32, rtol=5e-2, atol=5e-2), \
        f"max abs err (f32 ref) = {float(jnp.max(jnp.abs(out - ref_f32)))}"

    print("KERNEL_OK")
</pallas_src>

<mosaic_0001>
module attributes {stable_mosaic.version = 11 : i64} {
  func.func @kernel(%arg0: i32, %arg1: memref<1x256x8xf32, #tpu.memory_space<vmem>>, %arg2: memref<1x256x16xf32, #tpu.memory_space<vmem>>, %arg3: memref<1x256x32xf32, #tpu.memory_space<vmem>>, %arg4: memref<56x16xbf16, #tpu.memory_space<vmem>>, %arg5: memref<144x16xbf16, #tpu.memory_space<vmem>>, %arg6: memref<2x16xf32, #tpu.memory_space<vmem>>, %arg7: memref<256x9xf32, #tpu.memory_space<vmem>>, %arg8: memref<1x256x16xf32, #tpu.memory_space<vmem>>) attributes {dimension_semantics = [#tpu.dimension_semantics<parallel>], iteration_bounds = array<i64: 2>, scalar_prefetch = 0 : i64, scratch_operands = 0 : i64, tpu.core_type = #tpu.core_type<tc>, window_params = [{transform_indices = @transform_0, window_bounds = array<i64: 1, 256, 8>}, {transform_indices = @transform_1, window_bounds = array<i64: 1, 256, 16>}, {transform_indices = @transform_2, window_bounds = array<i64: 1, 256, 32>}, {pipeline_mode = #tpu.pipeline_mode<synchronous>, transform_indices = @transform_3, window_bounds = array<i64: 56, 16>}, {pipeline_mode = #tpu.pipeline_mode<synchronous>, transform_indices = @transform_4, window_bounds = array<i64: 144, 16>}, {pipeline_mode = #tpu.pipeline_mode<synchronous>, transform_indices = @transform_5, window_bounds = array<i64: 2, 16>}, {pipeline_mode = #tpu.pipeline_mode<synchronous>, transform_indices = @transform_6, window_bounds = array<i64: 256, 9>}, {transform_indices = @transform_7, window_bounds = array<i64: 1, 256, 16>}]} {
    %c0 = arith.constant 0 : index
    %c0_0 = arith.constant 0 : index
    %c0_1 = arith.constant 0 : index
    %0 = vector.load %arg1[%c0, %c0_0, %c0_1] : memref<1x256x8xf32, #tpu.memory_space<vmem>>, vector<1x256x8xf32>
    %1 = vector.shape_cast %0 : vector<1x256x8xf32> to vector<256x8xf32>
    %c0_2 = arith.constant 0 : index
    %c0_3 = arith.constant 0 : index
    %c0_4 = arith.constant 0 : index
    %2 = vector.load %arg2[%c0_2, %c0_3, %c0_4] : memref<1x256x16xf32, #tpu.memory_space<vmem>>, vector<1x256x16xf32>
    %3 = vector.shape_cast %2 : vector<1x256x16xf32> to vector<256x16xf32>
    %c0_5 = arith.constant 0 : index
    %c0_6 = arith.constant 0 : index
    %c0_7 = arith.constant 0 : index
    %4 = vector.load %arg3[%c0_5, %c0_6, %c0_7] : memref<1x256x32xf32, #tpu.memory_space<vmem>>, vector<1x256x32xf32>
    %5 = vector.shape_cast %4 : vector<1x256x32xf32> to vector<256x32xf32>
    %6 = tpu.concatenate %1, %3, %5 in 1 : vector<256x8xf32>, vector<256x16xf32>, vector<256x32xf32> -> vector<256x56xf32>
    %7 = arith.truncf %6 : vector<256x56xf32> to vector<256x56xbf16>
    %c0_8 = arith.constant 0 : index
    %c0_9 = arith.constant 0 : index
    %8 = vector.load %arg4[%c0_8, %c0_9] : memref<56x16xbf16, #tpu.memory_space<vmem>>, vector<56x16xbf16>
    %cst = arith.constant dense<0.000000e+00> : vector<256x16xf32>
    %9 = tpu.matmul %7, %8, %cst {dimension_numbers = #tpu.dot_dimension_numbers<[1], [0], [0], [1], [0, 0, 1, 1], [], []>} : vector<256x56xbf16>, vector<56x16xbf16>, vector<256x16xf32> -> vector<256x16xf32>
    %c0_10 = arith.constant 0 : index
    %c0_11 = arith.constant 0 : index
    %10 = vector.load %arg6[%c0_10, %c0_11] : memref<2x16xf32, #tpu.memory_space<vmem>>, vector<1x16xf32>
    %11 = vector.broadcast %10 : vector<1x16xf32> to vector<256x16xf32>
    %12 = arith.addf %9, %11 : vector<256x16xf32>
    %cst_12 = arith.constant 0.000000e+00 : f32
    %13 = vector.broadcast %cst_12 : f32 to vector<256x16xf32>
    %14 = arith.maximumf %12, %13 : vector<256x16xf32>
    %c0_13 = arith.constant 0 : index
    %c0_14 = arith.constant 0 : index
    %15 = vector.load %arg7[%c0_13, %c0_14] : memref<256x9xf32, #tpu.memory_space<vmem>>, vector<256x9xf32>
    %c17_i32 = arith.constant 17 : i32
    %16 = tpu.dynamic_rotate %14 by %c17_i32 dim 0 : vector<256x16xf32>, i32 -> vector<256x16xf32>
    %17 = vector.extract_strided_slice %15 {offsets = [0, 0], sizes = [256, 1], strides = [1, 1]} : vector<256x9xf32> to vector<256x1xf32>
    %18 = vector.broadcast %17 : vector<256x1xf32> to vector<256x16xf32>
    %19 = arith.mulf %16, %18 : vector<256x16xf32>
    %c16_i32 = arith.constant 16 : i32
    %20 = tpu.dynamic_rotate %14 by %c16_i32 dim 0 : vector<256x16xf32>, i32 -> vector<256x16xf32>
    %21 = vector.extract_strided_slice %15 {offsets = [0, 1], sizes = [256, 1], strides = [1, 1]} : vector<256x9xf32> to vector<256x1xf32>
    %22 = vector.broadcast %21 : vector<256x1xf32> to vector<256x16xf32>
    %23 = arith.mulf %20, %22 : vector<256x16xf32>
    %c15_i32 = arith.constant 15 : i32
    %24 = tpu.dynamic_rotate %14 by %c15_i32 dim 0 : vector<256x16xf32>, i32 -> vector<256x16xf32>
    %25 = vector.extract_strided_slice %15 {offsets = [0, 2], sizes = [256, 1], strides = [1, 1]} : vector<256x9xf32> to vector<256x1xf32>
    %26 = vector.broadcast %25 : vector<256x1xf32> to vector<256x16xf32>
    %27 = arith.mulf %24, %26 : vector<256x16xf32>
    %c1_i32 = arith.constant 1 : i32
    %28 = tpu.dynamic_rotate %14 by %c1_i32 dim 0 : vector<256x16xf32>, i32 -> vector<256x16xf32>
    %29 = vector.extract_strided_slice %15 {offsets = [0, 3], sizes = [256, 1], strides = [1, 1]} : vector<256x9xf32> to vector<256x1xf32>
    %30 = vector.broadcast %29 : vector<256x1xf32> to vector<256x16xf32>
    %31 = arith.mulf %28, %30 : vector<256x16xf32>
    %c255_i32 = arith.constant 255 : i32
    %32 = tpu.dynamic_rotate %14 by %c255_i32 dim 0 : vector<256x16xf32>, i32 -> vector<256x16xf32>
    %33 = vector.extract_strided_slice %15 {offsets = [0, 5], sizes = [256, 1], strides = [1, 1]} : vector<256x9xf32> to vector<256x1xf32>
    %34 = vector.broadcast %33 : vector<256x1xf32> to vector<256x16xf32>
    %35 = arith.mulf %32, %34 : vector<256x16xf32>
    %c241_i32 = arith.constant 241 : i32
    %36 = tpu.dynamic_rotate %14 by %c241_i32 dim 0 : vector<256x16xf32>, i32 -> vector<256x16xf32>
    %37 = vector.extract_strided_slice %15 {offsets = [0, 6], sizes = [256, 1], strides = [1, 1]} : vector<256x9xf32> to vector<256x1xf32>
    %38 = vector.broadcast %37 : vector<256x1xf32> to vector<256x16xf32>
    %39 = arith.mulf %36, %38 : vector<256x16xf32>
    %c240_i32 = arith.constant 240 : i32
    %40 = tpu.dynamic_rotate %14 by %c240_i32 dim 0 : vector<256x16xf32>, i32 -> vector<256x16xf32>
    %41 = vector.extract_strided_slice %15 {offsets = [0, 7], sizes = [256, 1], strides = [1, 1]} : vector<256x9xf32> to vector<256x1xf32>
    %42 = vector.broadcast %41 : vector<256x1xf32> to vector<256x16xf32>
    %43 = arith.mulf %40, %42 : vector<256x16xf32>
    %c239_i32 = arith.constant 239 : i32
    %44 = tpu.dynamic_rotate %14 by %c239_i32 dim 0 : vector<256x16xf32>, i32 -> vector<256x16xf32>
    %45 = vector.extract_strided_slice %15 {offsets = [0, 8], sizes = [256, 1], strides = [1, 1]} : vector<256x9xf32> to vector<256x1xf32>
    %46 = vector.broadcast %45 : vector<256x1xf32> to vector<256x16xf32>
    %47 = arith.mulf %44, %46 : vector<256x16xf32>
    %48 = tpu.concatenate %19, %23, %27, %31, %14, %35, %39, %43, %47 in 1 : vector<256x16xf32>, vector<256x16xf32>, vector<256x16xf32>, vector<256x16xf32>, vector<256x16xf32>, vector<256x16xf32>, vector<256x16xf32>, vector<256x16xf32>, vector<256x16xf32> -> vector<256x144xf32>
    %49 = arith.truncf %48 : vector<256x144xf32> to vector<256x144xbf16>
    %c0_15 = arith.constant 0 : index
    %c0_16 = arith.constant 0 : index
    %50 = vector.load %arg5[%c0_15, %c0_16] : memref<144x16xbf16, #tpu.memory_space<vmem>>, vector<144x16xbf16>
    %cst_17 = arith.constant dense<0.000000e+00> : vector<256x16xf32>
    %51 = tpu.matmul %49, %50, %cst_17 {dimension_numbers = #tpu.dot_dimension_numbers<[1], [0], [0], [1], [0, 0, 1, 1], [], []>} : vector<256x144xbf16>, vector<144x16xbf16>, vector<256x16xf32> -> vector<256x16xf32>
    %c1 = arith.constant 1 : index
    %c0_18 = arith.constant 0 : index
    %52 = vector.load %arg6[%c1, %c0_18] : memref<2x16xf32, #tpu.memory_space<vmem>>, vector<1x16xf32>
    %53 = vector.broadcast %52 : vector<1x16xf32> to vector<256x16xf32>
    %54 = arith.addf %51, %53 : vector<256x16xf32>
    %c0_19 = arith.constant 0 : index
    %c0_20 = arith.constant 0 : index
    %c0_21 = arith.constant 0 : index
    %55 = vector.load %arg8[%c0_19, %c0_20, %c0_21] : memref<1x256x16xf32, #tpu.memory_space<vmem>>, vector<1x256x16xf32>
    %56 = vector.shape_cast %55 : vector<1x256x16xf32> to vector<256x16xf32>
    %57 = vector.shape_cast %54 : vector<256x16xf32> to vector<1x256x16xf32>
    tpu.vector_store %arg8[%c0_19, %c0_20, %c0_21], %57 {strides = array<i32>} : memref<1x256x16xf32, #tpu.memory_space<vmem>>, vector<1x256x16xf32>,
    return
  }
  func.func @transform_0(%arg0: i32) -> (i32, i32, i32) {
    %c0_i32 = arith.constant 0 : i32
    %c0_i32_0 = arith.constant 0 : i32
    %c0_i32_1 = arith.constant 0 : i32
    return %arg0, %c0_i32, %c0_i32_0 : i32, i32, i32
  }
  func.func @transform_1(%arg0: i32) -> (i32, i32, i32) {
    %c0_i32 = arith.constant 0 : i32
    %c0_i32_0 = arith.constant 0 : i32
    %c0_i32_1 = arith.constant 0 : i32
    return %arg0, %c0_i32, %c0_i32_0 : i32, i32, i32
  }
  func.func @transform_2(%arg0: i32) -> (i32, i32, i32) {
    %c0_i32 = arith.constant 0 : i32
    %c0_i32_0 = arith.constant 0 : i32
    %c0_i32_1 = arith.constant 0 : i32
    return %arg0, %c0_i32, %c0_i32_0 : i32, i32, i32
  }
  func.func @transform_3(%arg0: i32) -> (i32, i32) {
    %c0_i32 = arith.constant 0 : i32
    %c0_i32_0 = arith.constant 0 : i32
    %c0_i32_1 = arith.constant 0 : i32
    return %c0_i32, %c0_i32_0 : i32, i32
  }
  func.func @transform_4(%arg0: i32) -> (i32, i32) {
    %c0_i32 = arith.constant 0 : i32
    %c0_i32_0 = arith.constant 0 : i32
    %c0_i32_1 = arith.constant 0 : i32
    return %c0_i32, %c0_i32_0 : i32, i32
  }
  func.func @transform_5(%arg0: i32) -> (i32, i32) {
    %c0_i32 = arith.constant 0 : i32
    %c0_i32_0 = arith.constant 0 : i32
    %c0_i32_1 = arith.constant 0 : i32
    return %c0_i32, %c0_i32_0 : i32, i32
  }
  func.func @transform_6(%arg0: i32) -> (i32, i32) {
    %c0_i32 = arith.constant 0 : i32
    %c0_i32_0 = arith.constant 0 : i32
    %c0_i32_1 = arith.constant 0 : i32
    return %c0_i32, %c0_i32_0 : i32, i32
  }
  func.func @transform_7(%arg0: i32) -> (i32, i32, i32) {
    %c0_i32 = arith.constant 0 : i32
    %c0_i32_0 = arith.constant 0 : i32
    %c0_i32_1 = arith.constant 0 : i32
    return %arg0, %c0_i32, %c0_i32_0 : i32, i32, i32
  }
}

</mosaic_0001>

<bundles_post_ra>
// kernel: tpu_custom_call.1
= control target key start
LH: loop header
LB: loop body
LE: loop exit
PB: predicated region body
PF: predicated region fallthrough
CT: control target
= control target key end

     0   :  { %s5081_s24 = smov 0   ;;  %s8466_s0 = inlined_call_operand.vmem [shape: f32[2,256,8], index: 0, kind: input, shape index: {}]   ;;  %s8467_s1 = inlined_call_operand.vmem [shape: f32[2,256,16], index: 1, kind: input, shape index: {}]   ;;  %s8468_s2 = inlined_call_operand.vmem [shape: f32[2,256,32], index: 2, kind: input, shape index: {}]   ;;  %s8469_s3 = inlined_call_operand.vmem [shape: bf16[56,16], index: 3, kind: input, shape index: {}]   ;;  %s8470_s4 = inlined_call_operand.vmem [shape: bf16[144,16], index: 4, kind: input, shape index: {}]   ;;  %s8471_s5 = inlined_call_operand.vmem [shape: f32[2,16], index: 5, kind: input, shape index: {}]   ;;  %s8472_s6 = inlined_call_operand.vmem [shape: f32[256,9], index: 6, kind: input, shape index: {}]   ;;  %s8473_s7 = inlined_call_operand.vmem [shape: f32[2,256,16], index: 7, kind: output, shape index: {}]  }
   0x1 LB: > { %s4065_s25 = sadd.s32 4294967295, %s5022_s24   ;;  %p4069_p0 = scmp.ge.s32.totalorder %s5022_s24, 1  ;;  %s5022_s24 = sphi %s5081_s24, %s17_s24  }
   0x2   : > { %p257_p1 = scmp.lt.s32.totalorder %s5022_s24, 3 }
   0x4   : > { %p258_p2 = pnand %p4069_p0, %p257_p1 }
   0x6   : > { %261 = sbr.rel (%p258_p2) target bundleno = 1190 (0x4a6), region = 48 }
   0xd   : > { %p299_p3 = scmp.lt.s32.totalorder %s4065_s25, 1  ;;  %v8474_v0 = vmov 0   ;;  %s5025_s30 = smov 8   ;;  %v4971_v59 = vld [vmem:[%s8469_s3] sm:$0xff]   ;;  %vm836_vm0 = vcmask 1043456   ;;  %vm672_vm1 = vcmask 64512  }
   0xe   : > { %4396 = vset.pattern.permute.xlu1 %v8474_v0  ;;  %4395 = vset.pattern.permute.xlu0 %v8474_v0  ;;  %s5026_s13 = smov 24   ;;  %vm705_vm2 = vcmask 195584   ;;  %vm787_vm3 = vcmask 457728   ;;  %s5036_s8 = smov 48   ;;  %vm3405_vm6 = vcmask 130048   ;;  %vm3438_vm7 = vcmask 261120  }
   0xf   : > { %s9301_s25 = smov (!%p299_p3, %s4065_s25), 1  ;;  %4191 = vmatprep.subr.bf16.mxu1 %v8474_v0  ;;  %4151 = vmatprep.subr.bf16.mxu0 %v4971_v59  ;;  %s5037_s9 = smov 80   ;;  %vm3471_vm8 = vcmask 392192   ;;  %vm3504_vm9 = vcmask 523264   ;;  %vm3537_vm10 = vcmask 654336   ;;  %vm3570_vm11 = vcmask 785408  }
  0x10   : > { %s5092_s26 = sshll.u32 %s9301_s25, 8  ;;  %4152 = vmatpush3.bf16.msra.mxu0 %v4971_v59  ;;  %v5338_v59 = vld [vmem:[%s8472_s6 + $0xa0] sm:$0xff]  ;;  %s5038_s12 = smov 112   ;;  %vm3603_vm12 = vcmask 916480  }
  0x11   : > { %s5098_s29 = scalar_lea.vmem %s8467_s1, %s5092_s26  ;;  %s5148_s10 = scalar_lea.vmem %s8468_s2, %s5092_s26 }
  0x12   : > { %v356_v1 = vld [vmem:[%s5098_s29 + $0x20] sm:$0xff]  ;;  %v357_v2 = vld [vmem:[%s5098_s29 + $0x28] sm:$0xff]  ;;  %v358_v6 = vld [vmem:[%s5098_s29 + $0x30] sm:$0xff]  ;;  %s5442_s23 = scalar_lea.vmem %s8466_s0, %s5092_s26  ;;  %s5039_s27 = smov 64  }
  0x13   : > { %v352_v3 = vld [vmem:[%s5098_s29] sm:$0xff]  ;;  %v4245_v4 = vpack.i.bf16 %v357_v2, %v356_v1  ;;  %v353_v5 = vld [vmem:[%s5098_s29 + $0x8] sm:$0xff]  ;;  %v359_v7 = vld [vmem:[%s5098_s29 + $0x38] sm:$0xff]  ;;  %s8365_s14 = scalar_lea.vmem %s8473_s7, %s5092_s26 }
  0x14   : > { %v4235_v8 = vpack.i.bf16 %v353_v5, %v352_v3  ;;  %v354_v9 = vld [vmem:[%s5098_s29 + $0x10] sm:$0xff]  ;;  %v355_v10 = vld [vmem:[%s5098_s29 + $0x18] sm:$0xff]  ;;  %v4250_v11 = vpack.i.bf16 %v359_v7, %v358_v6  ;;  %v360_v15 = vld [vmem:[%s5098_s29 + $0x40] sm:$0xff] }
  0x15   : > { %4246 = vrot.lane.b32.xlu1 %v4245_v4, %s5025_s30  ;;  %v4240_v12 = vpack.i.bf16 %v355_v10, %v354_v9  ;;  %v362_v13 = vld [vmem:[%s5098_s29 + $0x50] sm:$0xff]  ;;  %v363_v14 = vld [vmem:[%s5098_s29 + $0x58] sm:$0xff]  ;;  %v361_v16 = vld [vmem:[%s5098_s29 + $0x48] sm:$0xff] }
  0x16   : > { %4236 = vrot.lane.b32.xlu0 %v4235_v8, %s5025_s30  ;;  %v4260_v17 = vpack.i.bf16 %v363_v14, %v362_v13  ;;  %v4255_v18 = vpack.i.bf16 %v361_v16, %v360_v15  ;;  %v366_v19 = vld [vmem:[%s5098_s29 + $0x70] sm:$0xff]  ;;  %v367_v20 = vld [vmem:[%s5098_s29 + $0x78] sm:$0xff]  ;;  %v364_v21 = vld [vmem:[%s5098_s29 + $0x60] sm:$0xff] }
  0x17   : > { %v365_v22 = vld [vmem:[%s5098_s29 + $0x68] sm:$0xff]  ;;  %v4270_v23 = vpack.i.bf16 %v367_v20, %v366_v19  ;;  %v370_v25 = vld [vmem:[%s5098_s29 + $0x90] sm:$0xff]  ;;  %v371_v26 = vld [vmem:[%s5098_s29 + $0x98] sm:$0xff] }
  0x18   : > { %v4265_v24 = vpack.i.bf16 %v365_v22, %v364_v21  ;;  %v368_v27 = vld [vmem:[%s5098_s29 + $0x80] sm:$0xff]  ;;  %v369_v28 = vld [vmem:[%s5098_s29 + $0x88] sm:$0xff]  ;;  %v4280_v29 = vpack.i.bf16 %v371_v26, %v370_v25  ;;  %v374_v31 = vld [vmem:[%s5098_s29 + $0xb0] sm:$0xff] }
  0x19   : > { %4251 = vrot.lane.b32.xlu1 %v4250_v11, %s5025_s30  ;;  %v4275_v30 = vpack.i.bf16 %v369_v28, %v368_v27  ;;  %v375_v32 = vld [vmem:[%s5098_s29 + $0xb8] sm:$0xff]  ;;  %v372_v33 = vld [vmem:[%s5098_s29 + $0xa0] sm:$0xff]  ;;  %v373_v34 = vld [vmem:[%s5098_s29 + $0xa8] sm:$0xff] }
  0x1a   : > { %4241 = vrot.lane.b32.xlu0 %v4240_v12, %s5025_s30  ;;  %v4290_v35 = vpack.i.bf16 %v375_v32, %v374_v31  ;;  %v4285_v36 = vpack.i.bf16 %v373_v34, %v372_v33  ;;  %v378_v37 = vld [vmem:[%s5098_s29 + $0xd0] sm:$0xff]  ;;  %v379_v38 = vld [vmem:[%s5098_s29 + $0xd8] sm:$0xff]  ;;  %v376_v39 = vld [vmem:[%s5098_s29 + $0xc0] sm:$0xff] }
  0x1b   : > { %v377_v40 = vld [vmem:[%s5098_s29 + $0xc8] sm:$0xff]  ;;  %v4300_v41 = vpack.i.bf16 %v379_v38, %v378_v37  ;;  %v382_v43 = vld [vmem:[%s5098_s29 + $0xf0] sm:$0xff]  ;;  %v383_v44 = vld [vmem:[%s5098_s29 + $0xf8] sm:$0xff] }
  0x1c   : > { %v4295_v42 = vpack.i.bf16 %v377_v40, %v376_v39  ;;  %v380_v45 = vld [vmem:[%s5098_s29 + $0xe0] sm:$0xff]  ;;  %v381_v46 = vld [vmem:[%s5098_s29 + $0xe8] sm:$0xff]  ;;  %v4310_v47 = vpack.i.bf16 %v383_v44, %v382_v43  ;;  %v386_v49 = vld [vmem:[%s5148_s10 + $0x10] sm:$0xff]  ;;  %s5034_s29 = smov 16  }
  0x1d   : > { %4261 = vrot.lane.b32.xlu1 %v4260_v17, %s5025_s30  ;;  %v4305_v48 = vpack.i.bf16 %v381_v46, %v380_v45  ;;  %v387_v50 = vld [vmem:[%s5148_s10 + $0x18] sm:$0xff]  ;;  %v384_v51 = vld [vmem:[%s5148_s10] sm:$0xff]  ;;  %v385_v52 = vld [vmem:[%s5148_s10 + $0x8] sm:$0xff] }
  0x1e   : > { %4256 = vrot.lane.b32.xlu0 %v4255_v18, %s5025_s30  ;;  %v4320_v53 = vpack.i.bf16 %v387_v50, %v386_v49  ;;  %v4315_v54 = vpack.i.bf16 %v385_v52, %v384_v51  ;;  %v390_v55 = vld [vmem:[%s5148_s10 + $0x30] sm:$0xff]  ;;  %v391_v56 = vld [vmem:[%s5148_s10 + $0x38] sm:$0xff]  ;;  %v388_v57 = vld [vmem:[%s5148_s10 + $0x20] sm:$0xff] }
  0x1f   : > { %v389_v58 = vld [vmem:[%s5148_s10 + $0x28] sm:$0xff]  ;;  %v4330_v60 = vpack.i.bf16 %v391_v56, %v390_v55  ;;  %v394_v61 = vld [vmem:[%s5148_s10 + $0x50] sm:$0xff]  ;;  %v395_v63 = vld [vmem:[%s5148_s10 + $0x58] sm:$0xff] }
  0x20   : > { %v4325_v62 = vpack.i.bf16 %v389_v58, %v388_v57  ;;  %v4972_v1 = vld [vmem:[%s8469_s3 + $0x8] sm:$0xff]   ;;  %v392_v2 = vld [vmem:[%s5148_s10 + $0x40] sm:$0xff]  ;;  %v398_v4 = vld [vmem:[%s5148_s10 + $0x70] sm:$0xff]  ;;  %v4340_v6 = vpack.i.bf16 %v395_v63, %v394_v61 }
  0x21   : > { %4271 = vrot.lane.b32.xlu1 %v4270_v23, %s5025_s30  ;;  %v393_v3 = vld [vmem:[%s5148_s10 + $0x48] sm:$0xff]  ;;  %4153 = vmatprep.subr.bf16.mxu0 %v4972_v1  ;;  %v4973_v5 = vld [vmem:[%s8469_s3 + $0x10] sm:$0xff]   ;;  %v399_v7 = vld [vmem:[%s5148_s10 + $0x78] sm:$0xff] }
  0x22   : > { %4266 = vrot.lane.b32.xlu0 %v4265_v24, %s5025_s30  ;;  %v396_v8 = vld [vmem:[%s5148_s10 + $0x60] sm:$0xff]  ;;  %v4335_v9 = vpack.i.bf16 %v393_v3, %v392_v2  ;;  %v397_v10 = vld [vmem:[%s5148_s10 + $0x68] sm:$0xff]  ;;  %4154 = vmatpush3.bf16.msra.mxu0 %v4972_v1  ;;  %v4974_v11 = vld [vmem:[%s8469_s3 + $0x18] ss:$0 sps:$4 sm:$0xff]   ;;  %v4350_v14 = vpack.i.bf16 %v399_v7, %v398_v4 }
  0x23   : > { %v402_v12 = vld [vmem:[%s5148_s10 + $0x90] sm:$0xff]  ;;  %v403_v13 = vld [vmem:[%s5148_s10 + $0x98] sm:$0xff]  ;;  %4155 = vmatprep.subr.bf16.mxu0 %v4973_v5  ;;  %v400_v15 = vld [vmem:[%s5148_s10 + $0x80] sm:$0xff]  ;;  %v4345_v17 = vpack.i.bf16 %v397_v10, %v396_v8  ;;  %v838_v18 = vsel %vm836_vm0, %v4974_v11, 0 }
  0x24   : > { %v401_v16 = vld [vmem:[%s5148_s10 + $0x88] sm:$0xff]  ;;  %v4360_v19 = vpack.i.bf16 %v403_v13, %v402_v12  ;;  %v406_v21 = vld [vmem:[%s5148_s10 + $0xb0] sm:$0xff]  ;;  %v407_v22 = vld [vmem:[%s5148_s10 + $0xb8] sm:$0xff] }
  0x25   : > { %4281 = vrot.lane.b32.xlu1 %v4280_v29, %s5025_s30  ;;  %v4355_v20 = vpack.i.bf16 %v401_v16, %v400_v15  ;;  %v404_v23 = vld [vmem:[%s5148_s10 + $0xa0] sm:$0xff]  ;;  %v405_v24 = vld [vmem:[%s5148_s10 + $0xa8] sm:$0xff]  ;;  %v4370_v25 = vpack.i.bf16 %v407_v22, %v406_v21  ;;  %v410_v27 = vld [vmem:[%s5148_s10 + $0xd0] sm:$0xff]  ;;  %v5027_v16 = vmov 1  }
  0x26   : > { %4276 = vrot.lane.b32.xlu0 %v4275_v30, %s5025_s30  ;;  %4156 = vmatpush3.bf16.msra.mxu0 %v4973_v5  ;;  %v4365_v26 = vpack.i.bf16 %v405_v24, %v404_v23  ;;  %v411_v28 = vld [vmem:[%s5148_s10 + $0xd8] sm:$0xff]  ;;  %v408_v29 = vld [vmem:[%s5148_s10 + $0xc0] sm:$0xff]  ;;  %v409_v30 = vld [vmem:[%s5148_s10 + $0xc8] sm:$0xff] }
  0x27   : > { %4209 = vmatprep.subr.msk.bf16.mxu0 %vm836_vm0, %v4974_v11  ;;  %v4380_v31 = vpack.i.bf16 %v411_v28, %v410_v27  ;;  %v4375_v32 = vpack.i.bf16 %v409_v30, %v408_v29  ;;  %v414_v33 = vld [vmem:[%s5148_s10 + $0xf0] sm:$0xff]  ;;  %v415_v34 = vld [vmem:[%s5148_s10 + $0xf8] sm:$0xff]  ;;  %v5218_v39 = vld [vmem:[%s8472_s6 + $0x8] sm:$0xff] }
  0x28   : > { %v4390_v37 = vpack.i.bf16 %v415_v34, %v414_v33  ;;  %v5223_v40 = vld [vmem:[%s8472_s6] sm:$0xff]  ;;  %v5247_v44 = vld [vmem:[%s8472_s6 + $0x28] sm:$0xff]  ;;  %v5254_v45 = vld [vmem:[%s8472_s6 + $0x30] sm:$0xff] }
  0x29   : > { %4291 = vrot.lane.b32.xlu1 %v4290_v35, %s5025_s30  ;;  %v412_v35 = vld [vmem:[%s5148_s10 + $0xe0] sm:$0xff]  ;;  %8612 = vst [vmem:[#allocation2_spill] sm:$0xff] %v5254_v45  ;;  %v5259_v46 = vld [vmem:[%s8472_s6 + $0x38] sm:$0xff]  ;;  %v5278_v49 = vld [vmem:[%s8472_s6 + $0x50] sm:$0xff] }
  0x2a   : > { %4286 = vrot.lane.b32.xlu0 %v4285_v36, %s5025_s30  ;;  %4158 = vmatpush3.bf16.msra.mxu0 %v838_v18  ;;  %v413_v36 = vld [vmem:[%s5148_s10 + $0xe8] sm:$0xff]  ;;  %v5242_v43 = vld [vmem:[%s8472_s6 + $0x20] sm:$0xff]  ;;  %8615 = vst [vmem:[#allocation5_spill] sm:$0xff] %v5278_v49  ;;  %v5283_v50 = vld [vmem:[%s8472_s6 + $0x58] sm:$0xff]  ;;  %s5040_s10 = smov 96  }
  0x2b   : > { %3793 = vmatprep.subr.bf16.mxu0 %v8474_v0  ;;  %v4385_v38 = vpack.i.bf16 %v413_v36, %v412_v35  ;;  %v5290_v51 = vld [vmem:[%s8472_s6 + $0x60] sm:$0xff]  ;;  %v5295_v52 = vld [vmem:[%s8472_s6 + $0x68] sm:$0xff]  ;;  %v5326_v57 = vld [vmem:[%s8472_s6 + $0x90] sm:$0xff] }
  0x2c   : > { %8616 = vst [vmem:[#allocation6_spill] sm:$0xff] %v5290_v51  ;;  %v5314_v55 = vld [vmem:[%s8472_s6 + $0x80] sm:$0xff]  ;;  %v5319_v56 = vld [vmem:[%s8472_s6 + $0x88] sm:$0xff]  ;;  %v5331_v58 = vld [vmem:[%s8472_s6 + $0x98] sm:$0xff] }
  0x2d   : > { %4301 = vrot.lane.b32.xlu1 %v4300_v41, %s5025_s30  ;;  %v5230_v41 = vld [vmem:[%s8472_s6 + $0x10] sm:$0xff]  ;;  %v5362_v63 = vld [vmem:[%s8472_s6 + $0xc0] sm:$0xff]  ;;  %v5367_v1 = vld [vmem:[%s8472_s6 + $0xc8] sm:$0xff] }
  0x2e   : > { %4296 = vrot.lane.b32.xlu0 %v4295_v42, %s5025_s30  ;;  %v5235_v42 = vld [vmem:[%s8472_s6 + $0x18] sm:$0xff]  ;;  %v5350_v61 = vld [vmem:[%s8472_s6 + $0xb0] sm:$0xff]  ;;  %v5395_v8 = vld [vmem:[%s8472_s6 + $0xe8] sm:$0xff] }
  0x2f   : > { %v5374_v2 = vld [vmem:[%s8472_s6 + $0xd0] sm:$0xff]  ;;  %v5381_v4 = vld [vmem:[%s8472_s6 + $0xd8] sm:$0xff] }
  0x30   : > { %v5402_v10 = vld [vmem:[%s8472_s6 + $0xf0] sm:$0xff]  ;;  %v5409_v12 = vld [vmem:[%s8472_s6 + $0xf8] sm:$0xff] }
  0x31   : > { %4311 = vrot.lane.b32.xlu1 %v4310_v47, %s5025_s30  ;;  %v5266_v47 = vld [vmem:[%s8472_s6 + $0x40] sm:$0xff]  ;;  %v322_v28 = vld [vmem:[%s5442_s23 + $0x10] sm:$0xff]  ;;  %v323_v29 = vld [vmem:[%s5442_s23 + $0x18] sm:$0xff] }
  0x32   : > { %4306 = vrot.lane.b32.xlu0 %v4305_v48, %s5025_s30  ;;  %8613 = vst [vmem:[#allocation3_spill] sm:$0xff] %v5266_v47  ;;  %v5271_v48 = vld [vmem:[%s8472_s6 + $0x48] sm:$0xff]  ;;  %s5035_s30 = smov 32  }
  0x33   : > { %8614 = vst [vmem:[#allocation4_spill] sm:$0xff] %v5271_v48 }
  0x35   : > { %4321 = vrot.lane.b32.xlu1 %v4320_v53, %s5026_s13  ;;  %v5302_v53 = vld [vmem:[%s8472_s6 + $0x70] sm:$0xff] }
  0x36   : > { %4316 = vrot.lane.b32.xlu0 %v4315_v54, %s5026_s13  ;;  %v5307_v54 = vld [vmem:[%s8472_s6 + $0x78] sm:$0xff] }
  0x39   : > { %4331 = vrot.lane.b32.xlu1 %v4330_v60, %s5026_s13  ;;  %v5343_v60 = vld [vmem:[%s8472_s6 + $0xa8] sm:$0xff] }
  0x3a   : > { %4326 = vrot.lane.b32.xlu0 %v4325_v62, %s5026_s13  ;;  %v5355_v62 = vld [vmem:[%s8472_s6 + $0xb8] sm:$0xff] }
  0x3d   : > { %4341 = vrot.lane.b32.xlu1 %v4340_v6, %s5026_s13  ;;  %v5388_v6 = vld [vmem:[%s8472_s6 + $0xe0] sm:$0xff] }
  0x3e   : > { %4336 = vrot.lane.b32.xlu0 %v4335_v9, %s5026_s13 }
  0x41   : > { %4351 = vrot.lane.b32.xlu1 %v4350_v14, %s5026_s13 }
  0x42   : > { %4346 = vrot.lane.b32.xlu0 %v4345_v17, %s5026_s13 }
  0x45   : > { %4361 = vrot.lane.b32.xlu1 %v4360_v19, %s5026_s13 }
  0x46   : > { %4356 = vrot.lane.b32.xlu0 %v4355_v20, %s5026_s13 }
  0x49   : > { %4371 = vrot.lane.b32.xlu1 %v4370_v25, %s5026_s13 }
  0x4a   : > { %4366 = vrot.lane.b32.xlu0 %v4365_v26, %s5026_s13 }
  0x4d   : > { %4381 = vrot.lane.b32.xlu1 %v4380_v31, %s5026_s13  ;;  %v320_v31 = vld [vmem:[%s5442_s23] sm:$0xff] }
  0x4e   : > { %4376 = vrot.lane.b32.xlu0 %v4375_v32, %s5026_s13  ;;  %v321_v32 = vld [vmem:[%s5442_s23 + $0x8] sm:$0xff] }
  0x51   : > { %4391 = vrot.lane.b32.xlu1 %v4390_v37, %s5026_s13 }
  0x52   : > { %4386 = vrot.lane.b32.xlu0 %v4385_v38, %s5026_s13 }
  0x55   : > { %1139 = vperm.xlu1 %4396, %v5218_v39  }
  0x56   : > { %1134 = vperm.xlu0 %4395, %v5223_v40  }
  0x59   : > { %1144 = vperm.xlu1 %4396, %v5230_v41  }
  0x5a   : > { %1149 = vperm.xlu0 %4395, %v5235_v42  }
  0x5d   : > { %1154 = vperm.xlu1 %4396, %v5242_v43  }
  0x5e   : > { %1159 = vperm.xlu0 %4395, %v5247_v44  }
  0x61   : > { %1164 = vperm.xlu1 %4396, %v5254_v45  }
  0x62   : > { %1169 = vperm.xlu0 %4395, %v5259_v46  }
  0x65   : > { %1174 = vperm.xlu1 %4396, %v5266_v47  }
  0x66   : > { %1179 = vperm.xlu0 %4395, %v5271_v48  }
  0x69   : > { %1184 = vperm.xlu1 %4396, %v5278_v49  }
  0x6a   : > { %1189 = vperm.xlu0 %4395, %v5283_v50  }
  0x6d   : > { %1194 = vperm.xlu1 %4396, %v5290_v51  }
  0x6e   : > { %1199 = vperm.xlu0 %4395, %v5295_v52  }
  0x71   : > { %1204 = vperm.xlu1 %4396, %v5302_v53  }
  0x72   : > { %1209 = vperm.xlu0 %4395, %v5307_v54  }
  0x75   : > { %1214 = vperm.xlu1 %4396, %v5314_v55  }
  0x76   : > { %1219 = vperm.xlu0 %4395, %v5319_v56  }
  0x79   : > { %1224 = vperm.xlu1 %4396, %v5326_v57  }
  0x7a   : > { %1229 = vperm.xlu0 %4395, %v5331_v58  }
  0x7d   : > { %1234 = vperm.xlu1 %4396, %v5338_v59  }
  0x7e   : > { %1239 = vperm.xlu0 %4395, %v5343_v60  }
  0x81   : > { %1244 = vperm.xlu1 %4396, %v5350_v61  }
  0x82   : > { %1249 = vperm.xlu0 %4395, %v5355_v62  }
  0x85   : > { %1254 = vperm.xlu1 %4396, %v5362_v63  }
  0x86   : > { %1259 = vperm.xlu0 %4395, %v5367_v1  }
  0x87   : > { %v5376_v3 = vpop.permute.xlu1 %4246 }
  0x88   : > { %v4237_v5 = vpop.permute.xlu0 %4236 }
  0x89   : > { %1264 = vperm.xlu1 %4396, %v5374_v2   ;;  %v4239_v26 = vunpack.i.h.bf16 %v4237_v5  ;;  %v4238_v27 = vunpack.i.l.bf16 %v4237_v5 }
  0x8a   : > { %1269 = vperm.xlu0 %4395, %v5381_v4  }
  0x8b   : > { %v5390_v7 = vpop.permute.xlu1 %4251  ;;  %v673_v5 = vsel %vm672_vm1, %v320_v31, %v4238_v27 }
  0x8c   : > { %v4242_v9 = vpop.permute.xlu0 %4241 }
  0x8d   : > { %1274 = vperm.xlu1 %4396, %v5388_v6   ;;  %v4244_v23 = vunpack.i.h.bf16 %v4242_v9  ;;  %v4243_v24 = vunpack.i.l.bf16 %v4242_v9  ;;  %v674_v9 = vsel %vm672_vm1, %v321_v32, %v4239_v26 }
  0x8e   : > { %1279 = vperm.xlu0 %4395, %v5395_v8  }
  0x8f   : > { %v5404_v11 = vpop.permute.xlu1 %4261  ;;  %v675_v33 = vsel %vm672_vm1, %v322_v28, %v4243_v24  ;;  %v676_v34 = vsel %vm672_vm1, %v323_v29, %v4244_v23  ;;  %v4248_v24 = vunpack.i.l.bf16 %v5376_v3  ;;  %v324_v29 = vld [vmem:[%s5442_s23 + $0x20] sm:$0xff] }
  0x90   : > { %v5411_v13 = vpop.permute.xlu0 %4256 }
  0x91   : > { %1284 = vperm.xlu1 %4396, %v5402_v10   ;;  %v4259_v32 = vunpack.i.h.bf16 %v5411_v13 }
  0x92   : > { %1289 = vperm.xlu0 %4395, %v5409_v12  }
  0x93   : > { %v5415_v14 = vpop.permute.xlu1 %4271 }
  0x94   : > { %v5417_v15 = vpop.permute.xlu0 %4266 }
  0x95   : > { %4397 = vset.pattern.permute.xlu1 %v5027_v16 }
  0x96   : > { %4398 = vset.pattern.permute.xlu0 %v5027_v16  ;;  %1325 = vperm.xlu1 %4397, %v5223_v40  }
  0x97   : > { %1329 = vperm.xlu0 %4398, %v5218_v39   ;;  %v5421_v17 = vpop.permute.xlu1 %4281 }
  0x98   : > { %v5423_v18 = vpop.permute.xlu0 %4276 }
  0x9a   : > { %1333 = vperm.xlu1 %4397, %v5230_v41  }
  0x9b   : > { %1341 = vperm.xlu0 %4398, %v5242_v43   ;;  %v5427_v19 = vpop.permute.xlu1 %4291 }
  0x9c   : > { %v5429_v20 = vpop.permute.xlu0 %4286 }
  0x9e   : > { %1337 = vperm.xlu1 %4397, %v5235_v42  }
  0x9f   : > { %1349 = vperm.xlu0 %4398, %v5254_v45   ;;  %v5433_v21 = vpop.permute.xlu1 %4301 }
  0xa0   : > { %v5435_v22 = vpop.permute.xlu0 %4296 }
  0xa2   : > { %1345 = vperm.xlu1 %4397, %v5247_v44  }
  0xa3   : > { %1357 = vperm.xlu0 %4398, %v5266_v47   ;;  %v5445_v25 = vpop.permute.xlu1 %4311  ;;  %v4249_v47 = vunpack.i.h.bf16 %v5376_v3 }
  0xa4   : > { %v5449_v30 = vpop.permute.xlu0 %4306 }
  0xa6   : > { %1353 = vperm.xlu1 %4397, %v5259_v46  }
  0xa7   : > { %1365 = vperm.xlu0 %4398, %v5278_v49   ;;  %v4322_v35 = vpop.permute.xlu1 %4321  ;;  %v329_v49 = vld [vmem:[%s5442_s23 + $0x48] sm:$0xff] }
  0xa8   : > { %v4324_v36 = vunpack.i.h.bf16 %v4322_v35  ;;  %v4323_v37 = vunpack.i.l.bf16 %v4322_v35  ;;  %v4317_v38 = vpop.permute.xlu0 %4316  ;;  %v325_v35 = vld [vmem:[%s5442_s23 + $0x28] sm:$0xff] }
  0xa9   : > { %v4319_v16 = vunpack.i.h.bf16 %v4317_v38  ;;  %v4318_v0 = vunpack.i.l.bf16 %v4317_v38  ;;  %v4253_v38 = vunpack.i.l.bf16 %v5390_v7 }
  0xaa   : > { %v708_v23 = vsel %vm705_vm2, %v675_v33, %v4323_v37  ;;  %v709_v28 = vsel %vm705_vm2, %v676_v34, %v4324_v36  ;;  %1361 = vperm.xlu1 %4397, %v5271_v48   ;;  %v4258_v33 = vunpack.i.l.bf16 %v5411_v13  ;;  %v4254_v37 = vunpack.i.h.bf16 %v5390_v7 }
  0xab   : > { %1373 = vperm.xlu0 %4398, %v5290_v51   ;;  %v4332_v27 = vpop.permute.xlu1 %4331  ;;  %v706_v26 = vsel %vm705_vm2, %v673_v5, %v4318_v0  ;;  %v707_v31 = vsel %vm705_vm2, %v674_v9, %v4319_v16  ;;  %v739_v3 = vpack.c.bf16 %v709_v28, %v708_v23  ;;  %v328_v51 = vld [vmem:[%s5442_s23 + $0x40] sm:$0xff]  ;;  %v677_v5 = vsel %vm672_vm1, %v324_v29, %v4248_v24  ;;  %v326_v16 = vld [vmem:[%s5442_s23 + $0x30] sm:$0xff]  ;;  %v327_v23 = vld [vmem:[%s5442_s23 + $0x38] sm:$0xff] }
  0xac   : > { %v4327_v34 = vpop.permute.xlu0 %4326  ;;  %v738_v36 = vpack.c.bf16 %v707_v31, %v706_v26  ;;  %v678_v9 = vsel %vm672_vm1, %v325_v35, %v4249_v47  ;;  %v4334_v28 = vunpack.i.h.bf16 %v4332_v27  ;;  %v4333_v48 = vunpack.i.l.bf16 %v4332_v27 }
  0xad   : > { %v4329_v45 = vunpack.i.h.bf16 %v4327_v34  ;;  %v4328_v0 = vunpack.i.l.bf16 %v4327_v34  ;;  %v681_v24 = vsel %vm672_vm1, %v328_v51, %v4258_v33  ;;  %v682_v47 = vsel %vm672_vm1, %v329_v49, %v4259_v32 }
  0xae   : > { %4159 = vmatprep.mubr.msk.bf16.mxu0 %vm787_vm3, %v738_v36  ;;  %1369 = vperm.xlu1 %4397, %v5283_v50   ;;  %v679_v27 = vsel %vm672_vm1, %v326_v16, %v4253_v38  ;;  %v680_v26 = vsel %vm672_vm1, %v327_v23, %v4254_v37  ;;  %v4269_v32 = vunpack.i.h.bf16 %v5417_v15  ;;  %v4268_v33 = vunpack.i.l.bf16 %v5417_v15  ;;  %v330_v23 = vld [vmem:[%s5442_s23 + $0x50] sm:$0xff] }
  0xaf   : > { %v710_v13 = vsel %vm705_vm2, %v677_v5, %v4328_v0  ;;  %v711_v7 = vsel %vm705_vm2, %v678_v9, %v4329_v45  ;;  %1381 = vperm.xlu0 %4398, %v5302_v53   ;;  %4160 = vmatmul.mubr.msk.bf16.vlgmr.msra.gmra.mrb[0].mxu0 %vm787_vm3, %v739_v3  ;;  %v712_v45 = vsel %vm705_vm2, %v679_v27, %v4333_v48  ;;  %v4342_v3 = vpop.permute.xlu1 %4341  ;;  %v4264_v38 = vunpack.i.h.bf16 %v5404_v11  ;;  %v332_v5 = vld [vmem:[%s5442_s23 + $0x60] sm:$0xff]  ;;  %v333_v9 = vld [vmem:[%s5442_s23 + $0x68] sm:$0xff] }
  0xb0   : > { %v4337_v29 = vpop.permute.xlu0 %4336  ;;  %v740_v35 = vpack.c.bf16 %v711_v7, %v710_v13  ;;  %v713_v36 = vsel %vm705_vm2, %v680_v26, %v4334_v28  ;;  %v4263_v0 = vunpack.i.l.bf16 %v5404_v11  ;;  %v331_v28 = vld [vmem:[%s5442_s23 + $0x58] sm:$0xff]  ;;  %v4344_v13 = vunpack.i.h.bf16 %v4342_v3 }
  0xb1   : > { %v4339_v31 = vunpack.i.h.bf16 %v4337_v29  ;;  %v4338_v34 = vunpack.i.l.bf16 %v4337_v29  ;;  %v741_v16 = vpack.c.bf16 %v713_v36, %v712_v45  ;;  %v4343_v7 = vunpack.i.l.bf16 %v4342_v3 }
  0xb2   : > { %4163 = vmatprep.mubr.msk.bf16.mxu0 %vm787_vm3, %v740_v35  ;;  %1377 = vperm.xlu1 %4397, %v5295_v52   ;;  %v685_v15 = vsel %vm672_vm1, %v332_v5, %v4268_v33  ;;  %v686_v29 = vsel %vm672_vm1, %v333_v9, %v4269_v32  ;;  %v683_v35 = vsel %vm672_vm1, %v330_v23, %v4263_v0  ;;  %v4279_v36 = vunpack.i.h.bf16 %v5423_v18  ;;  %v336_v33 = vld [vmem:[%s5442_s23 + $0x80] sm:$0xff]  ;;  %v335_v0 = vld [vmem:[%s5442_s23 + $0x78] sm:$0xff] }
  0xb3   : > { %v714_v49 = vsel %vm705_vm2, %v681_v24, %v4338_v34  ;;  %v715_v51 = vsel %vm705_vm2, %v682_v47, %v4339_v31  ;;  %1389 = vperm.xlu0 %4398, %v5314_v55   ;;  %v4352_v11 = vpop.permute.xlu1 %4351  ;;  %v684_v27 = vsel %vm672_vm1, %v331_v28, %v4264_v38  ;;  %v716_v26 = vsel %vm705_vm2, %v683_v35, %v4343_v7  ;;  %v334_v38 = vld [vmem:[%s5442_s23 + $0x70] sm:$0xff] }
  0xb4   : > { %v4347_v48 = vpop.permute.xlu0 %4346  ;;  %v742_v37 = vpack.c.bf16 %v715_v51, %v714_v49  ;;  %v717_v31 = vsel %vm705_vm2, %v684_v27, %v4344_v13  ;;  %v4278_v3 = vunpack.i.l.bf16 %v5423_v18  ;;  %v4274_v51 = vunpack.i.h.bf16 %v5415_v14 }
  0xb5   : > { %v4349_v24 = vunpack.i.h.bf16 %v4347_v48  ;;  %v4348_v47 = vunpack.i.l.bf16 %v4347_v48  ;;  %v4273_v32 = vunpack.i.l.bf16 %v5415_v14  ;;  %v337_v48 = vld [vmem:[%s5442_s23 + $0x88] sm:$0xff]  ;;  %v4354_v5 = vunpack.i.h.bf16 %v4352_v11 }
  0xb6   : > { %1385 = vperm.xlu1 %4397, %v5307_v54   ;;  %v4353_v9 = vunpack.i.l.bf16 %v4352_v11  ;;  %v689_v18 = vsel %vm672_vm1, %v336_v33, %v4278_v3  ;;  %v690_v14 = vsel %vm672_vm1, %v337_v48, %v4279_v36  ;;  %v4289_v35 = vunpack.i.h.bf16 %v5429_v20  ;;  %v340_v36 = vld [vmem:[%s5442_s23 + $0xa0] sm:$0xff]  ;;  %v341_v3 = vld [vmem:[%s5442_s23 + $0xa8] sm:$0xff] }
  0xb7   : > { %1397 = vperm.xlu0 %4398, %v5326_v57   ;;  %4164 = vmatmul.mubr.msk.bf16.gmra.mrb[4].mxu0 %vm787_vm3, %v741_v16  ;;  %v718_v34 = vsel %vm705_vm2, %v685_v15, %v4348_v47  ;;  %v719_v45 = vsel %vm705_vm2, %v686_v29, %v4349_v24  ;;  %v4362_v16 = vpop.permute.xlu1 %4361  ;;  %v687_v7 = vsel %vm672_vm1, %v334_v38, %v4273_v32  ;;  %v4288_v27 = vunpack.i.l.bf16 %v5429_v20  ;;  %v339_v32 = vld [vmem:[%s5442_s23 + $0x98] sm:$0xff] }
  0xb8   : > { %4167 = vmatprep.mubr.msk.bf16.mxu0 %vm787_vm3, %v742_v37  ;;  %v4357_v49 = vpop.permute.xlu0 %4356  ;;  %v743_v37 = vpack.c.bf16 %v717_v31, %v716_v26  ;;  %v744_v23 = vpack.c.bf16 %v719_v45, %v718_v34  ;;  %v688_v24 = vsel %vm672_vm1, %v335_v0, %v4274_v51  ;;  %v720_v47 = vsel %vm705_vm2, %v687_v7, %v4353_v9  ;;  %v338_v51 = vld [vmem:[%s5442_s23 + $0x90] sm:$0xff] }
  0xb9   : > { %v4359_v28 = vunpack.i.h.bf16 %v4357_v49  ;;  %v4358_v13 = vunpack.i.l.bf16 %v4357_v49  ;;  %v721_v15 = vsel %vm705_vm2, %v688_v24, %v4354_v5  ;;  %v4284_v34 = vunpack.i.h.bf16 %v5421_v17 }
  0xba   : > { %1393 = vperm.xlu1 %4397, %v5319_v56   ;;  %v4283_v45 = vunpack.i.l.bf16 %v5421_v17  ;;  %v745_v49 = vpack.c.bf16 %v721_v15, %v720_v47  ;;  %v4364_v33 = vunpack.i.h.bf16 %v4362_v16  ;;  %v4363_v48 = vunpack.i.l.bf16 %v4362_v16 }
  0xbb   : > { %1405 = vperm.xlu0 %4398, %v5338_v59   ;;  %v722_v29 = vsel %vm705_vm2, %v689_v18, %v4358_v13  ;;  %v723_v11 = vsel %vm705_vm2, %v690_v14, %v4359_v28  ;;  %v4372_v26 = vpop.permute.xlu1 %4371  ;;  %v693_v20 = vsel %vm672_vm1, %v340_v36, %v4288_v27  ;;  %v694_v17 = vsel %vm672_vm1, %v341_v3, %v4289_v35  ;;  %v342_v27 = vld [vmem:[%s5442_s23 + $0xb0] sm:$0xff] }
  0xbc   : > { %v4367_v31 = vpop.permute.xlu0 %4366  ;;  %v691_v5 = vsel %vm672_vm1, %v338_v51, %v4283_v45  ;;  %v692_v9 = vsel %vm672_vm1, %v339_v32, %v4284_v34  ;;  %v4299_v7 = vunpack.i.h.bf16 %v5435_v22  ;;  %v4298_v24 = vunpack.i.l.bf16 %v5435_v22 }
  0xbd   : > { %v4369_v38 = vunpack.i.h.bf16 %v4367_v31  ;;  %v4368_v0 = vunpack.i.l.bf16 %v4367_v31  ;;  %v724_v16 = vsel %vm705_vm2, %v691_v5, %v4363_v48  ;;  %v4294_v47 = vunpack.i.h.bf16 %v5427_v19  ;;  %v343_v31 = vld [vmem:[%s5442_s23 + $0xb8] sm:$0xff] }
  0xbe   : > { %1401 = vperm.xlu1 %4397, %v5331_v58   ;;  %v4293_v15 = vunpack.i.l.bf16 %v5427_v19  ;;  %v4374_v34 = vunpack.i.h.bf16 %v4372_v26  ;;  %v4373_v45 = vunpack.i.l.bf16 %v4372_v26  ;;  %v4308_v5 = vunpack.i.l.bf16 %v5449_v30 }
  0xbf   : > { %1413 = vperm.xlu0 %4398, %v5350_v61   ;;  %4168 = vmatmul.mubr.msk.bf16.gmra.mrb[8].mxu0 %vm787_vm3, %v743_v37  ;;  %v746_v37 = vpack.c.bf16 %v723_v11, %v722_v29  ;;  %v5558_v28 = vpop.permute.xlu1 %4381  ;;  %v726_v13 = vsel %vm705_vm2, %v693_v20, %v4368_v0  ;;  %v727_v18 = vsel %vm705_vm2, %v694_v17, %v4369_v38  ;;  %v344_v29 = vld [vmem:[%s5442_s23 + $0xc0] sm:$0xff]  ;;  %v345_v11 = vld [vmem:[%s5442_s23 + $0xc8] sm:$0xff]  ;;  %v5028_v20 = vmov 2  }
  0xc0   : > { %4171 = vmatprep.mubr.msk.bf16.mxu0 %vm787_vm3, %v744_v23  ;;  %v725_v23 = vsel %vm705_vm2, %v692_v9, %v4364_v33  ;;  %v4377_v14 = vpop.permute.xlu0 %4376  ;;  %v748_v36 = vpack.c.bf16 %v727_v18, %v726_v13  ;;  %v697_v22 = vsel %vm672_vm1, %v344_v29, %v4298_v24  ;;  %v698_v19 = vsel %vm672_vm1, %v345_v11, %v4299_v7  ;;  %v348_v13 = vld [vmem:[%s5442_s23 + $0xe0] sm:$0xff]  ;;  %v349_v18 = vld [vmem:[%s5442_s23 + $0xe8] sm:$0xff]  ;;  %v346_v24 = vld [vmem:[%s5442_s23 + $0xd0] sm:$0xff] }
  0xc1   : > { %v747_v35 = vpack.c.bf16 %v725_v23, %v724_v16  ;;  %v4379_v3 = vunpack.i.h.bf16 %v4377_v14  ;;  %v695_v32 = vsel %vm672_vm1, %v342_v27, %v4293_v15  ;;  %v696_v26 = vsel %vm672_vm1, %v343_v31, %v4294_v47  ;;  %v347_v47 = vld [vmem:[%s5442_s23 + $0xd8] sm:$0xff] }
  0xc2   : > { %1409 = vperm.xlu1 %4397, %v5343_v60   ;;  %v728_v48 = vsel %vm705_vm2, %v695_v32, %v4373_v45  ;;  %v4309_v17 = vunpack.i.h.bf16 %v5449_v30  ;;  %v4304_v16 = vunpack.i.h.bf16 %v5433_v21  ;;  %v4303_v23 = vunpack.i.l.bf16 %v5433_v21 }
  0xc3   : > { %1421 = vperm.xlu0 %4398, %v5362_v63   ;;  %v5577_v51 = vpop.permute.xlu1 %4391  ;;  %v731_v0 = vsel %vm705_vm2, %v698_v19, %v4379_v3  ;;  %v4384_v15 = vunpack.i.h.bf16 %v5558_v28  ;;  %v4383_v29 = vunpack.i.l.bf16 %v5558_v28  ;;  %v701_v21 = vsel %vm672_vm1, %v348_v13, %v4308_v5 }
  0xc4   : > { %v4387_v33 = vpop.permute.xlu0 %4386  ;;  %v702_v27 = vsel %vm672_vm1, %v349_v18, %v4309_v17  ;;  %v699_v28 = vsel %vm672_vm1, %v346_v24, %v4303_v23  ;;  %v4314_v32 = vunpack.i.h.bf16 %v5445_v25  ;;  %v8625_v18 = vld [vmem:[#allocation4_spill] sm:$0xff] }
  0xc5   : > { %v4389_v11 = vunpack.i.h.bf16 %v4387_v33 }
  0xc6   : > { %1417 = vperm.xlu1 %4397, %v5355_v62  }
  0xc7   : > { %1429 = vperm.xlu0 %4398, %v5374_v2   ;;  %4172 = vmatmul.mubr.msk.bf16.gmra.mrb[12].mxu0 %vm787_vm3, %v745_v49  ;;  %v4378_v49 = vunpack.i.l.bf16 %v4377_v14 }
  0xc8   : > { %4175 = vmatprep.mubr.msk.bf16.mxu0 %vm787_vm3, %v746_v37  ;;  %v729_v37 = vsel %vm705_vm2, %v696_v26, %v4374_v34  ;;  %v700_v34 = vsel %vm672_vm1, %v347_v47, %v4304_v16  ;;  %v4313_v26 = vunpack.i.l.bf16 %v5445_v25 }
  0xc9   : > { %v730_v38 = vsel %vm705_vm2, %v697_v22, %v4378_v49  ;;  %v749_v7 = vpack.c.bf16 %v729_v37, %v728_v48  ;;  %v733_v3 = vsel %vm705_vm2, %v700_v34, %v4384_v15  ;;  %v735_v22 = vsel %vm705_vm2, %v702_v27, %v4389_v11  ;;  %v350_v37 = vld [vmem:[%s5442_s23 + $0xf0] sm:$0xff]  ;;  %v8628_v15 = vld [vmem:[#allocation2_spill] sm:$0xff]  ;;  %v8631_v11 = vld [vmem:[#allocation3_spill] sm:$0xff] }
  0xca   : > { %1425 = vperm.xlu1 %4397, %v5367_v1   ;;  %v750_v30 = vpack.c.bf16 %v731_v0, %v730_v38  ;;  %v351_v38 = vld [vmem:[%s5442_s23 + $0xf8] sm:$0xff]  ;;  %v4394_v0 = vunpack.i.h.bf16 %v5577_v51  ;;  %v703_v25 = vsel %vm672_vm1, %v350_v37, %v4313_v26 }
  0xcb   : > { %1437 = vperm.xlu0 %4398, %v5388_v6   ;;  %v704_v16 = vsel %vm672_vm1, %v351_v38, %v4314_v32  ;;  %v8634_v27 = vld [vmem:[#allocation5_spill] sm:$0xff] }
  0xce   : > { %1433 = vperm.xlu1 %4397, %v5381_v4  }
  0xcf   : > { %1445 = vperm.xlu0 %4398, %v5402_v10   ;;  %4176 = vmatmul.mubr.msk.bf16.gmra.mrb[16].mxu0 %vm787_vm3, %v747_v35  ;;  %v4388_v35 = vunpack.i.l.bf16 %v4387_v33 }
  0xd0   : > { %4179 = vmatprep.mubr.msk.bf16.mxu0 %vm787_vm3, %v748_v36  ;;  %v732_v36 = vsel %vm705_vm2, %v699_v28, %v4383_v29 }
  0xd1   : > { %v734_v49 = vsel %vm705_vm2, %v701_v21, %v4388_v35  ;;  %v751_v48 = vpack.c.bf16 %v733_v3, %v732_v36  ;;  %v8637_v36 = vld [vmem:[#allocation6_spill] sm:$0xff] }
  0xd2   : > { %1441 = vperm.xlu1 %4397, %v5395_v8   ;;  %v752_v17 = vpack.c.bf16 %v735_v22, %v734_v49 }
  0xd3   : > { %4399 = vset.pattern.permute.xlu0 %v5028_v20 }
  0xd4   : > { %1550 = vperm.xlu0 %4399, %v5223_v40   ;;  %v5590_v9 = vpop.permute.xlu1 %1139 }
  0xd5   : > { %8617 = vst [vmem:[#allocation7_spill] sm:$0xff] %v5590_v9  ;;  %v5596_v14 = vpop.permute.xlu0 %1134 }
  0xd6   : > { %8618 = vst [vmem:[#allocation8_spill] sm:$0xff] %v5596_v14  ;;  %1449 = vperm.xlu1 %4397, %v5409_v12  }
  0xd7   : > { %4180 = vmatmul.mubr.msk.bf16.gmra.mrb[20].mxu0 %vm787_vm3, %v749_v7 }
  0xd8   : > { %1562 = vperm.xlu0 %4399, %v5235_v42   ;;  %4183 = vmatprep.mubr.msk.bf16.mxu0 %vm787_vm3, %v750_v30  ;;  %v5608_v31 = vpop.permute.xlu1 %1144 }
  0xd9   : > { %8619 = vst [vmem:[#allocation9_spill] sm:$0xff] %v5608_v31  ;;  %v5612_v45 = vpop.permute.xlu0 %1149 }
  0xda   : > { %8620 = vst [vmem:[#allocation10_spill] sm:$0xff] %v5612_v45  ;;  %4400 = vset.pattern.permute.xlu1 %v5028_v20  ;;  %v4393_v20 = vunpack.i.l.bf16 %v5577_v51  ;;  %v737_v51 = vsel %vm705_vm2, %v704_v16, %v4394_v0 }
  0xdb   : > { %1554 = vperm.xlu1 %4400, %v5218_v39  }
  0xdc   : > { %1570 = vperm.xlu0 %4399, %v5247_v44   ;;  %v5620_v19 = vpop.permute.xlu1 %1154  ;;  %v736_v13 = vsel %vm705_vm2, %v703_v25, %v4393_v20 }
  0xdd   : > { %8621 = vst [vmem:[#allocation11_spill] sm:$0xff] %v5620_v19  ;;  %v5624_v33 = vpop.permute.xlu0 %1159  ;;  %v753_v47 = vpack.c.bf16 %v737_v51, %v736_v13 }
  0xde   : > { %8622 = vst [vmem:[#allocation12_spill] sm:$0xff] %v5624_v33 }
  0xdf   : > { %4184 = vmatmul.mubr.msk.bf16.gmra.mrb[24].mxu0 %vm787_vm3, %v751_v48  ;;  %1558 = vperm.xlu1 %4400, %v5230_v41  }
  0xe0   : > { %1578 = vperm.xlu0 %4399, %v5259_v46   ;;  %4187 = vmatprep.mubr.msk.bf16.mxu0 %vm787_vm3, %v752_v17  ;;  %v5634_v5 = vpop.permute.xlu1 %1164 }
  0xe1   : > { %8623 = vst [vmem:[#allocation13_spill] sm:$0xff] %v5634_v5  ;;  %v5638_v23 = vpop.permute.xlu0 %1169 }
  0xe2   : > { %8624 = vst [vmem:[#allocation14_spill] sm:$0xff] %v5638_v23  ;;  %v5029_v23 = vmov 3  }
  0xe3   : > { %1566 = vperm.xlu1 %4400, %v5242_v43  }
  0xe4   : > { %1586 = vperm.xlu0 %4399, %v8625_v18   ;;  %v5644_v7 = vpop.permute.xlu1 %1174 }
  0xe5   : > { %8626 = vst [vmem:[#allocation4_spill] sm:$0xff] %v5644_v7  ;;  %v5646_v24 = vpop.permute.xlu0 %1179 }
  0xe6   : > { %8627 = vst [vmem:[#allocation15_spill] sm:$0xff] %v5646_v24 }
  0xe7   : > { %4188 = vmatmul.mubr.msk.bf16.gmra.mrb[28].mxu0 %vm787_vm3, %v753_v47  ;;  %1574 = vperm.xlu1 %4400, %v8628_v15  }
  0xe8   : > { %1594 = vperm.xlu0 %4399, %v5283_v50   ;;  %v5651_v29 = vpop.permute.xlu1 %1184 }
  0xe9   : > { %8629 = vst [vmem:[#allocation2_spill] sm:$0xff] %v5651_v29  ;;  %v5653_v30 = vpop.permute.xlu0 %1189  ;;  %v5030_v29 = vmov 5  }
  0xea   : > { %8630 = vst [vmem:[#allocation16_spill] sm:$0xff] %v5653_v30 }
  0xeb   : > { %1582 = vperm.xlu1 %4400, %v8631_v11  }
  0xec   : > { %1602 = vperm.xlu0 %4399, %v5295_v52   ;;  %v5657_v35 = vpop.permute.xlu1 %1194 }
  0xed   : > { %8632 = vst [vmem:[#allocation3_spill] sm:$0xff] %v5657_v35  ;;  %v5659_v21 = vpop.permute.xlu0 %1199 }
  0xee   : > { %8633 = vst [vmem:[#allocation17_spill] sm:$0xff] %v5659_v21 }
  0xef   : > { %1590 = vperm.xlu1 %4400, %v8634_v27  }
  0xf0   : > { %1610 = vperm.xlu0 %4399, %v5307_v54   ;;  %v5663_v28 = vpop.permute.xlu1 %1204 }
  0xf1   : > { %8635 = vst [vmem:[#allocation5_spill] sm:$0xff] %v5663_v28  ;;  %v5665_v34 = vpop.permute.xlu0 %1209 }
  0xf2   : > { %8636 = vst [vmem:[#allocation18_spill] sm:$0xff] %v5665_v34 }
  0xf3   : > { %1598 = vperm.xlu1 %4400, %v8637_v36  }
  0xf4   : > { %1618 = vperm.xlu0 %4399, %v5319_v56   ;;  %v5669_v3 = vpop.permute.xlu1 %1214 }
  0xf5   : > { %8638 = vst [vmem:[#allocation6_spill] sm:$0xff] %v5669_v3  ;;  %v5671_v49 = vpop.permute.xlu0 %1219 }
  0xf6   : > { %8639 = vst [vmem:[#allocation19_spill] sm:$0xff] %v5671_v49 }
  0xf7   : > { %1606 = vperm.xlu1 %4400, %v5302_v53  }
  0xf8   : > { %1626 = vperm.xlu0 %4399, %v5331_v58   ;;  %v5675_v22 = vpop.permute.xlu1 %1224 }
  0xf9   : > { %8640 = vst [vmem:[#allocation20_spill] sm:$0xff] %v5675_v22  ;;  %v5677_v32 = vpop.permute.xlu0 %1229 }
  0xfa   : > { %8641 = vst [vmem:[#allocation21_spill] sm:$0xff] %v5677_v32 }
  0xfb   : > { %1614 = vperm.xlu1 %4400, %v5314_v55  }
  0xfc   : > { %1634 = vperm.xlu0 %4399, %v5343_v60   ;;  %v5681_v26 = vpop.permute.xlu1 %1234 }
  0xfd   : > { %8642 = vst [vmem:[#allocation22_spill] sm:$0xff] %v5681_v26  ;;  %v5683_v48 = vpop.permute.xlu0 %1239 }
  0xfe   : > { %8643 = vst [vmem:[#allocation23_spill] sm:$0xff] %v5683_v48 }
  0xff   : > { %1622 = vperm.xlu1 %4400, %v5326_v57  }
 0x100   : > { %1642 = vperm.xlu0 %4399, %v5355_v62   ;;  %v5687_v37 = vpop.permute.xlu1 %1244 }
 0x101   : > { %8644 = vst [vmem:[#allocation24_spill] sm:$0xff] %v5687_v37  ;;  %v5689_v38 = vpop.permute.xlu0 %1249 }
 0x102   : > { %8645 = vst [vmem:[#allocation25_spill] sm:$0xff] %v5689_v38 }
 0x103   : > { %1630 = vperm.xlu1 %4400, %v5338_v59  }
 0x104   : > { %1650 = vperm.xlu0 %4399, %v5367_v1   ;;  %v5693_v0 = vpop.permute.xlu1 %1254 }
 0x105   : > { %8646 = vst [vmem:[#allocation26_spill] sm:$0xff] %v5693_v0  ;;  %v5695_v20 = vpop.permute.xlu0 %1259 }
 0x106   : > { %8647 = vst [vmem:[#allocation27_spill] sm:$0xff] %v5695_v20 }
 0x107   : > { %1638 = vperm.xlu1 %4400, %v5350_v61  }
 0x108   : > { %1658 = vperm.xlu0 %4399, %v5381_v4   ;;  %v5699_v17 = vpop.permute.xlu1 %1264 }
 0x109   : > { %8648 = vst [vmem:[#allocation28_spill] sm:$0xff] %v5699_v17  ;;  %v5701_v25 = vpop.permute.xlu0 %1269 }
 0x10a   : > { %8649 = vst [vmem:[#allocation29_spill] sm:$0xff] %v5701_v25 }
 0x10b   : > { %1646 = vperm.xlu1 %4400, %v5362_v63  }
 0x10c   : > { %1666 = vperm.xlu0 %4399, %v5395_v8   ;;  %v5705_v16 = vpop.permute.xlu1 %1274 }
 0x10d   : > { %8650 = vst [vmem:[#allocation30_spill] sm:$0xff] %v5705_v16  ;;  %v5707_v13 = vpop.permute.xlu0 %1279 }
 0x10e   : > { %8651 = vst [vmem:[#allocation31_spill] sm:$0xff] %v5707_v13 }
 0x10f   : > { %1654 = vperm.xlu1 %4400, %v5374_v2  }
 0x110   : > { %1674 = vperm.xlu0 %4399, %v5409_v12   ;;  %v5711_v51 = vpop.permute.xlu1 %1284 }
 0x111   : > { %8652 = vst [vmem:[#allocation32_spill] sm:$0xff] %v5711_v51  ;;  %v5713_v47 = vpop.permute.xlu0 %1289 }
 0x112   : > { %8653 = vst [vmem:[#allocation33_spill] sm:$0xff] %v5713_v47 }
 0x113   : > { %1662 = vperm.xlu1 %4400, %v5388_v6  }
 0x114   : > { %4402 = vset.pattern.permute.xlu0 %v5029_v23 }
 0x115   : > { %1714 = vperm.xlu0 %4402, %v5218_v39   ;;  %v5717_v7 = vpop.permute.xlu1 %1325 }
 0x116   : > { %v5719_v24 = vpop.permute.xlu0 %1329 }
 0x117   : > { %1670 = vperm.xlu1 %4400, %v5402_v10  }
 0x119   : > { %1726 = vperm.xlu0 %4402, %v5242_v43   ;;  %v5723_v5 = vpop.permute.xlu1 %1333 }
 0x11a   : > { %8654 = vst [vmem:[#allocation34_spill] sm:$0xff] %v5723_v5  ;;  %v5725_v13 = vpop.permute.xlu0 %1341 }
 0x11b   : > { %4401 = vset.pattern.permute.xlu1 %v5029_v23 }
 0x11c   : > { %1710 = vperm.xlu1 %4401, %v5223_v40  }
 0x11d   : > { %1734 = vperm.xlu0 %4402, %v8628_v15   ;;  %v5729_v47 = vpop.permute.xlu1 %1337 }
 0x11e   : > { %8655 = vst [vmem:[#allocation35_spill] sm:$0xff] %v5729_v47  ;;  %v5731_v51 = vpop.permute.xlu0 %1349  ;;  %v6125_v47 = vld [vmem:[%s8472_s6 + $0x58] sm:$0xff] }
 0x11f   : > { %8656 = vst [vmem:[#allocation36_spill] sm:$0xff] %v5731_v51  ;;  %v6070_v51 = vld [vmem:[%s8472_s6 + $0x80] sm:$0xff] }
 0x120   : > { %1718 = vperm.xlu1 %4401, %v5230_v41  }
 0x121   : > { %1742 = vperm.xlu0 %4402, %v8631_v11   ;;  %v5735_v25 = vpop.permute.xlu1 %1345 }
 0x122   : > { %v5737_v16 = vpop.permute.xlu0 %1357 }
 0x124   : > { %1722 = vperm.xlu1 %4401, %v5235_v42  }
 0x125   : > { %1750 = vperm.xlu0 %4402, %v8634_v27   ;;  %v5741_v23 = vpop.permute.xlu1 %1353 }
 0x126   : > { %8657 = vst [vmem:[#allocation37_spill] sm:$0xff] %v5741_v23  ;;  %v5743_v17 = vpop.permute.xlu0 %1365 }
 0x127   : > { %8658 = vst [vmem:[#allocation38_spill] sm:$0xff] %v5743_v17  ;;  %v6024_v17 = vld [vmem:[%s8472_s6 + $0x10] sm:$0xff] }
 0x128   : > { %1730 = vperm.xlu1 %4401, %v5247_v44  }
 0x129   : > { %1758 = vperm.xlu0 %4402, %v8637_v36   ;;  %v5747_v31 = vpop.permute.xlu1 %1361 }
 0x12a   : > { %v5749_v19 = vpop.permute.xlu0 %1373 }
 0x12b   : > { %8659 = vst [vmem:[#allocation39_spill] sm:$0xff] %v5749_v19 }
 0x12c   : > { %1738 = vperm.xlu1 %4401, %v5259_v46  }
 0x12d   : > { %1766 = vperm.xlu0 %4402, %v5302_v53   ;;  %v5753_v45 = vpop.permute.xlu1 %1369 }
 0x12e   : > { %8660 = vst [vmem:[#allocation40_spill] sm:$0xff] %v5753_v45  ;;  %v5755_v33 = vpop.permute.xlu0 %1381 }
 0x130   : > { %1746 = vperm.xlu1 %4401, %v8625_v18  }
 0x131   : > { %1774 = vperm.xlu0 %4402, %v5314_v55   ;;  %v5759_v20 = vpop.permute.xlu1 %1377 }
 0x132   : > { %8661 = vst [vmem:[#allocation41_spill] sm:$0xff] %v5759_v20  ;;  %v5761_v38 = vpop.permute.xlu0 %1389 }
 0x133   : > { %8662 = vst [vmem:[#allocation42_spill] sm:$0xff] %v5761_v38 }
 0x134   : > { %1754 = vperm.xlu1 %4401, %v5283_v50  }
 0x135   : > { %1782 = vperm.xlu0 %4402, %v5326_v57   ;;  %v5765_v0 = vpop.permute.xlu1 %1385 }
 0x136   : > { %v5767_v37 = vpop.permute.xlu0 %1397 }
 0x137   : > { %8663 = vst [vmem:[#allocation43_spill] sm:$0xff] %v5767_v37 }
 0x138   : > { %1762 = vperm.xlu1 %4401, %v5295_v52  }
 0x139   : > { %1790 = vperm.xlu0 %4402, %v5338_v59   ;;  %v5771_v14 = vpop.permute.xlu1 %1393 }
 0x13a   : > { %8664 = vst [vmem:[#allocation44_spill] sm:$0xff] %v5771_v14  ;;  %v5773_v48 = vpop.permute.xlu0 %1405 }
 0x13b   : > { %8665 = vst [vmem:[#allocation45_spill] sm:$0xff] %v5773_v48 }
 0x13c   : > { %1770 = vperm.xlu1 %4401, %v5307_v54  }
 0x13d   : > { %1798 = vperm.xlu0 %4402, %v5350_v61   ;;  %v5777_v32 = vpop.permute.xlu1 %1401 }
 0x13e   : > { %8666 = vst [vmem:[#allocation46_spill] sm:$0xff] %v5777_v32  ;;  %v5779_v26 = vpop.permute.xlu0 %1413 }
 0x13f   : > { %8667 = vst [vmem:[#allocation47_spill] sm:$0xff] %v5779_v26 }
 0x140   : > { %1778 = vperm.xlu1 %4401, %v5319_v56  }
 0x141   : > { %1806 = vperm.xlu0 %4402, %v5362_v63   ;;  %v5783_v49 = vpop.permute.xlu1 %1409 }
 0x142   : > { %8668 = vst [vmem:[#allocation48_spill] sm:$0xff] %v5783_v49  ;;  %v5785_v22 = vpop.permute.xlu0 %1421 }
 0x143   : > { %8669 = vst [vmem:[#allocation49_spill] sm:$0xff] %v5785_v22 }
 0x144   : > { %1786 = vperm.xlu1 %4401, %v5331_v58  }
 0x145   : > { %1814 = vperm.xlu0 %4402, %v5374_v2   ;;  %v5789_v3 = vpop.permute.xlu1 %1417 }
 0x146   : > { %8670 = vst [vmem:[#allocation50_spill] sm:$0xff] %v5789_v3  ;;  %v5791_v34 = vpop.permute.xlu0 %1429 }
 0x147   : > { %8671 = vst [vmem:[#allocation51_spill] sm:$0xff] %v5791_v34 }
 0x148   : > { %1794 = vperm.xlu1 %4401, %v5343_v60  }
 0x149   : > { %1822 = vperm.xlu0 %4402, %v5388_v6   ;;  %v5795_v28 = vpop.permute.xlu1 %1425 }
 0x14a   : > { %8672 = vst [vmem:[#allocation52_spill] sm:$0xff] %v5795_v28  ;;  %v5797_v30 = vpop.permute.xlu0 %1437 }
 0x14b   : > { %8673 = vst [vmem:[#allocation53_spill] sm:$0xff] %v5797_v30 }
 0x14c   : > { %1802 = vperm.xlu1 %4401, %v5355_v62  }
 0x14d   : > { %1830 = vperm.xlu0 %4402, %v5402_v10   ;;  %v5801_v35 = vpop.permute.xlu1 %1433 }
 0x14e   : > { %8674 = vst [vmem:[#allocation54_spill] sm:$0xff] %v5801_v35  ;;  %v5803_v21 = vpop.permute.xlu0 %1445 }
 0x14f   : > { %8675 = vst [vmem:[#allocation55_spill] sm:$0xff] %v5803_v21 }
 0x150   : > { %1810 = vperm.xlu1 %4401, %v5367_v1  }
 0x151   : > { %4403 = vset.pattern.permute.xlu0 %v5030_v29  ;;  %v5806_v9 = vpop.permute.xlu1 %1441 }
 0x152   : > { %8676 = vst [vmem:[#allocation56_spill] sm:$0xff] %v5806_v9  ;;  %1870 = vperm.xlu0 %4403, %v5223_v40  }
 0x153   : > { %v5809_v34 = vpop.permute.xlu0 %1550 }
 0x154   : > { %8677 = vst [vmem:[#allocation57_spill] sm:$0xff] %v5809_v34  ;;  %1818 = vperm.xlu1 %4401, %v5381_v4  }
 0x155   : > { %v5812_v26 = vpop.permute.xlu1 %1449 }
 0x156   : > { %8678 = vst [vmem:[#allocation58_spill] sm:$0xff] %v5812_v26  ;;  %1882 = vperm.xlu0 %4403, %v5235_v42  }
 0x157   : > { %v5815_v3 = vpop.permute.xlu0 %1562 }
 0x158   : > { %8679 = vst [vmem:[#allocation59_spill] sm:$0xff] %v5815_v3  ;;  %1826 = vperm.xlu1 %4401, %v5395_v8  }
 0x15a   : > { %1890 = vperm.xlu0 %4403, %v5247_v44   ;;  %v5819_v21 = vpop.permute.xlu1 %1554 }
 0x15b   : > { %8680 = vst [vmem:[#allocation60_spill] sm:$0xff] %v5819_v21  ;;  %v5821_v35 = vpop.permute.xlu0 %1570  ;;  %v6104_v21 = vld [vmem:[%s8472_s6 + $0x48] sm:$0xff] }
 0x15c   : > { %8681 = vst [vmem:[#allocation61_spill] sm:$0xff] %v5821_v35  ;;  %1834 = vperm.xlu1 %4401, %v5409_v12   ;;  %v6088_v35 = vld [vmem:[%s8472_s6 + $0x90] sm:$0xff] }
 0x15e   : > { %1898 = vperm.xlu0 %4403, %v5259_v46   ;;  %v5825_v40 = vpop.permute.xlu1 %1558 }
 0x15f   : > { %8682 = vst [vmem:[#allocation62_spill] sm:$0xff] %v5825_v40  ;;  %v5827_v37 = vpop.permute.xlu0 %1578  ;;  %v5977_v40 = vld [vmem:[%s8472_s6 + $0x40] sm:$0xff] }
 0x160   : > { %8683 = vst [vmem:[#allocation63_spill] sm:$0xff] %v5827_v37  ;;  %4404 = vset.pattern.permute.xlu1 %v5030_v29 }
 0x161   : > { %1874 = vperm.xlu1 %4404, %v5218_v39  }
 0x162   : > { %1906 = vperm.xlu0 %4403, %v8625_v18   ;;  %v5831_v42 = vpop.permute.xlu1 %1566 }
 0x163   : > { %8684 = vst [vmem:[#allocation64_spill] sm:$0xff] %v5831_v42  ;;  %v5833_v44 = vpop.permute.xlu0 %1586  ;;  %v6064_v42 = vld [vmem:[%s8472_s6 + $0x28] sm:$0xff] }
 0x164   : > { %8685 = vst [vmem:[#allocation65_spill] sm:$0xff] %v5833_v44 }
 0x165   : > { %1878 = vperm.xlu1 %4404, %v5230_v41  }
 0x166   : > { %1914 = vperm.xlu0 %4403, %v5283_v50   ;;  %v5837_v3 = vpop.permute.xlu1 %1574 }
 0x167   : > { %8686 = vst [vmem:[#allocation66_spill] sm:$0xff] %v5837_v3  ;;  %v5839_v46 = vpop.permute.xlu0 %1594 }
 0x168   : > { %8687 = vst [vmem:[#allocation67_spill] sm:$0xff] %v5839_v46 }
 0x169   : > { %1886 = vperm.xlu1 %4404, %v5242_v43  }
 0x16a   : > { %1922 = vperm.xlu0 %4403, %v5295_v52   ;;  %v5843_v29 = vpop.permute.xlu1 %1582 }
 0x16b   : > { %8688 = vst [vmem:[#allocation68_spill] sm:$0xff] %v5843_v29  ;;  %v5845_v39 = vpop.permute.xlu0 %1602 }
 0x16c   : > { %8689 = vst [vmem:[#allocation69_spill] sm:$0xff] %v5845_v39 }
 0x16d   : > { %1894 = vperm.xlu1 %4404, %v8628_v15  }
 0x16e   : > { %1930 = vperm.xlu0 %4403, %v5307_v54   ;;  %v5849_v18 = vpop.permute.xlu1 %1590 }
 0x16f   : > { %8690 = vst [vmem:[#allocation70_spill] sm:$0xff] %v5849_v18  ;;  %v5851_v41 = vpop.permute.xlu0 %1610 }
 0x171   : > { %1902 = vperm.xlu1 %4404, %v8631_v11  }
 0x172   : > { %1938 = vperm.xlu0 %4403, %v5319_v56   ;;  %v5855_v50 = vpop.permute.xlu1 %1598 }
 0x173   : > { %8691 = vst [vmem:[#allocation71_spill] sm:$0xff] %v5855_v50  ;;  %v5857_v43 = vpop.permute.xlu0 %1618 }
 0x174   : > { %8692 = vst [vmem:[#allocation72_spill] sm:$0xff] %v5857_v43 }
 0x175   : > { %1910 = vperm.xlu1 %4404, %v8634_v27  }
 0x176   : > { %1946 = vperm.xlu0 %4403, %v5331_v58   ;;  %v5861_v52 = vpop.permute.xlu1 %1606 }
 0x177   : > { %v5863_v15 = vpop.permute.xlu0 %1626 }
 0x178   : > { %8693 = vst [vmem:[#allocation73_spill] sm:$0xff] %v5863_v15 }
 0x179   : > { %1918 = vperm.xlu1 %4404, %v8637_v36  }
 0x17a   : > { %1954 = vperm.xlu0 %4403, %v5343_v60   ;;  %v5867_v54 = vpop.permute.xlu1 %1614 }
 0x17b   : > { %8694 = vst [vmem:[#allocation74_spill] sm:$0xff] %v5867_v54  ;;  %v5869_v11 = vpop.permute.xlu0 %1634  ;;  %v5953_v54 = vld [vmem:[%s8471_s5] ss:$0 sm:$0xff] }
 0x17c   : > { %8695 = vst [vmem:[#allocation75_spill] sm:$0xff] %v5869_v11 }
 0x17d   : > { %1926 = vperm.xlu1 %4404, %v5302_v53  }
 0x17e   : > { %1962 = vperm.xlu0 %4403, %v5355_v62   ;;  %v5873_v56 = vpop.permute.xlu1 %1622 }
 0x17f   : > { %8696 = vst [vmem:[#allocation76_spill] sm:$0xff] %v5873_v56  ;;  %v5875_v27 = vpop.permute.xlu0 %1642 }
 0x180   : > { %8697 = vst [vmem:[#allocation77_spill] sm:$0xff] %v5875_v27 }
 0x181   : > { %1934 = vperm.xlu1 %4404, %v5314_v55  }
 0x182   : > { %1970 = vperm.xlu0 %4403, %v5367_v1   ;;  %v5879_v58 = vpop.f32.mrb[0].mxu0  ;;  %v5881_v36 = vpop.permute.xlu1 %1630 }
 0x183   : > { %8698 = vst [vmem:[#allocation78_spill] sm:$0xff] %v5881_v36  ;;  %v5883_v60 = vpop.permute.xlu0 %1650  ;;  %v5885_v15 = vpop.f32.mrb[1].mxu0 }
 0x184   : > { %8699 = vst [vmem:[#allocation79_spill] sm:$0xff] %v5883_v60  ;;  %8700 = vst [vmem:[#allocation80_spill] sm:$0xff] %v5885_v15  ;;  %v5887_v11 = vpop.f32.mrb[2].mxu0 }
 0x185   : > { %v5889_v53 = vpop.f32.mrb[3].mxu0  ;;  %1942 = vperm.xlu1 %4404, %v5326_v57  }
 0x186   : > { %8701 = vst [vmem:[#allocation81_spill] sm:$0xff] %v5889_v53  ;;  %1978 = vperm.xlu0 %4403, %v5381_v4   ;;  %v5893_v62 = vpop.permute.xlu1 %1638 }
 0x187   : > { %8702 = vst [vmem:[#allocation82_spill] sm:$0xff] %v5893_v62  ;;  %v5895_v55 = vpop.permute.xlu0 %1658  ;;  %v5925_v62 = vld [vmem:[%s8472_s6 + $0x8] sm:$0xff] }
 0x188   : > { %8703 = vst [vmem:[#allocation83_spill] sm:$0xff] %v5895_v55 }
 0x189   : > { %1950 = vperm.xlu1 %4404, %v5338_v59  }
 0x18a   : > { %1986 = vperm.xlu0 %4403, %v5395_v8   ;;  %v5899_v1 = vpop.f32.mrb[4].mxu0  ;;  %v5901_v27 = vpop.permute.xlu1 %1646  ;;  %v5031_v8 = vmov 6  }
 0x18b   : > { %8704 = vst [vmem:[#allocation84_spill] sm:$0xff] %v5901_v27  ;;  %v5903_v60 = vpop.permute.xlu0 %1666  ;;  %v5905_v36 = vpop.f32.mrb[5].mxu0 }
 0x18c   : > { %8705 = vst [vmem:[#allocation85_spill] sm:$0xff] %v5903_v60  ;;  %8706 = vst [vmem:[#allocation86_spill] sm:$0xff] %v5905_v36  ;;  %v5907_v56 = vpop.f32.mrb[6].mxu0 }
 0x18d   : > { %v5909_v57 = vpop.f32.mrb[7].mxu0  ;;  %1958 = vperm.xlu1 %4404, %v5350_v61  }
 0x18e   : > { %8707 = vst [vmem:[#allocation87_spill] sm:$0xff] %v5909_v57  ;;  %1994 = vperm.xlu0 %4403, %v5409_v12   ;;  %v5913_v4 = vpop.permute.xlu1 %1654 }
 0x18f   : > { %8708 = vst [vmem:[#allocation88_spill] sm:$0xff] %v5913_v4  ;;  %v5915_v59 = vpop.permute.xlu0 %1674 }
 0x190   : > { %8709 = vst [vmem:[#allocation89_spill] sm:$0xff] %v5915_v59 }
 0x191   : > { %1966 = vperm.xlu1 %4404, %v5362_v63  }
 0x192   : > { %4406 = vset.pattern.permute.xlu0 %v5031_v8  ;;  %v5918_v55 = vpop.f32.mrb[8].mxu0  ;;  %v5920_v60 = vpop.permute.xlu1 %1662 }
 0x193   : > { %8710 = vst [vmem:[#allocation90_spill] sm:$0xff] %v5920_v60  ;;  %2034 = vperm.xlu0 %4406, %v5925_v62   ;;  %v5928_v61 = vpop.f32.mrb[9].mxu0  ;;  %v5942_v60 = vld [vmem:[%s8472_s6 + $0x20] sm:$0xff] }
 0x194   : > { %8711 = vst [vmem:[#allocation91_spill] sm:$0xff] %v5928_v61  ;;  %v5930_v12 = vpop.permute.xlu0 %1714  ;;  %v5932_v59 = vpop.f32.mrb[10].mxu0 }
 0x195   : > { %8712 = vst [vmem:[#allocation92_spill] sm:$0xff] %v5930_v12  ;;  %v5934_v63 = vpop.f32.mrb[11].mxu0  ;;  %1974 = vperm.xlu1 %4404, %v5374_v2   ;;  %v1097_v2 = vlaneseq }
 0x196   : > { %8713 = vst [vmem:[#allocation93_spill] sm:$0xff] %v5934_v63  ;;  %v5937_v4 = vpop.permute.xlu1 %1670 }
 0x197   : > { %8714 = vst [vmem:[#allocation94_spill] sm:$0xff] %v5937_v4  ;;  %2046 = vperm.xlu0 %4406, %v5942_v60   ;;  %v5958_v4 = vld [vmem:[%s8472_s6 + $0x30] sm:$0xff]  ;;  %v5972_v37 = vshrl.u32 %v1097_v2, 7 }
 0x198   : > { %v5945_v27 = vpop.permute.xlu0 %1726 }
 0x199   : > { %8715 = vst [vmem:[#allocation95_spill] sm:$0xff] %v5945_v27  ;;  %1982 = vperm.xlu1 %4404, %v5388_v6   ;;  %vm1099_vm4 = vcmp.lt.s32.totalorder %v5972_v37, 1  ;;  %vm1516_vm5 = vcmp.lt.s32.totalorder %v5972_v37, 7 }
 0x19a   : > { %v5948_v12 = vpop.f32.mrb[12].mxu0 }
 0x19b   : > { %2054 = vperm.xlu0 %4406, %v5958_v4   ;;  %v922_v43 = vpop.f32.mrb[13].mxu0  ;;  %v5961_v50 = vpop.permute.xlu1 %1710  ;;  %v931_v38 = vadd.f32 %v5948_v12, %v5953_v54  ;;  %v6245_v12 = vld [vmem:[%s8472_s6 + $0xc8] sm:$0xff] }
 0x19c   : > { %8716 = vst [vmem:[#allocation96_spill] sm:$0xff] %v5961_v50  ;;  %v923_v6 = vadd.f32 %v5953_v54, %v922_v43  ;;  %v5964_v27 = vpop.permute.xlu0 %1734  ;;  %v5966_v39 = vpop.f32.mrb[14].mxu0 }
 0x19d   : > { %8717 = vst [vmem:[#allocation97_spill] sm:$0xff] %v5964_v27  ;;  %v925_v18 = vpop.f32.mrb[15].mxu0  ;;  %1990 = vperm.xlu1 %4404, %v5402_v10   ;;  %v6237_v14 = vmax.f32 %v931_v38, 0.0  ;;  %v6257_v38 = vld [vmem:[%s8472_s6 + $0xd8] sm:$0xff] }
 0x19e   : > { %v5969_v46 = vmax.f32 %v923_v6, 0.0  ;;  %v926_v3 = vadd.f32 %v5953_v54, %v925_v18  ;;  %v5991_v18 = vld [vmem:[%s8472_s6] sm:$0xff] }
 0x19f   : > { %2062 = vperm.xlu0 %4406, %v5977_v40   ;;  %v5980_v43 = vpop.permute.xlu1 %1718  ;;  %8762 = vst [vmem:[#allocation141_spill] sm:$0xff] %v6237_v14 }
 0x1a0   : > { %8718 = vst [vmem:[#allocation98_spill] sm:$0xff] %v5980_v43  ;;  %v5982_v27 = vmax.f32 %v926_v3, 0.0  ;;  %v5984_v50 = vpop.permute.xlu0 %1742  ;;  %v8487_v2 = vrot.slane %v5969_v46, 7  ;;  %v6000_v3 = vld [vmem:[%s8472_s6 + $0x50] sm:$0xff] }
 0x1a1   : > { %8720 = vst [vmem:[#allocation100_spill] sm:$0xff] %v5984_v50  ;;  %4405 = vset.pattern.permute.xlu1 %v5031_v8 }
 0x1a2   : > { %8719 = vst [vmem:[#allocation99_spill] sm:$0xff] %v5982_v27  ;;  %v5986_v10 = vpop.f32.mrb[16].mxu0  ;;  %2030 = vperm.xlu1 %4405, %v5991_v18   ;;  %v8486_v6 = vrot.slane %v5982_v27, 7  ;;  %v8745_v30 = vrot.slane %v5982_v27, 1 }
 0x1a3   : > { %8721 = vst [vmem:[#allocation101_spill] sm:$0xff] %v5986_v10  ;;  %2070 = vperm.xlu0 %4406, %v6000_v3   ;;  %v6003_v8 = vpop.f32.mrb[17].mxu0  ;;  %v6005_v50 = vpop.permute.xlu1 %1722  ;;  %v6276_v10 = vmul.f32 %v5765_v0, %v5982_v27  ;;  %v6294_v0 = vld [vmem:[%s8472_s6 + $0xe8] sm:$0xff] }
 0x1a4   : > { %8722 = vst [vmem:[#allocation102_spill] sm:$0xff] %v6003_v8  ;;  %8723 = vst [vmem:[#allocation103_spill] sm:$0xff] %v6005_v50  ;;  %v6007_v43 = vpop.permute.xlu0 %1750  ;;  %v6009_v26 = vpop.f32.mrb[18].mxu0  ;;  %v6017_v32 = vsel %vm1099_vm4, %v8487_v2, %v8486_v6  ;;  %v6030_v50 = vld [vmem:[%s8472_s6 + $0x60] sm:$0xff]  ;;  %v6048_v8 = vld [vmem:[%s8472_s6 + $0x70] sm:$0xff] }
 0x1a5   : > { %8724 = vst [vmem:[#allocation104_spill] sm:$0xff] %v6007_v43  ;;  %8725 = vst [vmem:[#allocation105_spill] sm:$0xff] %v6017_v32  ;;  %v6019_v29 = vpop.f32.mrb[19].mxu0  ;;  %v6042_v32 = vld [vmem:[%s8472_s6 + $0x18] sm:$0xff] }
 0x1a6   : > { %8726 = vst [vmem:[#allocation106_spill] sm:$0xff] %v6019_v29  ;;  %2038 = vperm.xlu1 %4405, %v6024_v17   ;;  %v9149_v37 = vld [vmem:[#allocation97_spill] sm:$0xff] }
 0x1a7   : > { %2078 = vperm.xlu0 %4406, %v6030_v50   ;;  %v6033_v43 = vpop.permute.xlu1 %1730 }
 0x1a8   : > { %8727 = vst [vmem:[#allocation107_spill] sm:$0xff] %v6033_v43  ;;  %v6035_v6 = vpop.permute.xlu0 %1758 }
 0x1a9   : > { %8728 = vst [vmem:[#allocation108_spill] sm:$0xff] %v6035_v6 }
 0x1aa   : > { %v6037_v2 = vpop.f32.mrb[20].mxu0  ;;  %2042 = vperm.xlu1 %4405, %v6042_v32  }
 0x1ab   : > { %8729 = vst [vmem:[#allocation109_spill] sm:$0xff] %v6037_v2  ;;  %2086 = vperm.xlu0 %4406, %v6048_v8   ;;  %v6051_v44 = vpop.f32.mrb[21].mxu0  ;;  %v6053_v43 = vpop.permute.xlu1 %1738 }
 0x1ac   : > { %8730 = vst [vmem:[#allocation110_spill] sm:$0xff] %v6051_v44  ;;  %8731 = vst [vmem:[#allocation111_spill] sm:$0xff] %v6053_v43  ;;  %v6055_v6 = vpop.permute.xlu0 %1766  ;;  %v6057_v45 = vpop.f32.mrb[22].mxu0 }
 0x1ad   : > { %8732 = vst [vmem:[#allocation112_spill] sm:$0xff] %v6055_v6  ;;  %8733 = vst [vmem:[#allocation113_spill] sm:$0xff] %v6057_v45  ;;  %v6059_v29 = vpop.f32.mrb[23].mxu0  ;;  %v8492_v45 = vrot.slane %v6237_v14, 1 }
 0x1ae   : > { %8734 = vst [vmem:[#allocation114_spill] sm:$0xff] %v6059_v29  ;;  %2050 = vperm.xlu1 %4405, %v6064_v42   ;;  %v6082_v29 = vld [vmem:[%s8472_s6 + $0x38] sm:$0xff] }
 0x1af   : > { %2094 = vperm.xlu0 %4406, %v6070_v51   ;;  %v6073_v43 = vpop.permute.xlu1 %1746 }
 0x1b0   : > { %8735 = vst [vmem:[#allocation115_spill] sm:$0xff] %v6073_v43  ;;  %v6075_v6 = vpop.permute.xlu0 %1774 }
 0x1b1   : > { %8736 = vst [vmem:[#allocation116_spill] sm:$0xff] %v6075_v6 }
 0x1b2   : > { %v6077_v44 = vpop.f32.mrb[24].mxu0  ;;  %2058 = vperm.xlu1 %4405, %v6082_v29  }
 0x1b3   : > { %8737 = vst [vmem:[#allocation117_spill] sm:$0xff] %v6077_v44  ;;  %2102 = vperm.xlu0 %4406, %v6088_v35   ;;  %v6091_v23 = vpop.f32.mrb[25].mxu0  ;;  %v6093_v43 = vpop.permute.xlu1 %1754 }
 0x1b4   : > { %8738 = vst [vmem:[#allocation118_spill] sm:$0xff] %v6091_v23  ;;  %8739 = vst [vmem:[#allocation119_spill] sm:$0xff] %v6093_v43  ;;  %v6095_v6 = vpop.permute.xlu0 %1782  ;;  %v6097_v5 = vpop.f32.mrb[26].mxu0  ;;  %v6111_v23 = vld [vmem:[%s8472_s6 + $0xa0] sm:$0xff] }
 0x1b5   : > { %8740 = vst [vmem:[#allocation120_spill] sm:$0xff] %v6095_v6  ;;  %8741 = vst [vmem:[#allocation121_spill] sm:$0xff] %v6097_v5  ;;  %v6099_v34 = vpop.f32.mrb[27].mxu0 }
 0x1b6   : > { %8742 = vst [vmem:[#allocation122_spill] sm:$0xff] %v6099_v34  ;;  %2066 = vperm.xlu1 %4405, %v6104_v21   ;;  %v8489_v34 = vrot.slane %v5969_v46, 1 }
 0x1b7   : > { %2110 = vperm.xlu0 %4406, %v6111_v23   ;;  %v6114_v6 = vpop.permute.xlu1 %1762 }
 0x1b8   : > { %8743 = vst [vmem:[#allocation123_spill] sm:$0xff] %v6114_v6  ;;  %v6116_v43 = vpop.permute.xlu0 %1790  ;;  %v6139_v6 = vld [vmem:[%s8472_s6 + $0xb0] sm:$0xff] }
 0x1b9   : > { %8744 = vst [vmem:[#allocation124_spill] sm:$0xff] %v6116_v43  ;;  %v6134_v43 = vsel %vm1516_vm5, %v8489_v34, %v8745_v30  ;;  %v6155_v30 = vld [vmem:[%s8472_s6 + $0x68] sm:$0xff]  ;;  %v6161_v34 = vld [vmem:[%s8472_s6 + $0xc0] sm:$0xff] }
 0x1ba   : > { %v6120_v63 = vpop.f32.mrb[28].mxu0  ;;  %2074 = vperm.xlu1 %4405, %v6125_v47   ;;  %8746 = vst [vmem:[#allocation125_spill] sm:$0xff] %v6134_v43 }
 0x1bb   : > { %2118 = vperm.xlu0 %4406, %v6139_v6   ;;  %v6142_v9 = vpop.f32.mrb[29].mxu0  ;;  %v6144_v57 = vpop.permute.xlu1 %1770 }
 0x1bc   : > { %8747 = vst [vmem:[#allocation126_spill] sm:$0xff] %v6142_v9  ;;  %8748 = vst [vmem:[#allocation127_spill] sm:$0xff] %v6144_v57  ;;  %v6146_v22 = vpop.permute.xlu0 %1798  ;;  %v6148_v61 = vpop.f32.mrb[30].mxu0  ;;  %v6171_v9 = vld [vmem:[%s8472_s6 + $0x78] sm:$0xff] }
 0x1bd   : > { %8749 = vst [vmem:[#allocation128_spill] sm:$0xff] %v6146_v22  ;;  %v6150_v28 = vpop.f32.mrb[31].mxu0 }
 0x1be   : > { %8750 = vst [vmem:[#allocation129_spill] sm:$0xff] %v6150_v28  ;;  %2082 = vperm.xlu1 %4405, %v6155_v30   ;;  %v6177_v28 = vld [vmem:[%s8472_s6 + $0xd0] sm:$0xff] }
 0x1bf   : > { %2126 = vperm.xlu0 %4406, %v6161_v34   ;;  %v6164_v57 = vpop.permute.xlu1 %1778 }
 0x1c0   : > { %8751 = vst [vmem:[#allocation130_spill] sm:$0xff] %v6164_v57  ;;  %v6166_v22 = vpop.permute.xlu0 %1806  ;;  %v6193_v57 = vld [vmem:[%s8472_s6 + $0xe0] sm:$0xff] }
 0x1c1   : > { %8752 = vst [vmem:[#allocation131_spill] sm:$0xff] %v6166_v22  ;;  %v6187_v22 = vld [vmem:[%s8472_s6 + $0x88] sm:$0xff] }
 0x1c2   : > { %2090 = vperm.xlu1 %4405, %v6171_v9  }
 0x1c3   : > { %2134 = vperm.xlu0 %4406, %v6177_v28   ;;  %v6180_v53 = vpop.permute.xlu1 %1786 }
 0x1c4   : > { %8753 = vst [vmem:[#allocation132_spill] sm:$0xff] %v6180_v53  ;;  %v6182_v48 = vpop.permute.xlu0 %1814  ;;  %v6209_v53 = vld [vmem:[%s8472_s6 + $0xf0] sm:$0xff] }
 0x1c5   : > { %8754 = vst [vmem:[#allocation133_spill] sm:$0xff] %v6182_v48  ;;  %v6203_v48 = vld [vmem:[%s8472_s6 + $0x98] sm:$0xff] }
 0x1c6   : > { %2098 = vperm.xlu1 %4405, %v6187_v22  }
 0x1c7   : > { %2142 = vperm.xlu0 %4406, %v6193_v57   ;;  %v6196_v44 = vpop.permute.xlu1 %1794 }
 0x1c8   : > { %8755 = vst [vmem:[#allocation134_spill] sm:$0xff] %v6196_v44  ;;  %v6198_v36 = vpop.permute.xlu0 %1822  ;;  %v5032_v44 = vmov 7  }
 0x1c9   : > { %8756 = vst [vmem:[#allocation135_spill] sm:$0xff] %v6198_v36  ;;  %v6219_v36 = vld [vmem:[%s8472_s6 + $0xa8] sm:$0xff] }
 0x1ca   : > { %2106 = vperm.xlu1 %4405, %v6203_v48  }
 0x1cb   : > { %2150 = vperm.xlu0 %4406, %v6209_v53   ;;  %v6212_v49 = vpop.permute.xlu1 %1802 }
 0x1cc   : > { %8757 = vst [vmem:[#allocation136_spill] sm:$0xff] %v6212_v49  ;;  %v6214_v5 = vpop.permute.xlu0 %1830 }
 0x1cd   : > { %8758 = vst [vmem:[#allocation137_spill] sm:$0xff] %v6214_v5  ;;  %v6232_v5 = vld [vmem:[%s8472_s6 + $0xb8] sm:$0xff] }
 0x1ce   : > { %2114 = vperm.xlu1 %4405, %v6219_v36  }
 0x1cf   : > { %4407 = vset.pattern.permute.xlu0 %v5032_v44  ;;  %v6222_v15 = vpop.permute.xlu1 %1810 }
 0x1d0   : > { %8759 = vst [vmem:[#allocation138_spill] sm:$0xff] %v6222_v15  ;;  %2190 = vperm.xlu0 %4407, %v5991_v18  }
 0x1d1   : > { %v6227_v2 = vpop.permute.xlu0 %1870 }
 0x1d2   : > { %8760 = vst [vmem:[#allocation139_spill] sm:$0xff] %v6227_v2  ;;  %2122 = vperm.xlu1 %4405, %v6232_v5  }
 0x1d3   : > { %v6235_v49 = vpop.permute.xlu1 %1818 }
 0x1d4   : > { %8761 = vst [vmem:[#allocation140_spill] sm:$0xff] %v6235_v49  ;;  %2202 = vperm.xlu0 %4407, %v6042_v32  }
 0x1d5   : > { %v6240_v15 = vpop.permute.xlu0 %1882 }
 0x1d6   : > { %8763 = vst [vmem:[#allocation142_spill] sm:$0xff] %v6240_v15  ;;  %2130 = vperm.xlu1 %4405, %v6245_v12   ;;  %v8766_v15 = vrot.slane %v5982_v27, 1 }
 0x1d7   : > { %v6248_v2 = vpop.permute.xlu1 %1826 }
 0x1d8   : > { %8764 = vst [vmem:[#allocation143_spill] sm:$0xff] %v6248_v2  ;;  %2210 = vperm.xlu0 %4407, %v6064_v42   ;;  %v6266_v2 = vsel %vm1516_vm5, %v8766_v15, %v8492_v45  ;;  %v6287_v15 = vmul.f32 %v5861_v52, %v6134_v43 }
 0x1d9   : > { %v6252_v49 = vpop.permute.xlu0 %1890  ;;  %8767 = vst [vmem:[#allocation145_spill] sm:$0xff] %v6266_v2  ;;  %v6283_v14 = vmul.f32 %v5851_v41, %v6266_v2 }
 0x1da   : > { %8765 = vst [vmem:[#allocation144_spill] sm:$0xff] %v6252_v49  ;;  %2138 = vperm.xlu1 %4405, %v6257_v38   ;;  %v6272_v49 = vmul.f32 %v5755_v33, %v5969_v46  ;;  %8771 = vst [vmem:[#allocation149_spill] sm:$0xff] %v6287_v15  ;;  %v6309_v33 = vld [vmem:[%s8472_s6 + $0xf8] sm:$0xff] }
 0x1db   : > { %v6268_v19 = vpop.permute.xlu1 %1834  ;;  %8770 = vst [vmem:[#allocation148_spill] sm:$0xff] %v6283_v14 }
 0x1dc   : > { %8768 = vst [vmem:[#allocation146_spill] sm:$0xff] %v6268_v19  ;;  %2218 = vperm.xlu0 %4407, %v6082_v29  }
 0x1dd   : > { %v6279_v20 = vpop.permute.xlu0 %1898 }
 0x1de   : > { %8769 = vst [vmem:[#allocation147_spill] sm:$0xff] %v6279_v20  ;;  %2146 = vperm.xlu1 %4405, %v6294_v0  }
 0x1e0   : > { %2226 = vperm.xlu0 %4407, %v6104_v21   ;;  %v6298_v45 = vpop.permute.xlu1 %1874 }
 0x1e1   : > { %8772 = vst [vmem:[#allocation150_spill] sm:$0xff] %v6298_v45  ;;  %v6302_v19 = vpop.permute.xlu0 %1906 }
 0x1e2   : > { %8773 = vst [vmem:[#allocation151_spill] sm:$0xff] %v6302_v19  ;;  %2154 = vperm.xlu1 %4405, %v6309_v33  }
 0x1e4   : > { %2234 = vperm.xlu0 %4407, %v6125_v47   ;;  %v6313_v20 = vpop.permute.xlu1 %1878 }
 0x1e5   : > { %8774 = vst [vmem:[#allocation152_spill] sm:$0xff] %v6313_v20  ;;  %v6315_v45 = vpop.permute.xlu0 %1914 }
 0x1e6   : > { %8775 = vst [vmem:[#allocation153_spill] sm:$0xff] %v6315_v45  ;;  %4408 = vset.pattern.permute.xlu1 %v5032_v44 }
 0x1e7   : > { %2194 = vperm.xlu1 %4408, %v5925_v62  }
 0x1e8   : > { %2242 = vperm.xlu0 %4407, %v6155_v30   ;;  %v6319_v41 = vpop.permute.xlu1 %1886 }
 0x1e9   : > { %8776 = vst [vmem:[#allocation154_spill] sm:$0xff] %v6319_v41  ;;  %v1923_v52 = vpop.permute.xlu0 %1922 }
 0x1eb   : > { %2198 = vperm.xlu1 %4408, %v6024_v17  }
 0x1ec   : > { %2250 = vperm.xlu0 %4407, %v6171_v9   ;;  %v6323_v19 = vpop.permute.xlu1 %1894 }
 0x1ed   : > { %8777 = vst [vmem:[#allocation155_spill] sm:$0xff] %v6323_v19  ;;  %v6325_v15 = vpop.permute.xlu0 %1930 }
 0x1ee   : > { %8778 = vst [vmem:[#allocation156_spill] sm:$0xff] %v6325_v15  ;;  %v6342_v15 = vmul.f32 %v1923_v52, %v6266_v2 }
 0x1ef   : > { %2206 = vperm.xlu1 %4408, %v5942_v60  }
 0x1f0   : > { %2258 = vperm.xlu0 %4407, %v6187_v22   ;;  %v6329_v44 = vpop.permute.xlu1 %1902 }
 0x1f1   : > { %8779 = vst [vmem:[#allocation157_spill] sm:$0xff] %v6329_v44  ;;  %v6331_v20 = vpop.permute.xlu0 %1938 }
 0x1f2   : > { %8780 = vst [vmem:[#allocation158_spill] sm:$0xff] %v6331_v20 }
 0x1f3   : > { %2214 = vperm.xlu1 %4408, %v5958_v4  }
 0x1f4   : > { %2266 = vperm.xlu0 %4407, %v6203_v48   ;;  %v6335_v41 = vpop.permute.xlu1 %1910 }
 0x1f5   : > { %v6337_v14 = vpop.permute.xlu0 %1946 }
 0x1f6   : > { %8781 = vst [vmem:[#allocation159_spill] sm:$0xff] %v6337_v14 }
 0x1f7   : > { %2222 = vperm.xlu1 %4408, %v5977_v40  }
 0x1f8   : > { %2274 = vperm.xlu0 %4407, %v6219_v36   ;;  %v1919_v19 = vpop.permute.xlu1 %1918 }
 0x1f9   : > { %v6345_v44 = vmul.f32 %v1919_v19, %v6134_v43  ;;  %v6347_v20 = vpop.permute.xlu0 %1954 }
 0x1fa   : > { %8782 = vst [vmem:[#allocation160_spill] sm:$0xff] %v6347_v20 }
 0x1fb   : > { %2230 = vperm.xlu1 %4408, %v6000_v3  }
 0x1fc   : > { %2282 = vperm.xlu0 %4407, %v6232_v5   ;;  %v6353_v14 = vpop.permute.xlu1 %1926 }
 0x1fd   : > { %v6355_v45 = vpop.permute.xlu0 %1962 }
 0x1fe   : > { %8783 = vst [vmem:[#allocation161_spill] sm:$0xff] %v6355_v45 }
 0x1ff   : > { %2238 = vperm.xlu1 %4408, %v6030_v50  }
 0x200   : > { %2290 = vperm.xlu0 %4407, %v6245_v12   ;;  %v6359_v52 = vpop.permute.xlu1 %1934 }
 0x201   : > { %8784 = vst [vmem:[#allocation162_spill] sm:$0xff] %v6359_v52  ;;  %v6361_v19 = vpop.permute.xlu0 %1970 }
 0x202   : > { %8785 = vst [vmem:[#allocation163_spill] sm:$0xff] %v6361_v19 }
 0x203   : > { %2246 = vperm.xlu1 %4408, %v6048_v8  }
 0x204   : > { %2298 = vperm.xlu0 %4407, %v6257_v38   ;;  %v6365_v27 = vpop.permute.xlu1 %1942 }
 0x205   : > { %8786 = vst [vmem:[#allocation164_spill] sm:$0xff] %v6365_v27  ;;  %v6367_v2 = vpop.permute.xlu0 %1978  ;;  %v5033_v27 = vmov 8  }
 0x206   : > { %8787 = vst [vmem:[#allocation165_spill] sm:$0xff] %v6367_v2 }
 0x207   : > { %2254 = vperm.xlu1 %4408, %v6070_v51  }
 0x208   : > { %2306 = vperm.xlu0 %4407, %v6294_v0   ;;  %v6371_v45 = vpop.permute.xlu1 %1950 }
 0x209   : > { %8788 = vst [vmem:[#allocation166_spill] sm:$0xff] %v6371_v45  ;;  %v6373_v43 = vpop.permute.xlu0 %1986 }
 0x20a   : > { %8789 = vst [vmem:[#allocation167_spill] sm:$0xff] %v6373_v43 }
 0x20b   : > { %2262 = vperm.xlu1 %4408, %v6088_v35  }
 0x20c   : > { %2314 = vperm.xlu0 %4407, %v6309_v33   ;;  %v6377_v19 = vpop.permute.xlu1 %1958 }
 0x20d   : > { %8790 = vst [vmem:[#allocation168_spill] sm:$0xff] %v6377_v19  ;;  %v6379_v20 = vpop.permute.xlu0 %1994 }
 0x20e   : > { %8791 = vst [vmem:[#allocation169_spill] sm:$0xff] %v6379_v20 }
 0x20f   : > { %2270 = vperm.xlu1 %4408, %v6111_v23  }
 0x210   : > { %4410 = vset.pattern.permute.xlu0 %v5033_v27  ;;  %v6382_v2 = vpop.permute.xlu1 %1966 }
 0x211   : > { %8792 = vst [vmem:[#allocation170_spill] sm:$0xff] %v6382_v2  ;;  %2354 = vperm.xlu0 %4410, %v5925_v62  }
 0x212   : > { %v6385_v52 = vpop.permute.xlu0 %2034 }
 0x213   : > { %8793 = vst [vmem:[#allocation171_spill] sm:$0xff] %v6385_v52  ;;  %2278 = vperm.xlu1 %4408, %v6139_v6  }
 0x214   : > { %v6388_v43 = vpop.permute.xlu1 %1974 }
 0x215   : > { %8794 = vst [vmem:[#allocation172_spill] sm:$0xff] %v6388_v43  ;;  %2366 = vperm.xlu0 %4410, %v5942_v60  }
 0x216   : > { %v6391_v45 = vpop.permute.xlu0 %2046 }
 0x217   : > { %8795 = vst [vmem:[#allocation173_spill] sm:$0xff] %v6391_v45  ;;  %2286 = vperm.xlu1 %4408, %v6161_v34  }
 0x218   : > { %v6394_v20 = vpop.permute.xlu1 %1982 }
 0x219   : > { %8796 = vst [vmem:[#allocation174_spill] sm:$0xff] %v6394_v20  ;;  %2374 = vperm.xlu0 %4410, %v5958_v4   ;;  %v8838_v20 = vld [vmem:[#allocation80_spill] sm:$0xff] }
 0x21a   : > { %v6397_v19 = vpop.permute.xlu0 %2054 }
 0x21b   : > { %8797 = vst [vmem:[#allocation175_spill] sm:$0xff] %v6397_v19  ;;  %2294 = vperm.xlu1 %4408, %v6177_v28  }
 0x21c   : > { %v6400_v62 = vpop.permute.xlu1 %1990 }
 0x21d   : > { %8798 = vst [vmem:[#allocation176_spill] sm:$0xff] %v6400_v62  ;;  %2382 = vperm.xlu0 %4410, %v5977_v40  }
 0x21e   : > { %v6403_v2 = vpop.permute.xlu0 %2062 }
 0x21f   : > { %8799 = vst [vmem:[#allocation177_spill] sm:$0xff] %v6403_v2  ;;  %2302 = vperm.xlu1 %4408, %v6193_v57  }
 0x221   : > { %2390 = vperm.xlu0 %4410, %v6000_v3   ;;  %v6407_v60 = vpop.permute.xlu1 %2030 }
 0x222   : > { %8800 = vst [vmem:[#allocation178_spill] sm:$0xff] %v6407_v60  ;;  %v6409_v43 = vpop.permute.xlu0 %2070 }
 0x223   : > { %2310 = vperm.xlu1 %4408, %v6209_v53  }
 0x225   : > { %2398 = vperm.xlu0 %4410, %v6030_v50   ;;  %v6413_v4 = vpop.permute.xlu1 %2038 }
 0x226   : > { %8801 = vst [vmem:[#allocation179_spill] sm:$0xff] %v6413_v4  ;;  %v6415_v19 = vpop.permute.xlu0 %2078 }
 0x227   : > { %4409 = vset.pattern.permute.xlu1 %v5033_v27 }
 0x228   : > { %2350 = vperm.xlu1 %4409, %v5991_v18  }
 0x229   : > { %2406 = vperm.xlu0 %4410, %v6048_v8   ;;  %v6419_v40 = vpop.permute.xlu1 %2042 }
 0x22a   : > { %8802 = vst [vmem:[#allocation180_spill] sm:$0xff] %v6419_v40  ;;  %v6421_v3 = vpop.permute.xlu0 %2086 }
 0x22c   : > { %2358 = vperm.xlu1 %4409, %v6024_v17  }
 0x22d   : > { %2414 = vperm.xlu0 %4410, %v6070_v51   ;;  %v6425_v62 = vpop.permute.xlu1 %2050 }
 0x22e   : > { %8803 = vst [vmem:[#allocation181_spill] sm:$0xff] %v6425_v62  ;;  %v6427_v50 = vpop.permute.xlu0 %2094 }
 0x22f   : > { %8804 = vst [vmem:[#allocation182_spill] sm:$0xff] %v6427_v50 }
 0x230   : > { %2362 = vperm.xlu1 %4409, %v6042_v32  }
 0x231   : > { %2422 = vperm.xlu0 %4410, %v6088_v35   ;;  %v6431_v27 = vpop.permute.xlu1 %2058 }
 0x232   : > { %8805 = vst [vmem:[#allocation183_spill] sm:$0xff] %v6431_v27  ;;  %v6433_v18 = vpop.permute.xlu0 %2102 }
 0x233   : > { %8806 = vst [vmem:[#allocation184_spill] sm:$0xff] %v6433_v18  ;;  %v8893_v18 = vld [vmem:[#allocation110_spill] sm:$0xff] }
 0x234   : > { %2370 = vperm.xlu1 %4409, %v6064_v42  }
 0x235   : > { %2430 = vperm.xlu0 %4410, %v6111_v23   ;;  %v6437_v8 = vpop.permute.xlu1 %2066  ;;  %v998_v23 = vadd.f32 %v6148_v61, %v5953_v54  ;;  %v883_v61 = vadd.f32 %v5879_v58, %v5953_v54  ;;  %v899_v58 = vadd.f32 %v5899_v1, %v5953_v54 }
 0x236   : > { %8807 = vst [vmem:[#allocation185_spill] sm:$0xff] %v6437_v8  ;;  %v6439_v17 = vpop.permute.xlu0 %2110 }
 0x237   : > { %8808 = vst [vmem:[#allocation186_spill] sm:$0xff] %v6439_v17  ;;  %v6502_v1 = vmax.f32 %v899_v58, 0.0 }
 0x238   : > { %2378 = vperm.xlu1 %4409, %v6082_v29   ;;  %v995_v29 = vadd.f32 %v6120_v63, %v5953_v54 }
 0x239   : > { %2438 = vperm.xlu0 %4410, %v6139_v6   ;;  %v6443_v51 = vpop.permute.xlu1 %2074  ;;  %8820 = vst [vmem:[#allocation198_spill] sm:$0xff] %v6502_v1 }
 0x23a   : > { %v6445_v32 = vpop.permute.xlu0 %2118 }
 0x23b   : > { %8809 = vst [vmem:[#allocation187_spill] sm:$0xff] %v6445_v32 }
 0x23c   : > { %2386 = vperm.xlu1 %4409, %v6104_v21   ;;  %v886_v21 = vadd.f32 %v5887_v11, %v5953_v54  ;;  %v902_v11 = vadd.f32 %v5907_v56, %v5953_v54 }
 0x23d   : > { %2446 = vperm.xlu0 %4410, %v6161_v34   ;;  %v6449_v35 = vpop.permute.xlu1 %2082  ;;  %v6465_v34 = vmax.f32 %v998_v23, 0.0 }
 0x23e   : > { %v6451_v42 = vpop.permute.xlu0 %2126  ;;  %v6477_v2 = vmax.f32 %v886_v21, 0.0  ;;  %v6495_v56 = vmax.f32 %v902_v11, 0.0 }
 0x23f   : > { %8810 = vst [vmem:[#allocation188_spill] sm:$0xff] %v6451_v42  ;;  %8812 = vst [vmem:[#allocation190_spill] sm:$0xff] %v6465_v34  ;;  %v1453_v23 = vmul.f32 %v5719_v24, %v6465_v34  ;;  %v918_v24 = vadd.f32 %v5932_v59, %v5953_v54 }
 0x240   : > { %2394 = vperm.xlu1 %4409, %v6125_v47   ;;  %v6470_v47 = vmax.f32 %v995_v29, 0.0  ;;  %8816 = vst [vmem:[#allocation194_spill] sm:$0xff] %v6477_v2  ;;  %8819 = vst [vmem:[#allocation197_spill] sm:$0xff] %v6495_v56  ;;  %v1461_v58 = vmul.f32 %v5747_v31, %v6495_v56  ;;  %v8827_v31 = vld [vmem:[#allocation41_spill] sm:$0xff] }
 0x241   : > { %2454 = vperm.xlu0 %4410, %v6177_v28   ;;  %v6459_v6 = vpop.permute.xlu1 %2090  ;;  %v6511_v59 = vmax.f32 %v918_v24, 0.0 }
 0x242   : > { %v6461_v27 = vpop.permute.xlu0 %2134  ;;  %8813 = vst [vmem:[#allocation191_spill] sm:$0xff] %v6470_v47  ;;  %v1452_v29 = vmul.f32 %v5717_v7, %v6470_v47 }
 0x243   : > { %8811 = vst [vmem:[#allocation189_spill] sm:$0xff] %v6461_v27  ;;  %8822 = vst [vmem:[#allocation200_spill] sm:$0xff] %v6511_v59 }
 0x244   : > { %2402 = vperm.xlu1 %4409, %v6155_v30   ;;  %v6484_v30 = vmax.f32 %v883_v61, 0.0  ;;  %v1457_v61 = vmul.f32 %v5735_v25, %v6477_v2  ;;  %v934_v25 = vadd.f32 %v5966_v39, %v5953_v54  ;;  %v950_v39 = vadd.f32 %v6009_v26, %v5953_v54  ;;  %v8831_v26 = vld [vmem:[#allocation113_spill] sm:$0xff] }
 0x245   : > { %2462 = vperm.xlu0 %4410, %v6193_v57   ;;  %v6473_v63 = vpop.permute.xlu1 %2098 }
 0x246   : > { %8814 = vst [vmem:[#allocation192_spill] sm:$0xff] %v6473_v63  ;;  %v6475_v28 = vpop.permute.xlu0 %2142  ;;  %v1456_v11 = vmul.f32 %v5725_v13, %v6484_v30  ;;  %v1460_v13 = vmul.f32 %v5737_v16, %v6502_v1  ;;  %v6527_v24 = vmax.f32 %v934_v25, 0.0  ;;  %v8830_v16 = vld [vmem:[#allocation39_spill] sm:$0xff]  ;;  %v8929_v63 = vrot.slane %v6484_v30, 1 }
 0x247   : > { %8815 = vst [vmem:[#allocation193_spill] sm:$0xff] %v6475_v28  ;;  %v8837_v28 = vld [vmem:[#allocation42_spill] sm:$0xff] }
 0x248   : > { %2410 = vperm.xlu1 %4409, %v6171_v9   ;;  %v4411_v9 = vpack.i.bf16 %v1453_v23, %v1452_v29 }
 0x249   : > { %2470 = vperm.xlu0 %4410, %v6209_v53   ;;  %v6489_v57 = vpop.permute.xlu1 %2106  ;;  %v915_v53 = vadd.f32 %v5918_v55, %v5953_v54 }
 0x24a   : > { %8817 = vst [vmem:[#allocation195_spill] sm:$0xff] %v6489_v57  ;;  %v6493_v21 = vpop.permute.xlu0 %2150  ;;  %v8908_v57 = vld [vmem:[#allocation50_spill] sm:$0xff] }
 0x24b   : > { %8818 = vst [vmem:[#allocation196_spill] sm:$0xff] %v6493_v21  ;;  %v6520_v55 = vmax.f32 %v915_v53, 0.0  ;;  %v8828_v53 = vld [vmem:[#allocation101_spill] sm:$0xff]  ;;  %v6543_v21 = vmax.f32 %v950_v39, 0.0 }
 0x24c   : > { %2418 = vperm.xlu1 %4409, %v6187_v22   ;;  %v4421_v22 = vpack.i.bf16 %v1457_v61, %v1456_v11  ;;  %v4431_v61 = vpack.i.bf16 %v1461_v58, %v1460_v13  ;;  %v947_v11 = vadd.f32 %v8828_v53, %v5953_v54  ;;  %v966_v58 = vadd.f32 %v8831_v26, %v5953_v54 }
 0x24d   : > { %4412 = vrot.lane.b32.xlu0 %v4411_v9, %s5034_s29  ;;  %v6507_v7 = vpop.permute.xlu1 %2114  ;;  %8824 = vst [vmem:[#allocation202_spill] sm:$0xff] %v6520_v55  ;;  %v1464_v25 = vmul.f32 %v8830_v16, %v6520_v55  ;;  %v8836_v16 = vld [vmem:[#allocation141_spill] sm:$0xff] }
 0x24e   : > { %8821 = vst [vmem:[#allocation199_spill] sm:$0xff] %v6507_v7  ;;  %v6552_v53 = vmax.f32 %v947_v11, 0.0  ;;  %v1468_v26 = vmul.f32 %v8837_v28, %v8836_v16 }
 0x24f   : > { %v6515_v23 = vpop.permute.xlu0 %2190 }
 0x250   : > { %8823 = vst [vmem:[#allocation201_spill] sm:$0xff] %v6515_v23  ;;  %2426 = vperm.xlu1 %4409, %v6203_v48   ;;  %v1465_v48 = vmul.f32 %v8827_v31, %v6511_v59  ;;  %v8883_v23 = vld [vmem:[#allocation102_spill] sm:$0xff] }
 0x251   : > { %4422 = vrot.lane.b32.xlu0 %v4421_v22, %s5034_s29  ;;  %v6523_v29 = vpop.permute.xlu1 %2122 }
 0x252   : > { %8825 = vst [vmem:[#allocation203_spill] sm:$0xff] %v6523_v29  ;;  %v4441_v31 = vpack.i.bf16 %v1465_v48, %v1464_v25  ;;  %v875_v48 = vadd.f32 %v5953_v54, %v8838_v20  ;;  %v6563_v25 = vmax.f32 %v966_v58, 0.0  ;;  %v8843_v20 = vld [vmem:[#allocation117_spill] sm:$0xff] }
 0x253   : > { %v6531_v9 = vpop.permute.xlu0 %2202  ;;  %v979_v58 = vadd.f32 %v8843_v20, %v5953_v54 }
 0x254   : > { %8826 = vst [vmem:[#allocation204_spill] sm:$0xff] %v6531_v9  ;;  %2434 = vperm.xlu1 %4409, %v6219_v36   ;;  %v8833_v36 = vld [vmem:[#allocation44_spill] sm:$0xff] }
 0x255   : > { %4432 = vrot.lane.b32.xlu0 %v4431_v61, %s5034_s29  ;;  %v6539_v22 = vpop.permute.xlu1 %2130  ;;  %v1469_v8 = vmul.f32 %v8833_v36, %v6527_v24  ;;  %v8834_v61 = vld [vmem:[#allocation109_spill] sm:$0xff] }
 0x256   : > { %8829 = vst [vmem:[#allocation41_spill] sm:$0xff] %v6539_v22  ;;  %v963_v27 = vadd.f32 %v8834_v61, %v5953_v54  ;;  %v8839_v36 = vld [vmem:[#allocation121_spill] sm:$0xff]  ;;  %v8841_v61 = vld [vmem:[#allocation48_spill] sm:$0xff] }
 0x257   : > { %v6547_v13 = vpop.permute.xlu0 %2210  ;;  %v4451_v9 = vpack.i.bf16 %v1469_v8, %v1468_v26  ;;  %v1473_v4 = vmul.f32 %v8841_v61, %v6543_v21  ;;  %v6583_v26 = vmax.f32 %v875_v48, 0.0  ;;  %v8847_v61 = vld [vmem:[#allocation81_spill] sm:$0xff]  ;;  %v6599_v48 = vmax.f32 %v979_v58, 0.0  ;;  %v8857_v58 = vld [vmem:[#allocation56_spill] sm:$0xff] }
 0x258   : > { %8832 = vst [vmem:[#allocation101_spill] sm:$0xff] %v6547_v13  ;;  %2442 = vperm.xlu1 %4409, %v6232_v5   ;;  %v982_v5 = vadd.f32 %v8839_v36, %v5953_v54  ;;  %v6574_v28 = vmax.f32 %v963_v27, 0.0  ;;  %v8845_v36 = vld [vmem:[#allocation45_spill] sm:$0xff]  ;;  %v8850_v13 = vld [vmem:[#allocation52_spill] sm:$0xff] }
 0x259   : > { %4442 = vrot.lane.b32.xlu0 %v4441_v31, %s5034_s29  ;;  %v6557_v39 = vpop.permute.xlu1 %2138  ;;  %v8842_v31 = vld [vmem:[#allocation86_spill] sm:$0xff]  ;;  %v1472_v8 = vmul.f32 %v8845_v36, %v6552_v53  ;;  %8846 = vst [vmem:[#allocation109_spill] sm:$0xff] %v6583_v26  ;;  %v1477_v20 = vmul.f32 %v8850_v13, %v6563_v25  ;;  %v1515_v36 = vrot.slane %v6465_v34, 1  ;;  %8852 = vst [vmem:[#allocation80_spill] sm:$0xff] %v6599_v48  ;;  %v8856_v13 = vld [vmem:[#allocation87_spill] sm:$0xff] }
 0x25a   : > { %8835 = vst [vmem:[#allocation39_spill] sm:$0xff] %v6557_v39  ;;  %v891_v39 = vadd.f32 %v5953_v54, %v8842_v31  ;;  %v6587_v31 = vmax.f32 %v982_v5, 0.0 }
 0x25b   : > { %v6567_v11 = vpop.permute.xlu0 %2218  ;;  %v4461_v27 = vpack.i.bf16 %v1473_v4, %v1472_v8  ;;  %v8854_v4 = vld [vmem:[#allocation49_spill] sm:$0xff] }
 0x25c   : > { %8840 = vst [vmem:[#allocation113_spill] sm:$0xff] %v6567_v11  ;;  %2450 = vperm.xlu1 %4409, %v6245_v12   ;;  %v878_v11 = vadd.f32 %v5953_v54, %v8847_v61  ;;  %8848 = vst [vmem:[#allocation141_spill] sm:$0xff] %v6587_v31  ;;  %v6593_v45 = vmax.f32 %v891_v39, 0.0  ;;  %v1476_v8 = vmul.f32 %v8854_v4, %v6574_v28 }
 0x25d   : > { %4452 = vrot.lane.b32.xlu0 %v4451_v9, %s5034_s29  ;;  %v6579_v40 = vpop.permute.xlu1 %2146  ;;  %v8851_v9 = vld [vmem:[#allocation91_spill] sm:$0xff]  ;;  %v894_v39 = vadd.f32 %v5953_v54, %v8856_v13 }
 0x25e   : > { %8844 = vst [vmem:[#allocation44_spill] sm:$0xff] %v6579_v40  ;;  %v907_v40 = vadd.f32 %v5953_v54, %v8851_v9  ;;  %v6606_v61 = vmax.f32 %v878_v11, 0.0  ;;  %v8499_v9 = vrot.slane %v6583_v26, 1 }
 0x25f   : > { %v6589_v12 = vpop.permute.xlu0 %2226  ;;  %v6636_v13 = vmax.f32 %v894_v39, 0.0 }
 0x260   : > { %8849 = vst [vmem:[#allocation42_spill] sm:$0xff] %v6589_v12  ;;  %2458 = vperm.xlu1 %4409, %v6257_v38   ;;  %8855 = vst [vmem:[#allocation48_spill] sm:$0xff] %v6606_v61  ;;  %v8502_v12 = vrot.slane %v6470_v47, 1  ;;  %v4471_v38 = vpack.i.bf16 %v1477_v20, %v1476_v8  ;;  %v6616_v32 = vmax.f32 %v907_v40, 0.0  ;;  %v6623_v11 = vsel %vm1516_vm5, %v1515_v36, %v8499_v9  ;;  %v8861_v40 = vld [vmem:[#allocation53_spill] sm:$0xff]  ;;  %v8864_v47 = vld [vmem:[#allocation35_spill] sm:$0xff] }
 0x261   : > { %4462 = vrot.lane.b32.xlu0 %v4461_v27, %s5034_s29  ;;  %v6602_v5 = vpop.permute.xlu1 %2154  ;;  %v1481_v27 = vmul.f32 %v8857_v58, %v6587_v31  ;;  %8859 = vst [vmem:[#allocation117_spill] sm:$0xff] %v6623_v11  ;;  %v1487_v20 = vrot.slane %v6477_v2, 1  ;;  %v1480_v8 = vmul.f32 %v8861_v40, %v6599_v48  ;;  %v8862_v58 = vld [vmem:[#allocation93_spill] sm:$0xff]  ;;  %v8867_v40 = vrot.slane %v6593_v45, 1 }
 0x262   : > { %8853 = vst [vmem:[#allocation121_spill] sm:$0xff] %v6602_v5  ;;  %8858 = vst [vmem:[#allocation86_spill] sm:$0xff] %v6616_v32  ;;  %v6629_v4 = vsel %vm1516_vm5, %v8502_v12, %v1515_v36  ;;  %v910_v9 = vadd.f32 %v5953_v54, %v8862_v58  ;;  %v1455_v36 = vmul.f32 %v8864_v47, %v6606_v61  ;;  %v8868_v47 = vld [vmem:[#allocation34_spill] sm:$0xff] }
 0x263   : > { %v6612_v62 = vpop.permute.xlu0 %2234  ;;  %8860 = vst [vmem:[#allocation45_spill] sm:$0xff] %v6629_v4  ;;  %v4481_v39 = vpack.i.bf16 %v1481_v27, %v1480_v8  ;;  %v6655_v58 = vsel %vm1516_vm5, %v1487_v20, %v8867_v40  ;;  %v1454_v12 = vmul.f32 %v8868_v47, %v6583_v26  ;;  %v1491_v8 = vrot.slane %v6495_v56, 1  ;;  %v8873_v47 = vld [vmem:[#allocation61_spill] sm:$0xff] }
 0x264   : > { %2466 = vperm.xlu1 %4409, %v6294_v0   ;;  %v8865_v0 = vld [vmem:[#allocation60_spill] sm:$0xff]  ;;  %v6668_v27 = vmax.f32 %v910_v9, 0.0 }
 0x265   : > { %4472 = vrot.lane.b32.xlu0 %v4471_v38, %s5034_s29  ;;  %v1678_v29 = vmul.f32 %v8865_v0, %v6623_v11  ;;  %v8866_v38 = vld [vmem:[#allocation57_spill] sm:$0xff]  ;;  %v8869_v0 = vrot.slane %v6484_v30, 1  ;;  %v4416_v48 = vpack.i.bf16 %v1455_v36, %v1454_v12  ;;  %v8876_v12 = vld [vmem:[#allocation36_spill] sm:$0xff] }
 0x266   : > { %v6640_v5 = vpop.permute.xlu1 %2194  ;;  %v1677_v42 = vmul.f32 %v8866_v38, %v6629_v4  ;;  %8870 = vst [vmem:[#allocation52_spill] sm:$0xff] %v6668_v27  ;;  %v1682_v4 = vmul.f32 %v8873_v47, %v6655_v58  ;;  %v1458_v36 = vmul.f32 %v8876_v12, %v6593_v45 }
 0x267   : > { %8863 = vst [vmem:[#allocation81_spill] sm:$0xff] %v6640_v5  ;;  %v6649_v22 = vpop.permute.xlu0 %2242  ;;  %v6665_v38 = vsel %vm1516_vm5, %v8869_v0, %v1487_v20  ;;  %v8513_v20 = vrot.slane %v6502_v1, 1  ;;  %v8881_v0 = vld [vmem:[#allocation40_spill] sm:$0xff]  ;;  %v8887_v5 = vrot.slane %v6511_v59, 7 }
 0x268   : > { %2474 = vperm.xlu1 %4409, %v6309_v33   ;;  %v8872_v33 = vld [vmem:[#allocation37_spill] sm:$0xff]  ;;  %v4491_v17 = vpack.i.bf16 %v1678_v29, %v1677_v42  ;;  %v8878_v42 = vld [vmem:[#allocation106_spill] sm:$0xff] }
 0x269   : > { %4482 = vrot.lane.b32.xlu0 %v4481_v39, %s5034_s29  ;;  %v1459_v11 = vmul.f32 %v8872_v33, %v6636_v13  ;;  %v8874_v39 = vrot.slane %v6616_v32, 1  ;;  %v8877_v33 = vld [vmem:[#allocation64_spill] sm:$0xff]  ;;  %v942_v29 = vadd.f32 %v5953_v54, %v8878_v42  ;;  %v939_v42 = vadd.f32 %v5953_v54, %v8883_v23 }
 0x26a   : > { %v6671_v40 = vpop.permute.xlu1 %2198  ;;  %v1681_v47 = vmul.f32 %v8877_v33, %v6665_v38  ;;  %v8882_v33 = vld [vmem:[#allocation65_spill] sm:$0xff] }
 0x26b   : > { %8871 = vst [vmem:[#allocation91_spill] sm:$0xff] %v6671_v40  ;;  %v6677_v31 = vpop.permute.xlu0 %2250  ;;  %v6684_v9 = vsel %vm1516_vm5, %v1491_v8, %v8874_v39  ;;  %v6699_v39 = vsel %vm1516_vm5, %v8513_v20, %v1491_v8  ;;  %v4426_v12 = vpack.i.bf16 %v1459_v11, %v1458_v36  ;;  %v1463_v40 = vmul.f32 %v8881_v0, %v6668_v27  ;;  %v8884_v11 = vld [vmem:[#allocation38_spill] sm:$0xff]  ;;  %v8885_v20 = vld [vmem:[#allocation68_spill] sm:$0xff] }
 0x26c   : > { %8875 = vst [vmem:[#allocation49_spill] sm:$0xff] %v6684_v9  ;;  %4417 = vrot.lane.b32.xlu1 %v4416_v48, %s5034_s29  ;;  %8879 = vst [vmem:[#allocation87_spill] sm:$0xff] %v6699_v39  ;;  %v1686_v56 = vmul.f32 %v8882_v33, %v6684_v9  ;;  %v1075_v8 = vrot.slane %v6520_v55, 7  ;;  %v1462_v36 = vmul.f32 %v8884_v11, %v6616_v32  ;;  %v1495_v0 = vrot.slane %v6511_v59, 1 }
 0x26d   : > { %4492 = vrot.lane.b32.xlu0 %v4491_v17, %s5035_s30  ;;  %v4501_v17 = vpack.i.bf16 %v1682_v4, %v1681_v47  ;;  %v1685_v33 = vmul.f32 %v8885_v20, %v6699_v39  ;;  %v6720_v4 = vmax.f32 %v942_v29, 0.0  ;;  %v8886_v47 = vld [vmem:[#allocation114_spill] sm:$0xff]  ;;  %v6736_v29 = vmax.f32 %v939_v42, 0.0 }
 0x26e   : > { %v6701_v48 = vpop.permute.xlu1 %2206  ;;  %v958_v23 = vadd.f32 %v5953_v54, %v8886_v47  ;;  %v4436_v11 = vpack.i.bf16 %v1463_v40, %v1462_v36  ;;  %v8891_v39 = vrot.slane %v6668_v27, 7  ;;  %v8894_v40 = vld [vmem:[#allocation104_spill] sm:$0xff]  ;;  %v8895_v42 = vld [vmem:[#allocation122_spill] sm:$0xff] }
 0x26f   : > { %8880 = vst [vmem:[#allocation56_spill] sm:$0xff] %v6701_v48  ;;  %v6707_v7 = vpop.permute.xlu0 %2258  ;;  %v8890_v48 = vld [vmem:[#allocation119_spill] sm:$0xff]  ;;  %v974_v36 = vadd.f32 %v5953_v54, %v8895_v42  ;;  %v8900_v42 = vld [vmem:[#allocation118_spill] sm:$0xff] }
 0x270   : > { %4427 = vrot.lane.b32.xlu1 %v4426_v12, %s5034_s29  ;;  %v6728_v12 = vsel %vm1099_vm4, %v1075_v8, %v8887_v5  ;;  %v6742_v47 = vsel %vm1099_vm4, %v8891_v39, %v1075_v8  ;;  %v955_v5 = vadd.f32 %v5953_v54, %v8893_v18  ;;  %v8898_v8 = vld [vmem:[#allocation46_spill] sm:$0xff] }
 0x271   : > { %4502 = vrot.lane.b32.xlu0 %v4501_v17, %s5035_s30  ;;  %8888 = vst [vmem:[#allocation53_spill] sm:$0xff] %v6728_v12  ;;  %v1848_v52 = vmul.f32 %v8890_v48, %v6728_v12  ;;  %v4511_v17 = vpack.i.bf16 %v1686_v56, %v1685_v33  ;;  %8892 = vst [vmem:[#allocation35_spill] sm:$0xff] %v6742_v47  ;;  %v1847_v48 = vmul.f32 %v8894_v40, %v6742_v47 }
 0x272   : > { %v6730_v9 = vpop.permute.xlu1 %2214  ;;  %v6751_v56 = vmax.f32 %v958_v23, 0.0  ;;  %v1471_v33 = vmul.f32 %v8898_v8, %v6720_v4  ;;  %v6769_v40 = vmax.f32 %v955_v5, 0.0  ;;  %v971_v47 = vadd.f32 %v5953_v54, %v8900_v42  ;;  %v8905_v5 = vld [vmem:[#allocation153_spill] sm:$0xff] }
 0x273   : > { %8889 = vst [vmem:[#allocation93_spill] sm:$0xff] %v6730_v9  ;;  %v6734_v20 = vpop.permute.xlu0 %2266  ;;  %v8522_v9 = vrot.slane %v6520_v55, 1  ;;  %v8901_v12 = vrot.slane %v5969_v46, 1  ;;  %v6788_v42 = vmax.f32 %v974_v36, 0.0  ;;  %v8912_v36 = vld [vmem:[#allocation126_spill] sm:$0xff] }
 0x274   : > { %4437 = vrot.lane.b32.xlu1 %v4436_v11, %s5034_s29  ;;  %v4521_v11 = vpack.i.bf16 %v1848_v52, %v1847_v48  ;;  %v8903_v52 = vpack.i.bf16 %v6276_v10, %v6272_v49  ;;  %v1475_v49 = vmul.f32 %v8908_v57, %v6751_v56  ;;  %v6799_v50 = vmax.f32 %v971_v47, 0.0  ;;  %v8915_v47 = vld [vmem:[#allocation54_spill] sm:$0xff] }
 0x275   : > { %4512 = vrot.lane.b32.xlu0 %v4511_v17, %s5035_s30  ;;  %v6759_v39 = vsel %vm1516_vm5, %v8522_v9, %v1495_v0  ;;  %v6777_v9 = vsel %vm1516_vm5, %v1495_v0, %v8901_v12  ;;  %8906 = vst [vmem:[#allocation61_spill] sm:$0xff] %v6788_v42 }
 0x276   : > { %8896 = vst [vmem:[#allocation60_spill] sm:$0xff] %v6759_v39  ;;  %v6761_v18 = vpop.permute.xlu1 %2222  ;;  %v2007_v17 = vmul.f32 %v6335_v41, %v6759_v39  ;;  %8902 = vst [vmem:[#allocation37_spill] sm:$0xff] %v6777_v9  ;;  %v8904_v41 = vld [vmem:[#allocation43_spill] sm:$0xff]  ;;  %v2008_v8 = vmul.f32 %v8905_v5, %v6777_v9 }
 0x277   : > { %8897 = vst [vmem:[#allocation57_spill] sm:$0xff] %v6761_v18  ;;  %v6767_v23 = vpop.permute.xlu0 %2274  ;;  %v1470_v48 = vmul.f32 %v8904_v41, %v6736_v29  ;;  %v8907_v18 = vld [vmem:[#allocation129_spill] sm:$0xff]  ;;  %8911 = vst [vmem:[#allocation64_spill] sm:$0xff] %v6799_v50 }
 0x278   : > { %8899 = vst [vmem:[#allocation34_spill] sm:$0xff] %v6767_v23  ;;  %4447 = vrot.lane.b32.xlu1 %v8903_v52, %s5034_s29  ;;  %v990_v0 = vadd.f32 %v5953_v54, %v8907_v18  ;;  %v4531_v10 = vpack.i.bf16 %v2008_v8, %v2007_v17  ;;  %v8909_v52 = vld [vmem:[#allocation99_spill] sm:$0xff] }
 0x279   : > { %4522 = vrot.lane.b32.xlu0 %v4521_v11, %s5036_s8  ;;  %v4456_v60 = vpack.i.bf16 %v1471_v33, %v1470_v48  ;;  %v2328_v41 = vmul.f32 %v6612_v62, %v8909_v52  ;;  %v987_v11 = vadd.f32 %v5953_v54, %v8912_v36  ;;  %v8913_v18 = vld [vmem:[#allocation47_spill] sm:$0xff]  ;;  %v1485_v62 = vrot.slane %v6606_v61, 1  ;;  %v4975_v54 = vld [vmem:[%s8470_s4] sm:$0xff]  }
 0x27a   : > { %v2231_v12 = vpop.permute.xlu1 %2230  ;;  %v1474_v33 = vmul.f32 %v8913_v18, %v6769_v40  ;;  %v6807_v57 = vmax.f32 %v990_v0, 0.0  ;;  %v8917_v36 = vld [vmem:[#allocation123_spill] sm:$0xff]  ;;  %v8920_v0 = vrot.slane %v6511_v59, 7  ;;  %4200 = vmatpush1.bf16.msra.mxu1 %v4975_v54  ;;  %3794 = vmatpush1.bf16.msra.mxu0 %v4975_v54 }
 0x27b   : > { %v2327_v2 = vmul.f32 %v2231_v12, %v5969_v46  ;;  %v6797_v5 = vpop.permute.xlu0 %2282  ;;  %v1479_v12 = vmul.f32 %v8915_v47, %v6788_v42  ;;  %v8926_v42 = vrot.slane %v6583_v26, 1 }
 0x27c   : > { %8910 = vst [vmem:[#allocation36_spill] sm:$0xff] %v6797_v5  ;;  %4457 = vrot.lane.b32.xlu1 %v4456_v60, %s5034_s29  ;;  %8914 = vst [vmem:[#allocation106_spill] sm:$0xff] %v6807_v57  ;;  %v4466_v8 = vpack.i.bf16 %v1475_v49, %v1474_v33  ;;  %v8916_v60 = vld [vmem:[#allocation105_spill] sm:$0xff]  ;;  %v6827_v49 = vmax.f32 %v987_v11, 0.0  ;;  %v8923_v33 = vld [vmem:[#allocation51_spill] sm:$0xff] }
 0x27d   : > { %v4541_v48 = vpack.i.bf16 %v2328_v41, %v2327_v2  ;;  %4532 = vrot.lane.b32.xlu0 %v4531_v10, %s5037_s9  ;;  %v1850_v18 = vmul.f32 %v8917_v36, %v8916_v60  ;;  %v8919_v10 = vrot.slane %v5969_v46, 7  ;;  %v1478_v47 = vmul.f32 %v8923_v33, %v6799_v50  ;;  %v8924_v36 = vld [vmem:[#allocation108_spill] sm:$0xff]  ;;  %v8928_v33 = vld [vmem:[#allocation58_spill] sm:$0xff] }
 0x27e   : > { %v2239_v17 = vpop.permute.xlu1 %2238  ;;  %8922 = vst [vmem:[#allocation102_spill] sm:$0xff] %v6827_v49  ;;  %v6840_v11 = vsel %vm1516_vm5, %v8926_v42, %v1485_v62  ;;  %v1483_v50 = vmul.f32 %v8928_v33, %v6807_v57  ;;  %v6854_v42 = vsel %vm1516_vm5, %v1485_v62, %v8929_v63  ;;  %v8933_v33 = vld [vmem:[#allocation62_spill] sm:$0xff]  ;;  %v8937_v63 = vrot.slane %v6593_v45, 1 }
 0x27f   : > { %v6817_v2 = vpop.permute.xlu0 %2290  ;;  %v6825_v41 = vsel %vm1099_vm4, %v8920_v0, %v8919_v10  ;;  %8927 = vst [vmem:[#allocation38_spill] sm:$0xff] %v6840_v11  ;;  %v4476_v0 = vpack.i.bf16 %v1479_v12, %v1478_v47  ;;  %8930 = vst [vmem:[#allocation68_spill] sm:$0xff] %v6854_v42  ;;  %v8932_v12 = vld [vmem:[#allocation55_spill] sm:$0xff]  ;;  %v1679_v54 = vmul.f32 %v8933_v33, %v6840_v11  ;;  %v1493_v33 = vrot.slane %v6668_v27, 1 }
 0x280   : > { %8918 = vst [vmem:[#allocation40_spill] sm:$0xff] %v6817_v2  ;;  %8921 = vst [vmem:[#allocation65_spill] sm:$0xff] %v6825_v41  ;;  %4467 = vrot.lane.b32.xlu1 %v4466_v8, %s5034_s29  ;;  %v1849_v5 = vmul.f32 %v8924_v36, %v6825_v41  ;;  %v8925_v2 = vmov 0   ;;  %v1489_v8 = vrot.slane %v6636_v13, 1  ;;  %v1482_v47 = vmul.f32 %v8932_v12, %v6827_v49 }
 0x281   : > { %4542 = vrot.lane.b32.xlu0 %v4541_v48, %s5038_s12  ;;  %4192 = vmatprep.subr.bf16.mxu1 %v8925_v2  ;;  %v4976_v48 = vld [vmem:[%s8470_s4 + $0x8] sm:$0xff]  }
 0x282   : > { %v6843_v10 = vpop.permute.xlu1 %2246  ;;  %v4551_v36 = vpack.i.bf16 %v1850_v18, %v1849_v5  ;;  %3795 = vmatprep.subr.bf16.mxu0 %v8925_v2  ;;  %4201 = vmatpush1.bf16.msra.mxu1 %v4976_v48  ;;  %v8934_v5 = vrot.slane %v6502_v1, 1  ;;  %v8936_v18 = vld [vmem:[#allocation59_spill] sm:$0xff]  ;;  %v6885_v57 = vsel %vm1516_vm5, %v8937_v63, %v1489_v8 }
 0x283   : > { %v6856_v23 = vpop.permute.xlu0 %2298  ;;  %4193 = vmatprep.subr.bf16.mxu1 %v8925_v2  ;;  %3796 = vmatpush1.bf16.msra.mxu0 %v4976_v48  ;;  %8938 = vst [vmem:[#allocation110_spill] sm:$0xff] %v6885_v57  ;;  %v8940_v48 = vld [vmem:[#allocation63_spill] sm:$0xff] }
 0x284   : > { %8931 = vst [vmem:[#allocation114_spill] sm:$0xff] %v6856_v23  ;;  %4477 = vrot.lane.b32.xlu1 %v4476_v0, %s5034_s29  ;;  %v6871_v62 = vsel %vm1516_vm5, %v1489_v8, %v8934_v5  ;;  %v1680_v0 = vmul.f32 %v8936_v18, %v6854_v42  ;;  %v4486_v23 = vpack.i.bf16 %v1483_v50, %v1482_v47  ;;  %v1079_v50 = vrot.slane %v8836_v16, 7 }
 0x285   : > { %4552 = vrot.lane.b32.xlu0 %v4551_v36, %s5036_s8  ;;  %8935 = vst [vmem:[#allocation119_spill] sm:$0xff] %v6871_v62  ;;  %v4977_v36 = vld [vmem:[%s8470_s4 + $0x10] sm:$0xff]   ;;  %v2329_v5 = vmul.f32 %v2239_v17, %v8836_v16  ;;  %3797 = vmatprep.subr.bf16.mxu0 %v8925_v2  ;;  %v1684_v47 = vmul.f32 %v8940_v48, %v6871_v62  ;;  %v8942_v17 = vrot.slane %v6527_v24, 7  ;;  %v1499_v48 = vrot.slane %v6527_v24, 1 }
 0x286   : > { %v6875_v12 = vpop.permute.xlu1 %2254  ;;  %4202 = vmatpush1.bf16.msra.mxu1 %v4977_v36  ;;  %v2330_v18 = vmul.f32 %v6649_v22, %v6527_v24  ;;  %v8941_v8 = vpack.i.bf16 %v6342_v15, %v6345_v44  ;;  %v4496_v22 = vpack.i.bf16 %v1680_v0, %v1679_v54  ;;  %v4978_v15 = vld [vmem:[%s8470_s4 + $0x18] sm:$0xff]   ;;  %v8945_v44 = vld [vmem:[#allocation127_spill] sm:$0xff]  ;;  %v8946_v62 = vrot.slane %v6520_v55, 1 }
 0x287   : > { %v6888_v49 = vpop.permute.xlu0 %2306  ;;  %4194 = vmatprep.subr.bf16.mxu1 %v8925_v2  ;;  %v6906_v63 = vsel %vm1099_vm4, %v1079_v50, %v8942_v17  ;;  %3798 = vmatpush1.bf16.msra.mxu0 %v4977_v36  ;;  %v8949_v36 = vrot.slane %v8909_v52, 7 }
 0x288   : > { %8939 = vst [vmem:[#allocation104_spill] sm:$0xff] %v6888_v49  ;;  %4487 = vrot.lane.b32.xlu1 %v4486_v23, %s5034_s29  ;;  %8943 = vst [vmem:[#allocation122_spill] sm:$0xff] %v6906_v63  ;;  %v8944_v23 = vld [vmem:[#allocation66_spill] sm:$0xff]  ;;  %v6922_v17 = vsel %vm1516_vm5, %v1493_v33, %v8946_v62  ;;  %v4571_v54 = vpack.i.bf16 %v2330_v18, %v2329_v5  ;;  %3799 = vmatprep.subr.bf16.mxu0 %v8925_v2  ;;  %v1500_v62 = vrot.slane %v6736_v29, 1  ;;  %v8951_v5 = vld [vmem:[#allocation67_spill] sm:$0xff] }
 0x289   : > { %4562 = vrot.lane.b32.xlu0 %v8941_v8, %s5037_s9  ;;  %v1683_v49 = vmul.f32 %v8944_v23, %v6885_v57  ;;  %v1852_v8 = vmul.f32 %v8945_v44, %v6906_v63  ;;  %v8947_v23 = vrot.slane %v6616_v32, 1  ;;  %v6937_v44 = vsel %vm1099_vm4, %v8949_v36, %v1079_v50  ;;  %v8950_v32 = vld [vmem:[#allocation112_spill] sm:$0xff] }
 0x28a   : > { %v6911_v27 = vpop.permute.xlu1 %2262  ;;  %4203 = vmatpush1.bf16.msra.mxu1 %v4978_v15  ;;  %v1688_v18 = vmul.f32 %v8951_v5, %v6922_v17  ;;  %v8953_v50 = vrot.slane %v8836_v16, 1 }
 0x28b   : > { %v6928_v1 = vsel %vm1516_vm5, %v8947_v23, %v1493_v33  ;;  %v6930_v0 = vpop.permute.xlu0 %2314  ;;  %v1851_v33 = vmul.f32 %v8950_v32, %v6937_v44  ;;  %4195 = vmatprep.subr.bf16.mxu1 %v8925_v2  ;;  %v8952_v23 = vld [vmem:[#allocation70_spill] sm:$0xff]  ;;  %v4506_v57 = vpack.i.bf16 %v1684_v47, %v1683_v49  ;;  %3800 = vmatpush1.bf16.msra.mxu0 %v4978_v15  ;;  %v8954_v49 = vld [vmem:[#allocation156_spill] sm:$0xff] }
 0x28c   : > { %8948 = vst [vmem:[#allocation46_spill] sm:$0xff] %v6930_v0  ;;  %4497 = vrot.lane.b32.xlu1 %v4496_v22, %s5035_s30  ;;  %v1687_v0 = vmul.f32 %v8952_v23, %v6928_v1  ;;  %v6953_v36 = vsel %vm1516_vm5, %v8953_v50, %v1499_v48  ;;  %v4979_v32 = vld [vmem:[%s8470_s4 + $0x20] sm:$0xff]   ;;  %3801 = vmatprep.subr.bf16.mxu0 %v8925_v2 }
 0x28d   : > { %4572 = vrot.lane.b32.xlu0 %v4571_v54, %s5038_s12  ;;  %v4581_v54 = vpack.i.bf16 %v1852_v8, %v1851_v33  ;;  %v2011_v5 = vmul.f32 %v6353_v14, %v6953_v36  ;;  %v6965_v23 = vsel %vm1516_vm5, %v1499_v48, %v1500_v62  ;;  %v8543_v14 = vrot.slane %v6720_v4, 7  ;;  %v4980_v48 = vld [vmem:[%s8470_s4 + $0x28] sm:$0xff]  }
 0x28e   : > { %v6955_v22 = vpop.permute.xlu1 %2270  ;;  %4204 = vmatpush1.bf16.msra.mxu1 %v4979_v32  ;;  %v2012_v47 = vmul.f32 %v8954_v49, %v6965_v23  ;;  %v4516_v8 = vpack.i.bf16 %v1688_v18, %v1687_v0  ;;  %v2332_v0 = vmul.f32 %v6677_v31, %v6720_v4  ;;  %v1501_v18 = vrot.slane %v6720_v4, 1 }
 0x28f   : > { %4196 = vmatprep.subr.bf16.mxu1 %v8925_v2  ;;  %3802 = vmatpush1.bf16.msra.mxu0 %v4979_v32  ;;  %v2168_v32 = vmul.f32 %v6443_v51, %v8916_v60  ;;  %v4526_v31 = vpack.i.bf16 %v6511_v59, %v6520_v55  ;;  %v2167_v60 = vmul.f32 %v6409_v43, %v6825_v41 }
 0x290   : > { %v6967_v50 = vpop.permute.xlu0 %2354  ;;  %4507 = vrot.lane.b32.xlu1 %v4506_v57, %s5035_s30  ;;  %v4591_v33 = vpack.i.bf16 %v2012_v47, %v2011_v5  ;;  %v2331_v57 = vmul.f32 %v6843_v10, %v6736_v29  ;;  %3803 = vmatprep.subr.bf16.mxu0 %v8925_v2  ;;  %v4981_v47 = vld [vmem:[%s8470_s4 + $0x30] sm:$0xff]   ;;  %v7030_v43 = vsel %vm1516_vm5, %v1500_v62, %v1501_v18  ;;  %v8963_v62 = vld [vmem:[#allocation71_spill] sm:$0xff] }
 0x291   : > { %4582 = vrot.lane.b32.xlu0 %v4581_v54, %s5036_s8  ;;  %v1081_v54 = vrot.slane %v6736_v29, 7 }
 0x292   : > { %v6975_v15 = vpop.permute.xlu1 %2278  ;;  %4205 = vmatpush1.bf16.msra.mxu1 %v4980_v48 }
 0x293   : > { %4197 = vmatprep.subr.bf16.mxu1 %v8925_v2  ;;  %v6995_v10 = vsel %vm1099_vm4, %v1081_v54, %v8543_v14  ;;  %3804 = vmatpush1.bf16.msra.mxu0 %v4980_v48  ;;  %v4601_v14 = vpack.i.bf16 %v2332_v0, %v2331_v57  ;;  %v8960_v48 = vld [vmem:[#allocation116_spill] sm:$0xff]  ;;  %v8961_v0 = vld [vmem:[#allocation69_spill] sm:$0xff] }
 0x294   : > { %v6984_v49 = vpop.permute.xlu0 %2366  ;;  %4517 = vrot.lane.b32.xlu1 %v4516_v8, %s5035_s30  ;;  %8956 = vst [vmem:[#allocation43_spill] sm:$0xff] %v6995_v10  ;;  %v8957_v8 = vld [vmem:[#allocation130_spill] sm:$0xff]  ;;  %3805 = vmatprep.subr.bf16.mxu0 %v8925_v2 }
 0x295   : > { %8955 = vst [vmem:[#allocation118_spill] sm:$0xff] %v6984_v49  ;;  %4592 = vrot.lane.b32.xlu0 %v4591_v33, %s5037_s9  ;;  %v1854_v33 = vmul.f32 %v8957_v8, %v6995_v10  ;;  %v8958_v49 = vrot.slane %v6527_v24, 7  ;;  %v4536_v8 = vpack.i.bf16 %v2168_v32, %v2167_v60  ;;  %v1689_v60 = vmul.f32 %v8963_v62, %v6759_v39  ;;  %v4983_v62 = vld [vmem:[%s8470_s4 + $0x40] sm:$0xff]  }
 0x296   : > { %v7000_v5 = vpop.permute.xlu1 %2286  ;;  %4206 = vmatpush1.bf16.msra.mxu1 %v4981_v47  ;;  %v1504_v39 = vrot.slane %v6769_v40, 1 }
 0x297   : > { %v7014_v51 = vsel %vm1099_vm4, %v8958_v49, %v1081_v54  ;;  %4198 = vmatprep.subr.bf16.mxu1 %v8925_v2  ;;  %v1690_v54 = vmul.f32 %v8961_v0, %v6777_v9  ;;  %v1502_v49 = vrot.slane %v6552_v53, 1  ;;  %3806 = vmatpush1.bf16.msra.mxu0 %v4981_v47  ;;  %v8965_v47 = vld [vmem:[#allocation158_spill] sm:$0xff]  ;;  %v2169_v9 = vmul.f32 %v6415_v19, %v6937_v44  ;;  %v8974_v19 = vld [vmem:[#allocation164_spill] sm:$0xff] }
 0x298   : > { %v7018_v59 = vpop.permute.xlu0 %2374  ;;  %4527 = vrot.lane.b32.xlu1 %v4526_v31, %s5039_s27  ;;  %v1853_v57 = vmul.f32 %v8960_v48, %v7014_v51  ;;  %v4982_v31 = vld [vmem:[%s8470_s4 + $0x38] sm:$0xff]   ;;  %v8962_v48 = vld [vmem:[#allocation162_spill] sm:$0xff]  ;;  %3807 = vmatprep.subr.bf16.mxu0 %v8925_v2 }
 0x299   : > { %8959 = vst [vmem:[#allocation153_spill] sm:$0xff] %v7018_v59  ;;  %4602 = vrot.lane.b32.xlu0 %v4601_v14, %s5038_s12  ;;  %v2013_v41 = vmul.f32 %v8962_v48, %v7030_v43  ;;  %v7042_v0 = vsel %vm1516_vm5, %v1501_v18, %v1502_v49  ;;  %v4546_v48 = vpack.i.bf16 %v1690_v54, %v1689_v60  ;;  %v8968_v60 = vld [vmem:[#allocation132_spill] sm:$0xff] }
 0x29a   : > { %v7032_v59 = vpop.permute.xlu1 %2294  ;;  %v4611_v14 = vpack.i.bf16 %v1854_v33, %v1853_v57  ;;  %4207 = vmatpush1.bf16.msra.mxu1 %v4982_v31  ;;  %v2014_v33 = vmul.f32 %v8965_v47, %v7042_v0  ;;  %v1084_v57 = vrot.slane %v6543_v21, 7  ;;  %v2334_v54 = vmul.f32 %v6707_v7, %v6543_v21 }
 0x29b   : > { %4199 = vmatprep.subr.bf16.mxu1 %v8925_v2  ;;  %3808 = vmatpush1.bf16.msra.mxu0 %v4982_v31  ;;  %v8969_v7 = vrot.slane %v6720_v4, 7 }
 0x29c   : > { %v7046_v32 = vpop.permute.xlu0 %2382  ;;  %4537 = vrot.lane.b32.xlu1 %v4536_v8, %s5040_s10  ;;  %v2333_v8 = vmul.f32 %v6875_v12, %v6552_v53  ;;  %3809 = vmatprep.subr.bf16.mxu0 %v8925_v2  ;;  %v1503_v12 = vrot.slane %v6543_v21, 1  ;;  %v2170_v2 = vmul.f32 %v6449_v35, %v6906_v63  ;;  %v8971_v35 = vpack.i.bf16 %v8909_v52, %v5969_v46 }
 0x29d   : > { %8964 = vst [vmem:[#allocation129_spill] sm:$0xff] %v7046_v32  ;;  %4612 = vrot.lane.b32.xlu0 %v4611_v14, %s5036_s8  ;;  %v4621_v32 = vpack.i.bf16 %v2014_v33, %v2013_v41  ;;  %v1083_v14 = vrot.slane %v6552_v53, 7  ;;  %v2478_v46 = vmul.f32 %v6967_v50, %v6655_v58 }
 0x29e   : > { %v7054_v18 = vpop.permute.xlu1 %2302  ;;  %4208 = vmatpush1.bf16.msra.mxu1 %v4983_v62  ;;  %v7106_v63 = vsel %vm1516_vm5, %v1503_v12, %v1504_v39 }
 0x29f   : > { %v7071_v41 = vsel %vm1099_vm4, %v1083_v14, %v1084_v57  ;;  %3810 = vmatpush1.bf16.msra.mxu0 %v4983_v62  ;;  %v8972_v62 = vld [vmem:[#allocation120_spill] sm:$0xff] }
 0x2a0   : > { %v7063_v47 = vpop.permute.xlu0 %2390  ;;  %4547 = vrot.lane.b32.xlu1 %v4546_v48, %s5035_s30  ;;  %8966 = vst [vmem:[#allocation50_spill] sm:$0xff] %v7071_v41  ;;  %v1856_v33 = vmul.f32 %v8968_v60, %v7071_v41  ;;  %v4631_v48 = vpack.i.bf16 %v2334_v54, %v2333_v8  ;;  %v4566_v54 = vpack.i.bf16 %v2170_v2, %v2169_v9  ;;  %v8975_v9 = vld [vmem:[#allocation159_spill] sm:$0xff]  ;;  %v8551_v2 = vrot.slane %v6751_v56, 7 }
 0x2a1   : > { %4622 = vrot.lane.b32.xlu0 %v4621_v32, %s5037_s9  ;;  %v7084_v32 = vsel %vm1099_vm4, %v8969_v7, %v1083_v14  ;;  %v7100_v14 = vsel %vm1516_vm5, %v1502_v49, %v1503_v12  ;;  %v2016_v49 = vmul.f32 %v8975_v9, %v7106_v63  ;;  %v8982_v9 = vld [vmem:[#allocation134_spill] sm:$0xff] }
 0x2a2   : > { %v7076_v31 = vpop.permute.xlu1 %2310  ;;  %8970 = vst [vmem:[#allocation126_spill] sm:$0xff] %v7084_v32  ;;  %v1855_v8 = vmul.f32 %v8972_v62, %v7084_v32  ;;  %8973 = vst [vmem:[#allocation47_spill] sm:$0xff] %v7100_v14  ;;  %v2015_v7 = vmul.f32 %v8974_v19, %v7100_v14  ;;  %v2336_v19 = vmul.f32 %v6734_v20, %v6751_v56 }
 0x2a3   : > { %8967 = vst [vmem:[#allocation99_spill] sm:$0xff] %v7076_v31 }
 0x2a4   : > { %v7089_v55 = vpop.permute.xlu0 %2398  ;;  %4557 = vrot.lane.b32.xlu1 %v8971_v35, %s5039_s27  ;;  %v4641_v60 = vpack.i.bf16 %v1856_v33, %v1855_v8  ;;  %v4651_v12 = vpack.i.bf16 %v2016_v49, %v2015_v7  ;;  %v2335_v35 = vmul.f32 %v6911_v27, %v6769_v40  ;;  %v8978_v8 = vld [vmem:[#allocation148_spill] sm:$0xff]  ;;  %v1505_v7 = vrot.slane %v6751_v56, 1 }
 0x2a5   : > { %4632 = vrot.lane.b32.xlu0 %v4631_v48, %s5038_s12 }
 0x2a6   : > { %v4661_v20 = vpack.i.bf16 %v2336_v19, %v2335_v35  ;;  %v8989_v19 = vld [vmem:[#allocation166_spill] sm:$0xff] }
 0x2a7   : > { %v2351_v31 = vpop.permute.xlu1 %2350 }
 0x2a8   : > { %v2477_v52 = vmul.f32 %v2351_v31, %v6665_v38  ;;  %v7111_v48 = vpop.permute.xlu0 %2406  ;;  %4567 = vrot.lane.b32.xlu1 %v4566_v54, %s5040_s10  ;;  %v1085_v31 = vrot.slane %v6769_v40, 7  ;;  %v8979_v54 = vld [vmem:[#allocation149_spill] sm:$0xff] }
 0x2a9   : > { %4642 = vrot.lane.b32.xlu0 %v4641_v60, %s5036_s8  ;;  %v8980_v60 = vpack.i.bf16 %v8978_v8, %v8979_v54  ;;  %v2171_v8 = vmul.f32 %v6421_v3, %v7014_v51 }
 0x2aa   : > { %v3637_v33 = vpack.c.bf16 %v2478_v46, %v2477_v52  ;;  %v7137_v27 = vsel %vm1099_vm4, %v1085_v31, %v8551_v2  ;;  %v2172_v46 = vmul.f32 %v6459_v6, %v6995_v10  ;;  %v4586_v52 = vpack.i.bf16 %v6527_v24, %v8836_v16  ;;  %v8986_v6 = vld [vmem:[#allocation124_spill] sm:$0xff]  ;;  %v9155_v10 = vld [vmem:[#allocation3_spill] sm:$0xff] }
 0x2ab   : > { %v7120_v50 = vpop.permute.xlu1 %2358  ;;  %8981 = vst [vmem:[#allocation51_spill] sm:$0xff] %v7137_v27  ;;  %v1858_v49 = vmul.f32 %v8982_v9, %v7137_v27  ;;  %v8987_v16 = vld [vmem:[#allocation72_spill] sm:$0xff] }
 0x2ac   : > { %8976 = vst [vmem:[#allocation54_spill] sm:$0xff] %v7120_v50  ;;  %v7123_v62 = vpop.permute.xlu0 %2414  ;;  %4109 = vmatprep.mubr.msk.bf16.mxu0 %vm3405_vm6, %v3637_v33  ;;  %4577 = vrot.lane.b32.xlu1 %v8980_v60, %s5035_s30  ;;  %v1694_v35 = vmul.f32 %v8987_v16, %v6965_v23  ;;  %v8552_v60 = vrot.slane %v6574_v28, 1  ;;  %v8992_v16 = vld [vmem:[#allocation74_spill] sm:$0xff]  ;;  %v9008_v50 = vld [vmem:[#allocation125_spill] sm:$0xff] }
 0x2ad   : > { %8977 = vst [vmem:[#allocation123_spill] sm:$0xff] %v7123_v62  ;;  %4652 = vrot.lane.b32.xlu0 %v4651_v12, %s5037_s9  ;;  %v7150_v12 = vsel %vm1099_vm4, %v1084_v57, %v1085_v31  ;;  %v7165_v57 = vsel %vm1516_vm5, %v1504_v39, %v1505_v7  ;;  %v4596_v31 = vpack.i.bf16 %v2172_v46, %v2171_v8  ;;  %v8994_v46 = vld [vmem:[#allocation160_spill] sm:$0xff]  ;;  %v1065_v8 = vrot.slane %v6583_v26, 7 }
 0x2ae   : > { %8984 = vst [vmem:[#allocation58_spill] sm:$0xff] %v7150_v12  ;;  %v1857_v24 = vmul.f32 %v8986_v6, %v7150_v12  ;;  %8988 = vst [vmem:[#allocation62_spill] sm:$0xff] %v7165_v57  ;;  %v2017_v9 = vmul.f32 %v8989_v19, %v7165_v57  ;;  %v8553_v6 = vrot.slane %v6465_v34, 7  ;;  %v1693_v2 = vmul.f32 %v8992_v16, %v6953_v36 }
 0x2af   : > { %v7146_v33 = vpop.permute.xlu1 %2362  ;;  %v1066_v16 = vrot.slane %v6606_v61, 7 }
 0x2b0   : > { %8983 = vst [vmem:[#allocation108_spill] sm:$0xff] %v7146_v33  ;;  %v7154_v54 = vpop.permute.xlu0 %2422  ;;  %4587 = vrot.lane.b32.xlu1 %v4586_v52, %s5039_s27  ;;  %v4671_v3 = vpack.i.bf16 %v1858_v49, %v1857_v24  ;;  %v4606_v24 = vpack.i.bf16 %v1694_v35, %v1693_v2  ;;  %v8998_v2 = vld [vmem:[#allocation34_spill] sm:$0xff] }
 0x2b1   : > { %8985 = vst [vmem:[#allocation55_spill] sm:$0xff] %v7154_v54  ;;  %4662 = vrot.lane.b32.xlu0 %v4661_v20, %s5038_s12  ;;  %v7176_v20 = vsel %vm1516_vm5, %v1505_v7, %v8552_v60  ;;  %v2337_v7 = vmul.f32 %v6955_v22, %v6574_v28  ;;  %v2338_v35 = vmul.f32 %v8998_v2, %v6563_v25  ;;  %v8999_v22 = vld [vmem:[#allocation192_spill] sm:$0xff]  ;;  %v9003_v2 = vld [vmem:[#allocation182_spill] sm:$0xff] }
 0x2b2   : > { %8991 = vst [vmem:[#allocation63_spill] sm:$0xff] %v7176_v20  ;;  %v2018_v49 = vmul.f32 %v8994_v46, %v7176_v20 }
 0x2b3   : > { %v7169_v52 = vpop.permute.xlu1 %2370 }
 0x2b4   : > { %8990 = vst [vmem:[#allocation59_spill] sm:$0xff] %v7169_v52  ;;  %v7180_v39 = vpop.permute.xlu0 %2430  ;;  %4597 = vrot.lane.b32.xlu1 %v4596_v31, %s5040_s10  ;;  %v4681_v19 = vpack.i.bf16 %v2018_v49, %v2017_v9  ;;  %v7196_v31 = vsel %vm1099_vm4, %v8553_v6, %v1065_v8  ;;  %v4616_v9 = vpack.i.bf16 %v6720_v4, %v6736_v29  ;;  %v9000_v49 = vld [vmem:[#allocation96_spill] sm:$0xff]  ;;  %v9006_v29 = vld [vmem:[#allocation73_spill] sm:$0xff] }
 0x2b5   : > { %8993 = vst [vmem:[#allocation66_spill] sm:$0xff] %v7180_v39  ;;  %4672 = vrot.lane.b32.xlu0 %v4671_v3, %s5036_s8  ;;  %8996 = vst [vmem:[#allocation112_spill] sm:$0xff] %v7196_v31  ;;  %v2174_v3 = vmul.f32 %v8999_v22, %v7071_v41  ;;  %v4691_v6 = vpack.i.bf16 %v2338_v35, %v2337_v7  ;;  %v9005_v22 = vld [vmem:[#allocation92_spill] sm:$0xff]  ;;  %v1696_v7 = vmul.f32 %v9006_v29, %v7042_v0  ;;  %v9011_v29 = vld [vmem:[#allocation150_spill] sm:$0xff] }
 0x2b6   : > { %v9007_v35 = vld [vmem:[#allocation76_spill] sm:$0xff]  ;;  %v1998_v54 = vmul.f32 %v9011_v29, %v6854_v42 }
 0x2b7   : > { %v7189_v60 = vpop.permute.xlu1 %2378 }
 0x2b8   : > { %8995 = vst [vmem:[#allocation127_spill] sm:$0xff] %v7189_v60  ;;  %v7198_v46 = vpop.permute.xlu0 %2438  ;;  %4607 = vrot.lane.b32.xlu1 %v4606_v24, %s5035_s30  ;;  %v1837_v60 = vmul.f32 %v9000_v49, %v7196_v31  ;;  %v7214_v24 = vsel %vm1099_vm4, %v1065_v8, %v1066_v16  ;;  %v1695_v49 = vmul.f32 %v9007_v35, %v7030_v43 }
 0x2b9   : > { %8997 = vst [vmem:[#allocation67_spill] sm:$0xff] %v7198_v46  ;;  %4682 = vrot.lane.b32.xlu0 %v4681_v19, %s5037_s9  ;;  %9002 = vst [vmem:[#allocation156_spill] sm:$0xff] %v7214_v24  ;;  %v2173_v46 = vmul.f32 %v9003_v2, %v7084_v32  ;;  %v1838_v4 = vmul.f32 %v9005_v22, %v7214_v24  ;;  %v2487_v2 = vmul.f32 %v7063_v47, %v9008_v50 }
 0x2ba   : > { %v4636_v22 = vpack.i.bf16 %v1696_v7, %v1695_v49  ;;  %v1067_v50 = vrot.slane %v6484_v30, 7  ;;  %v4646_v7 = vpack.i.bf16 %v6543_v21, %v6552_v53  ;;  %v9022_v21 = vld [vmem:[#allocation171_spill] sm:$0xff] }
 0x2bb   : > { %v7210_v52 = vpop.permute.xlu1 %2386  ;;  %v4626_v8 = vpack.i.bf16 %v2174_v3, %v2173_v46  ;;  %v4701_v33 = vpack.i.bf16 %v1838_v4, %v1837_v60  ;;  %v4711_v60 = vpack.i.bf16 %v6606_v61, %v6583_v26  ;;  %v9012_v46 = vld [vmem:[#allocation194_spill] sm:$0xff] }
 0x2bc   : > { %9001 = vst [vmem:[#allocation70_spill] sm:$0xff] %v7210_v52  ;;  %v7218_v19 = vpop.permute.xlu0 %2446  ;;  %4617 = vrot.lane.b32.xlu1 %v4616_v9, %s5039_s27  ;;  %v8554_v47 = vrot.slane %v9012_v46, 7  ;;  %v7252_v3 = vsel %vm1099_vm4, %v1066_v16, %v1067_v50  ;;  %v9019_v16 = vld [vmem:[#allocation64_spill] sm:$0xff] }
 0x2bd   : > { %9004 = vst [vmem:[#allocation130_spill] sm:$0xff] %v7218_v19  ;;  %4692 = vrot.lane.b32.xlu0 %v4691_v6, %s5038_s12  ;;  %v9009_v19 = vld [vmem:[#allocation145_spill] sm:$0xff]  ;;  %9015 = vst [vmem:[#allocation162_spill] sm:$0xff] %v7252_v3  ;;  %v1508_v29 = vrot.slane %v9019_v16, 1 }
 0x2bf   : > { %v2395_v52 = vpop.permute.xlu1 %2394 }
 0x2c0   : > { %v2488_v39 = vmul.f32 %v2395_v52, %v9009_v19  ;;  %v7231_v9 = vpop.permute.xlu0 %2454  ;;  %4627 = vrot.lane.b32.xlu1 %v4626_v8, %s5040_s10  ;;  %v9016_v19 = vld [vmem:[#allocation195_spill] sm:$0xff]  ;;  %v9017_v8 = vld [vmem:[#allocation178_spill] sm:$0xff] }
 0x2c1   : > { %9010 = vst [vmem:[#allocation116_spill] sm:$0xff] %v7231_v9  ;;  %4702 = vrot.lane.b32.xlu0 %v4701_v33, %s5036_s8  ;;  %v9014_v33 = vld [vmem:[#allocation139_spill] sm:$0xff]  ;;  %v2176_v4 = vmul.f32 %v9016_v19, %v7137_v27  ;;  %v1087_v9 = vrot.slane %v6574_v28, 7 }
 0x2c2   : > { %v3647_v6 = vpack.c.bf16 %v2488_v39, %v2487_v2  ;;  %v1997_v39 = vmul.f32 %v9014_v33, %v6840_v11  ;;  %v2157_v2 = vmul.f32 %v9017_v8, %v7252_v3  ;;  %v9024_v11 = vld [vmem:[#allocation81_spill] sm:$0xff] }
 0x2c3   : > { %v7237_v35 = vpop.permute.xlu1 %2402  ;;  %v2318_v42 = vmul.f32 %v9024_v11, %v9012_v46  ;;  %v9030_v11 = vld [vmem:[#allocation61_spill] sm:$0xff] }
 0x2c4   : > { %v7243_v52 = vpop.permute.xlu0 %2462  ;;  %4114 = vmatprep.mubr.msk.bf16.mxu1 %vm3405_vm6, %v3647_v6  ;;  %4637 = vrot.lane.b32.xlu1 %v4636_v22, %s5035_s30  ;;  %v4721_v49 = vpack.i.bf16 %v1998_v54, %v1997_v39  ;;  %v7266_v22 = vsel %vm1099_vm4, %v1067_v50, %v8554_v47  ;;  %v9023_v54 = vld [vmem:[#allocation75_spill] sm:$0xff]  ;;  %v1507_v50 = vrot.slane %v6563_v25, 1 }
 0x2c5   : > { %9013 = vst [vmem:[#allocation69_spill] sm:$0xff] %v7243_v52  ;;  %4712 = vrot.lane.b32.xlu0 %v4711_v60, %s5039_s27  ;;  %9018 = vst [vmem:[#allocation71_spill] sm:$0xff] %v7266_v22  ;;  %v9020_v60 = vld [vmem:[#allocation184_spill] sm:$0xff]  ;;  %v2158_v53 = vmul.f32 %v9022_v21, %v7266_v22  ;;  %v1698_v39 = vmul.f32 %v9023_v54, %v7106_v63  ;;  %v9027_v21 = vld [vmem:[#allocation78_spill] sm:$0xff]  ;;  %v1088_v54 = vrot.slane %v6563_v25, 7 }
 0x2c6   : > { %v2175_v33 = vmul.f32 %v9020_v60, %v7150_v12 }
 0x2c7   : > { %v7260_v6 = vpop.permute.xlu1 %2410  ;;  %v4731_v47 = vpack.i.bf16 %v2158_v53, %v2157_v2  ;;  %v9031_v53 = vrot.slane %v6574_v28, 1  ;;  %v7315_v31 = vsel %vm1099_vm4, %v1087_v9, %v1088_v54 }
 0x2c8   : > { %v7271_v19 = vpop.permute.xlu0 %2470  ;;  %4647 = vrot.lane.b32.xlu1 %v4646_v7, %s5039_s27  ;;  %v4656_v8 = vpack.i.bf16 %v2176_v4, %v2175_v33  ;;  %v7286_v7 = vsel %vm1516_vm5, %v1507_v50, %v1508_v29  ;;  %v9029_v4 = vld [vmem:[#allocation201_spill] sm:$0xff]  ;;  %v1090_v33 = vrot.slane %v9030_v11, 7  ;;  %9036 = vst [vmem:[#allocation134_spill] sm:$0xff] %v7315_v31 }
 0x2c9   : > { %9021 = vst [vmem:[#allocation158_spill] sm:$0xff] %v7271_v19  ;;  %4722 = vrot.lane.b32.xlu0 %v4721_v49, %s5037_s9  ;;  %9026 = vst [vmem:[#allocation120_spill] sm:$0xff] %v7286_v7  ;;  %v1697_v19 = vmul.f32 %v9027_v21, %v7100_v14  ;;  %v2317_v2 = vmul.f32 %v9029_v4, %v6484_v30  ;;  %v7302_v52 = vsel %vm1516_vm5, %v9031_v53, %v1507_v50  ;;  %v9039_v50 = vld [vmem:[#allocation199_spill] sm:$0xff] }
 0x2ca   : > { %9032 = vst [vmem:[#allocation159_spill] sm:$0xff] %v7302_v52  ;;  %v1089_v4 = vrot.slane %v9019_v16, 7  ;;  %v4676_v53 = vpack.i.bf16 %v6751_v56, %v6769_v40 }
 0x2cb   : > { %v7282_v60 = vpop.permute.xlu1 %2418  ;;  %v4666_v21 = vpack.i.bf16 %v1698_v39, %v1697_v19  ;;  %v4741_v12 = vpack.i.bf16 %v2318_v42, %v2317_v2  ;;  %v9037_v19 = vld [vmem:[#allocation84_spill] sm:$0xff]  ;;  %v2178_v2 = vmul.f32 %v9039_v50, %v7315_v31  ;;  %v9045_v50 = vld [vmem:[#allocation186_spill] sm:$0xff] }
 0x2cc   : > { %9025 = vst [vmem:[#allocation132_spill] sm:$0xff] %v7282_v60  ;;  %v7290_v49 = vpop.permute.xlu0 %4412  ;;  %4657 = vrot.lane.b32.xlu1 %v4656_v8, %s5040_s10  ;;  %v9033_v8 = vld [vmem:[#allocation79_spill] sm:$0xff]  ;;  %v1701_v39 = vmul.f32 %v9037_v19, %v7302_v52  ;;  %v7322_v42 = vsel %vm1099_vm4, %v1089_v4, %v1090_v33  ;;  %v9042_v19 = vld [vmem:[#allocation138_spill] sm:$0xff]  ;;  %v7340_v41 = vsel %vm1099_vm4, %v1088_v54, %v1089_v4 }
 0x2cd   : > { %9028 = vst [vmem:[#allocation164_spill] sm:$0xff] %v7290_v49  ;;  %4732 = vrot.lane.b32.xlu0 %v4731_v47, %s5040_s10  ;;  %v1702_v27 = vmul.f32 %v9033_v8, %v7286_v7  ;;  %9038 = vst [vmem:[#allocation124_spill] sm:$0xff] %v7322_v42  ;;  %v9049_v54 = vld [vmem:[#allocation82_spill] sm:$0xff] }
 0x2ce   : > { %9044 = vst [vmem:[#allocation74_spill] sm:$0xff] %v7340_v41  ;;  %v1699_v4 = vmul.f32 %v9049_v54, %v7165_v57 }
 0x2cf   : > { %v7307_v61 = vpop.permute.xlu1 %2426 }
 0x2d0   : > { %9034 = vst [vmem:[#allocation148_spill] sm:$0xff] %v7307_v61  ;;  %v7310_v47 = vpop.permute.xlu0 %4422  ;;  %4667 = vrot.lane.b32.xlu1 %v4666_v21, %s5035_s30  ;;  %v9040_v21 = vrot.slane %v6751_v56, 7  ;;  %v4751_v61 = vpack.i.bf16 %v1702_v27, %v1701_v39  ;;  %v9047_v56 = vld [vmem:[#allocation131_spill] sm:$0xff]  ;;  %v1509_v27 = vrot.slane %v9030_v11, 1 }
 0x2d1   : > { %9035 = vst [vmem:[#allocation149_spill] sm:$0xff] %v7310_v47  ;;  %4742 = vrot.lane.b32.xlu0 %v4741_v12, %s5038_s12  ;;  %v1862_v47 = vmul.f32 %v9042_v19, %v7322_v42 }
 0x2d2   : > { %v7332_v8 = vsel %vm1099_vm4, %v9040_v21, %v1087_v9  ;;  %v1861_v9 = vmul.f32 %v9047_v56, %v7340_v41  ;;  %v9048_v21 = vld [vmem:[#allocation77_spill] sm:$0xff]  ;;  %v7367_v54 = vsel %vm1516_vm5, %v1508_v29, %v1509_v27 }
 0x2d3   : > { %9041 = vst [vmem:[#allocation72_spill] sm:$0xff] %v7332_v8  ;;  %v7336_v12 = vpop.permute.xlu1 %2434  ;;  %v2177_v26 = vmul.f32 %v9045_v50, %v7332_v8  ;;  %v1700_v19 = vmul.f32 %v9048_v21, %v7176_v20  ;;  %v9053_v20 = vld [vmem:[#allocation80_spill] sm:$0xff]  ;;  %9054 = vst [vmem:[#allocation192_spill] sm:$0xff] %v7367_v54 }
 0x2d4   : > { %9043 = vst [vmem:[#allocation166_spill] sm:$0xff] %v7336_v12  ;;  %v7344_v40 = vpop.permute.xlu0 %4432  ;;  %4677 = vrot.lane.b32.xlu1 %v4676_v53, %s5039_s27  ;;  %v4761_v12 = vpack.i.bf16 %v1862_v47, %v1861_v9  ;;  %v9051_v53 = vld [vmem:[#allocation141_spill] sm:$0xff]  ;;  %v8571_v24 = vrot.slane %v9053_v20, 1  ;;  %v9055_v47 = vld [vmem:[#allocation170_spill] sm:$0xff] }
 0x2d5   : > { %9046 = vst [vmem:[#allocation160_spill] sm:$0xff] %v7344_v40  ;;  %4752 = vrot.lane.b32.xlu0 %v4751_v61, %s5035_s30  ;;  %v4686_v39 = vpack.i.bf16 %v2178_v2, %v2177_v26  ;;  %v9052_v61 = vld [vmem:[#allocation136_spill] sm:$0xff]  ;;  %v4696_v26 = vpack.i.bf16 %v1700_v19, %v1699_v4  ;;  %v2021_v2 = vmul.f32 %v9055_v47, %v7367_v54  ;;  %v9060_v4 = vld [vmem:[#allocation163_spill] sm:$0xff] }
 0x2d6   : > { %v1860_v21 = vmul.f32 %v9052_v61, %v7315_v31  ;;  %v1091_v61 = vrot.slane %v9053_v20, 7  ;;  %v7382_v29 = vsel %vm1516_vm5, %v1509_v27, %v8571_v24  ;;  %v9063_v27 = vld [vmem:[#allocation41_spill] sm:$0xff] }
 0x2d7   : > { %v7355_v50 = vpop.permute.xlu1 %2442  ;;  %9058 = vst [vmem:[#allocation182_spill] sm:$0xff] %v7382_v29  ;;  %v2022_v47 = vmul.f32 %v9060_v4, %v7382_v29 }
 0x2d8   : > { %9050 = vst [vmem:[#allocation34_spill] sm:$0xff] %v7355_v50  ;;  %v7357_v40 = vpop.permute.xlu0 %4442  ;;  %4687 = vrot.lane.b32.xlu1 %v4686_v39, %s5040_s10  ;;  %v4771_v39 = vpack.i.bf16 %v9030_v11, %v9019_v16 }
 0x2d9   : > { %4762 = vrot.lane.b32.xlu0 %v4761_v12, %s5036_s8  ;;  %v9057_v12 = vld [vmem:[#allocation128_spill] sm:$0xff] }
 0x2da   : > { %v1859_v56 = vmul.f32 %v9057_v12, %v7332_v8  ;;  %v9061_v12 = vrot.slane %v9051_v53, 7 }
 0x2db   : > { %v7371_v9 = vpop.permute.xlu1 %2450 }
 0x2dc   : > { %9056 = vst [vmem:[#allocation96_spill] sm:$0xff] %v7371_v9  ;;  %v7384_v19 = vpop.permute.xlu0 %4452  ;;  %4697 = vrot.lane.b32.xlu1 %v4696_v26, %s5035_s30  ;;  %v4706_v31 = vpack.i.bf16 %v1860_v21, %v1859_v56  ;;  %v7394_v8 = vsel %vm1099_vm4, %v1091_v61, %v9061_v12  ;;  %v4781_v9 = vpack.i.bf16 %v2022_v47, %v2021_v2  ;;  %v9067_v56 = vld [vmem:[#allocation188_spill] sm:$0xff]  ;;  %v1070_v2 = vrot.slane %v6636_v13, 7 }
 0x2dd   : > { %9059 = vst [vmem:[#allocation92_spill] sm:$0xff] %v7384_v19  ;;  %4772 = vrot.lane.b32.xlu0 %v4771_v39, %s5039_s27  ;;  %9062 = vst [vmem:[#allocation73_spill] sm:$0xff] %v7394_v8  ;;  %v2182_v24 = vmul.f32 %v9063_v27, %v7394_v8  ;;  %v7402_v26 = vsel %vm1099_vm4, %v1090_v33, %v1091_v61  ;;  %v9068_v39 = vld [vmem:[#allocation168_spill] sm:$0xff]  ;;  %v4716_v12 = vpack.i.bf16 %v6563_v25, %v6574_v28  ;;  %v9157_v19 = vld [vmem:[#allocation111_spill] sm:$0xff] }
 0x2de   : > { %9065 = vst [vmem:[#allocation125_spill] sm:$0xff] %v7402_v26  ;;  %v2181_v21 = vmul.f32 %v9067_v56, %v7402_v26  ;;  %v2019_v47 = vmul.f32 %v9068_v39, %v7302_v52  ;;  %v2341_v33 = vmul.f32 %v7000_v5, %v9053_v20  ;;  %v9070_v56 = vld [vmem:[#allocation161_spill] sm:$0xff]  ;;  %v9072_v39 = vld [vmem:[#allocation40_spill] sm:$0xff]  ;;  %v9074_v5 = vld [vmem:[#allocation203_spill] sm:$0xff] }
 0x2df   : > { %v7398_v50 = vpop.permute.xlu1 %2458  ;;  %v9080_v52 = vld [vmem:[#allocation187_spill] sm:$0xff] }
 0x2e0   : > { %9064 = vst [vmem:[#allocation76_spill] sm:$0xff] %v7398_v50  ;;  %v7404_v4 = vpop.permute.xlu0 %4462  ;;  %4707 = vrot.lane.b32.xlu1 %v4706_v31, %s5036_s8  ;;  %v4791_v27 = vpack.i.bf16 %v2182_v24, %v2181_v21  ;;  %v1069_v31 = vrot.slane %v6593_v45, 7  ;;  %v2020_v50 = vmul.f32 %v9070_v56, %v7286_v7  ;;  %v2180_v24 = vmul.f32 %v9074_v5, %v7322_v42  ;;  %v9075_v21 = vld [vmem:[#allocation107_spill] sm:$0xff] }
 0x2e1   : > { %9066 = vst [vmem:[#allocation145_spill] sm:$0xff] %v7404_v4  ;;  %4782 = vrot.lane.b32.xlu0 %v4781_v9, %s5037_s9  ;;  %v2342_v4 = vmul.f32 %v9072_v39, %v9051_v53  ;;  %v9078_v39 = vrot.slane %v9012_v46, 7  ;;  %v9082_v5 = vld [vmem:[#allocation95_spill] sm:$0xff] }
 0x2e2   : > { %v7430_v25 = vsel %vm1099_vm4, %v1069_v31, %v1070_v2  ;;  %v4726_v28 = vpack.i.bf16 %v2020_v50, %v2019_v47  ;;  %v2179_v50 = vmul.f32 %v9080_v52, %v7340_v41  ;;  %v2339_v52 = vmul.f32 %v6975_v15, %v9019_v16  ;;  %v9088_v15 = vld [vmem:[#allocation197_spill] sm:$0xff]  ;;  %v9095_v16 = vld [vmem:[#allocation98_spill] sm:$0xff] }
 0x2e3   : > { %v7417_v61 = vpop.permute.xlu1 %2466  ;;  %9073 = vst [vmem:[#allocation139_spill] sm:$0xff] %v7430_v25  ;;  %v1842_v56 = vmul.f32 %v9075_v21, %v7430_v25  ;;  %v4801_v7 = vpack.i.bf16 %v2342_v4, %v2341_v33  ;;  %v9083_v4 = vrot.slane %v6465_v34, 7 }
 0x2e4   : > { %9069 = vst [vmem:[#allocation150_spill] sm:$0xff] %v7417_v61  ;;  %v7422_v9 = vpop.permute.xlu0 %4472  ;;  %4717 = vrot.lane.b32.xlu1 %v4716_v12, %s5039_s27  ;;  %v9076_v61 = vld [vmem:[#allocation191_spill] sm:$0xff] }
 0x2e5   : > { %9071 = vst [vmem:[#allocation194_spill] sm:$0xff] %v7422_v9  ;;  %4792 = vrot.lane.b32.xlu0 %v4791_v27, %s5040_s10  ;;  %v8579_v9 = vrot.slane %v9076_v61, 7  ;;  %v7443_v27 = vsel %vm1099_vm4, %v9078_v39, %v1069_v31  ;;  %v4736_v31 = vpack.i.bf16 %v2180_v24, %v2179_v50  ;;  %v4415_v39 = vunpack.i.h.bf16 %v7290_v49  ;;  %v9089_v24 = vld [vmem:[#allocation103_spill] sm:$0xff] }
 0x2e6   : > { %9079 = vst [vmem:[#allocation178_spill] sm:$0xff] %v7443_v27  ;;  %v1841_v21 = vmul.f32 %v9082_v5, %v7443_v27  ;;  %v9085_v5 = vld [vmem:[#allocation7_spill] sm:$0xff]  ;;  %v1839_v49 = vmul.f32 %v9095_v16, %v7252_v3 }
 0x2e7   : > { %v7437_v12 = vpop.permute.xlu1 %2474  ;;  %v7458_v33 = vsel %vm1099_vm4, %v8579_v9, %v9083_v4  ;;  %v9091_v9 = vld [vmem:[#allocation154_spill] sm:$0xff] }
 0x2e8   : > { %9077 = vst [vmem:[#allocation195_spill] sm:$0xff] %v7437_v12  ;;  %v7447_v47 = vpop.permute.xlu0 %4482  ;;  %4727 = vrot.lane.b32.xlu1 %v4726_v28, %s5037_s9  ;;  %v4811_v28 = vpack.i.bf16 %v1842_v56, %v1841_v21  ;;  %v1293_v42 = vmul.f32 %v9085_v5, %v7458_v33  ;;  %v1840_v56 = vmul.f32 %v9089_v24, %v7266_v22  ;;  %v9090_v5 = vld [vmem:[#allocation110_spill] sm:$0xff] }
 0x2e9   : > { %9081 = vst [vmem:[#allocation64_spill] sm:$0xff] %v7447_v47  ;;  %4802 = vrot.lane.b32.xlu0 %v4801_v7, %s5038_s12  ;;  %v9086_v47 = vld [vmem:[#allocation36_spill] sm:$0xff] }
 0x2ea   : > { %v2340_v41 = vmul.f32 %v9086_v47, %v9030_v11  ;;  %v3407_v21 = vsel %vm3405_vm6, %v1293_v42, %v4415_v39  ;;  %v2001_v11 = vmul.f32 %v9091_v9, %v9090_v5  ;;  %v9098_v42 = vld [vmem:[#allocation144_spill] sm:$0xff]  ;;  %v9099_v39 = vrot.slane %v9088_v15, 7 }
 0x2eb   : > { %v7464_v12 = vpop.permute.xlu1 %4417 }
 0x2ec   : > { %9084 = vst [vmem:[#allocation184_spill] sm:$0xff] %v7464_v12  ;;  %v7470_v4 = vpop.permute.xlu0 %4492  ;;  %4737 = vrot.lane.b32.xlu1 %v4736_v31, %s5040_s10  ;;  %v4746_v50 = vpack.i.bf16 %v2340_v41, %v2339_v52  ;;  %v4821_v31 = vpack.i.bf16 %v6636_v13, %v6593_v45  ;;  %v9097_v41 = vld [vmem:[#allocation119_spill] sm:$0xff]  ;;  %v4756_v52 = vpack.i.bf16 %v1840_v56, %v1839_v49  ;;  %v9104_v49 = vld [vmem:[#allocation173_spill] sm:$0xff] }
 0x2ed   : > { %9087 = vst [vmem:[#allocation171_spill] sm:$0xff] %v7470_v4  ;;  %v4495_v7 = vunpack.i.h.bf16 %v7470_v4  ;;  %4812 = vrot.lane.b32.xlu0 %v4811_v28, %s5036_s8  ;;  %v9094_v28 = vld [vmem:[#allocation198_spill] sm:$0xff]  ;;  %v2002_v9 = vmul.f32 %v9098_v42, %v9097_v41  ;;  %v9114_v41 = vld [vmem:[#allocation85_spill] sm:$0xff] }
 0x2ee   : > { %v1071_v4 = vrot.slane %v9094_v28, 7  ;;  %v9102_v42 = vld [vmem:[#allocation102_spill] sm:$0xff] }
 0x2ef   : > { %v7482_v47 = vsel %vm3438_vm7, %v3407_v21, %v4495_v7  ;;  %v7484_v12 = vpop.permute.xlu1 %4427  ;;  %v4831_v21 = vpack.i.bf16 %v2002_v9, %v2001_v11  ;;  %v9105_v11 = vld [vmem:[#allocation152_spill] sm:$0xff]  ;;  %v1511_v9 = vrot.slane %v9051_v53, 1  ;;  %v2343_v60 = vmul.f32 %v7032_v59, %v9102_v42 }
 0x2f0   : > { %9092 = vst [vmem:[#allocation75_spill] sm:$0xff] %v7482_v47  ;;  %9093 = vst [vmem:[#allocation81_spill] sm:$0xff] %v7484_v12  ;;  %v7491_v24 = vpop.permute.xlu0 %4502  ;;  %4747 = vrot.lane.b32.xlu1 %v4746_v50, %s5038_s12  ;;  %v7501_v7 = vsel %vm1099_vm4, %v1071_v4, %v9099_v39  ;;  %v9100_v12 = vld [vmem:[#allocation181_spill] sm:$0xff]  ;;  %v7509_v50 = vsel %vm1099_vm4, %v1070_v2, %v1071_v4  ;;  %v4766_v2 = vpack.i.bf16 %v9012_v46, %v6484_v30  ;;  %v9106_v39 = vld [vmem:[#allocation56_spill] sm:$0xff] }
 0x2f1   : > { %9096 = vst [vmem:[#allocation78_spill] sm:$0xff] %v7491_v24  ;;  %4822 = vrot.lane.b32.xlu0 %v4821_v31, %s5039_s27  ;;  %v2162_v16 = vmul.f32 %v9100_v12, %v7501_v7  ;;  %9101 = vst [vmem:[#allocation201_spill] sm:$0xff] %v7509_v50  ;;  %v1512_v24 = vrot.slane %v9102_v42, 1  ;;  %v2161_v56 = vmul.f32 %v9104_v49, %v7509_v50  ;;  %v9110_v46 = vld [vmem:[#allocation106_spill] sm:$0xff] }
 0x2f2   : > { %v1999_v12 = vmul.f32 %v9105_v11, %v6665_v38  ;;  %v2321_v22 = vmul.f32 %v9106_v39, %v9094_v28  ;;  %v9109_v38 = vld [vmem:[#allocation101_spill] sm:$0xff]  ;;  %v9111_v11 = vrot.slane %v9053_v20, 1  ;;  %v9113_v39 = vld [vmem:[#allocation180_spill] sm:$0xff] }
 0x2f3   : > { %v7505_v3 = vpop.permute.xlu1 %4437  ;;  %v4841_v4 = vpack.i.bf16 %v2162_v16, %v2161_v56  ;;  %v2322_v30 = vmul.f32 %v9109_v38, %v9088_v15  ;;  %v1094_v16 = vrot.slane %v9110_v46, 7  ;;  %v9116_v38 = vld [vmem:[#allocation179_spill] sm:$0xff] }
 0x2f4   : > { %v7512_v31 = vpop.permute.xlu0 %4512  ;;  %4757 = vrot.lane.b32.xlu1 %v4756_v52, %s5036_s8  ;;  %v9107_v52 = vld [vmem:[#allocation142_spill] sm:$0xff] }
 0x2f5   : > { %9103 = vst [vmem:[#allocation61_spill] sm:$0xff] %v7512_v31  ;;  %4832 = vrot.lane.b32.xlu0 %v4831_v21, %s5037_s9  ;;  %v2000_v47 = vmul.f32 %v9107_v52, %v6655_v58  ;;  %v7531_v21 = vsel %vm1516_vm5, %v1511_v9, %v1512_v24  ;;  %v7544_v58 = vsel %vm1516_vm5, %v9111_v11, %v1511_v9  ;;  %v9117_v9 = vld [vmem:[#allocation90_spill] sm:$0xff] }
 0x2f6   : > { %9108 = vst [vmem:[#allocation79_spill] sm:$0xff] %v7531_v21  ;;  %9112 = vst [vmem:[#allocation84_spill] sm:$0xff] %v7544_v58  ;;  %v2160_v52 = vmul.f32 %v9113_v39, %v7430_v25  ;;  %v4851_v5 = vpack.i.bf16 %v2322_v30, %v2321_v22  ;;  %v1705_v11 = vmul.f32 %v9117_v9, %v7544_v58  ;;  %v9119_v30 = vld [vmem:[#allocation91_spill] sm:$0xff] }
 0x2f7   : > { %v7525_v31 = vpop.permute.xlu1 %4447  ;;  %v4776_v56 = vpack.i.bf16 %v2000_v47, %v1999_v12  ;;  %v2159_v47 = vmul.f32 %v9116_v38, %v7443_v27  ;;  %v2319_v39 = vmul.f32 %v9119_v30, %v6593_v45  ;;  %v9120_v25 = vld [vmem:[#allocation143_spill] sm:$0xff] }
 0x2f8   : > { %v7533_v49 = vpop.permute.xlu0 %4522  ;;  %4767 = vrot.lane.b32.xlu1 %v4766_v2, %s5039_s27  ;;  %v1706_v2 = vmul.f32 %v9114_v41, %v7531_v21  ;;  %v9125_v45 = vld [vmem:[#allocation135_spill] sm:$0xff] }
 0x2f9   : > { %4842 = vrot.lane.b32.xlu0 %v4841_v4, %s5040_s10  ;;  %v1093_v4 = vrot.slane %v9102_v42, 7  ;;  %v4786_v22 = vpack.i.bf16 %v2160_v52, %v2159_v47  ;;  %v1513_v47 = vrot.slane %v9110_v46, 1 }
 0x2fb   : > { %v7550_v57 = vpop.permute.xlu1 %4457  ;;  %v7563_v41 = vsel %vm1099_vm4, %v1093_v4, %v1094_v16 }
 0x2fc   : > { %9115 = vst [vmem:[#allocation199_spill] sm:$0xff] %v7550_v57  ;;  %v7555_v12 = vpop.permute.xlu0 %4532  ;;  %4777 = vrot.lane.b32.xlu1 %v4776_v56, %s5037_s9  ;;  %9118 = vst [vmem:[#allocation138_spill] sm:$0xff] %v7563_v41  ;;  %v1866_v38 = vmul.f32 %v9120_v25, %v7563_v41  ;;  %v4861_v57 = vpack.i.bf16 %v1706_v2, %v1705_v11  ;;  %v9122_v56 = vrot.slane %v9051_v53, 7  ;;  %v9126_v25 = vld [vmem:[#allocation83_spill] sm:$0xff] }
 0x2fd   : > { %4852 = vrot.lane.b32.xlu0 %v4851_v5, %s5038_s12  ;;  %v9124_v5 = vld [vmem:[#allocation204_spill] sm:$0xff]  ;;  %v1704_v2 = vmul.f32 %v9126_v25, %v7382_v29 }
 0x2fe   : > { %v7575_v9 = vsel %vm1099_vm4, %v9122_v56, %v1093_v4  ;;  %v2320_v62 = vmul.f32 %v9124_v5, %v6636_v13  ;;  %v9127_v4 = vld [vmem:[#allocation88_spill] sm:$0xff] }
 0x2ff   : > { %v7569_v27 = vpop.permute.xlu1 %4467  ;;  %9123 = vst [vmem:[#allocation131_spill] sm:$0xff] %v7575_v9  ;;  %v1865_v52 = vmul.f32 %v9125_v45, %v7575_v9  ;;  %v1703_v11 = vmul.f32 %v9127_v4, %v7367_v54  ;;  %v7600_v45 = vsel %vm1516_vm5, %v1512_v24, %v1513_v47  ;;  %v9130_v4 = vld [vmem:[#allocation174_spill] sm:$0xff]  ;;  %v9144_v54 = vld [vmem:[#allocation52_spill] sm:$0xff] }
 0x300   : > { %9121 = vst [vmem:[#allocation186_spill] sm:$0xff] %v7569_v27  ;;  %v7579_v14 = vpop.permute.xlu0 %4542  ;;  %4787 = vrot.lane.b32.xlu1 %v4786_v22, %s5040_s10  ;;  %v4796_v30 = vpack.i.bf16 %v2320_v62, %v2319_v39  ;;  %v2025_v62 = vmul.f32 %v9130_v4, %v7600_v45  ;;  %v9135_v4 = vld [vmem:[#allocation167_spill] sm:$0xff]  ;;  %v9145_v29 = vrot.slane %v9144_v54, 7 }
 0x301   : > { %4862 = vrot.lane.b32.xlu0 %v4861_v57, %s5035_s30  ;;  %v4871_v56 = vpack.i.bf16 %v1866_v38, %v1865_v52  ;;  %v9129_v57 = vld [vmem:[#allocation140_spill] sm:$0xff]  ;;  %v4806_v25 = vpack.i.bf16 %v1704_v2, %v1703_v11  ;;  %v4881_v38 = vpack.i.bf16 %v9110_v46, %v9102_v42  ;;  %v9132_v52 = vld [vmem:[#allocation133_spill] sm:$0xff]  ;;  %v9134_v2 = vld [vmem:[#allocation86_spill] sm:$0xff] }
 0x302   : > { %v1864_v22 = vmul.f32 %v9129_v57, %v7394_v8  ;;  %v1073_v11 = vrot.slane %v9134_v2, 7 }
 0x303   : > { %v7590_v13 = vpop.permute.xlu1 %4477 }
 0x304   : > { %9128 = vst [vmem:[#allocation77_spill] sm:$0xff] %v7590_v13  ;;  %v7592_v5 = vpop.permute.xlu0 %4552  ;;  %4797 = vrot.lane.b32.xlu1 %v4796_v30, %s5038_s12  ;;  %v1863_v30 = vmul.f32 %v9132_v52, %v7402_v26  ;;  %v9136_v52 = vld [vmem:[#allocation44_spill] sm:$0xff] }
 0x305   : > { %4872 = vrot.lane.b32.xlu0 %v4871_v56, %s5036_s8  ;;  %v9133_v56 = vrot.slane %v9076_v61, 1  ;;  %v2186_v26 = vmul.f32 %v9136_v52, %v7458_v33 }
 0x306   : > { %v4816_v8 = vpack.i.bf16 %v1864_v22, %v1863_v30 }
 0x307   : > { %v7604_v39 = vpop.permute.xlu1 %4487  ;;  %v7614_v57 = vsel %vm1516_vm5, %v1513_v47, %v9133_v56  ;;  %v9138_v47 = vrot.slane %v9076_v61, 7 }
 0x308   : > { %9131 = vst [vmem:[#allocation82_spill] sm:$0xff] %v7604_v39  ;;  %v7616_v24 = vpop.permute.xlu0 %4562  ;;  %4807 = vrot.lane.b32.xlu1 %v4806_v25, %s5035_s30  ;;  %v2026_v39 = vmul.f32 %v9135_v4, %v7614_v57  ;;  %v9139_v4 = vrot.slane %v9088_v15, 7 }
 0x309   : > { %4882 = vrot.lane.b32.xlu0 %v4881_v38, %s5039_s27  ;;  %v7631_v56 = vsel %vm1099_vm4, %v1094_v16, %v9138_v47  ;;  %v9141_v38 = vld [vmem:[#allocation172_spill] sm:$0xff]  ;;  %v4826_v16 = vpack.i.bf16 %v9051_v53, %v9053_v20 }
 0x30a   : > { %v4891_v13 = vpack.i.bf16 %v2026_v39, %v2025_v62  ;;  %v7640_v22 = vsel %vm1099_vm4, %v9139_v4, %v1073_v11  ;;  %v9140_v62 = vld [vmem:[#allocation193_spill] sm:$0xff]  ;;  %v2023_v30 = vmul.f32 %v9141_v38, %v7544_v58  ;;  %v9143_v4 = vld [vmem:[#allocation2_spill] sm:$0xff]  ;;  %v9148_v53 = vld [vmem:[#allocation104_spill] sm:$0xff] }
 0x30b   : > { %v7625_v27 = vpop.permute.xlu1 %4497  ;;  %v2185_v39 = vmul.f32 %v9140_v62, %v7631_v56  ;;  %v9146_v62 = vld [vmem:[#allocation165_spill] sm:$0xff] }
 0x30c   : > { %9137 = vst [vmem:[#allocation141_spill] sm:$0xff] %v7625_v27  ;;  %v7633_v25 = vpop.permute.xlu0 %4572  ;;  %4817 = vrot.lane.b32.xlu1 %v4816_v8, %s5036_s8  ;;  %v2345_v8 = vmul.f32 %v7054_v18, %v9076_v61  ;;  %v1302_v27 = vmul.f32 %v9143_v4, %v7640_v22  ;;  %v2024_v38 = vmul.f32 %v9146_v62, %v7531_v21  ;;  %v9147_v18 = vld [vmem:[#allocation115_spill] sm:$0xff]  ;;  %v4439_v4 = vunpack.i.l.bf16 %v7505_v3  ;;  %v9151_v62 = vld [vmem:[#allocation17_spill] sm:$0xff] }
 0x30d   : > { %4892 = vrot.lane.b32.xlu0 %v4891_v13, %s5037_s9  ;;  %v4901_v52 = vpack.i.bf16 %v2186_v26, %v2185_v39  ;;  %v7659_v13 = vsel %vm1099_vm4, %v1073_v11, %v9145_v29  ;;  %v2346_v26 = vmul.f32 %v9148_v53, %v6465_v34  ;;  %v4440_v39 = vunpack.i.h.bf16 %v7505_v3  ;;  %v9150_v11 = vld [vmem:[#allocation53_spill] sm:$0xff]  ;;  %v9153_v53 = vld [vmem:[#allocation100_spill] sm:$0xff]  ;;  %v9154_v61 = vld [vmem:[#allocation35_spill] sm:$0xff] }
 0x30e   : > { %v1846_v20 = vmul.f32 %v9147_v18, %v7659_v13  ;;  %v7675_v29 = vmul.f32 %v9149_v37, %v7509_v50  ;;  %v9152_v18 = vld [vmem:[#allocation39_spill] sm:$0xff]  ;;  %v1845_v34 = vmul.f32 %v9153_v53, %v7640_v22  ;;  %v7687_v3 = vmul.f32 %v9155_v10, %v9154_v61 }
 0x30f   : > { %v7651_v47 = vpop.permute.xlu1 %4507  ;;  %v2184_v21 = vmul.f32 %v9152_v18, %v7563_v41  ;;  %v4911_v37 = vpack.i.bf16 %v2346_v26, %v2345_v8  ;;  %v3416_v26 = vsel %vm3405_vm6, %v1302_v27, %v4439_v4 }
 0x310   : > { %9142 = vst [vmem:[#allocation136_spill] sm:$0xff] %v7651_v47  ;;  %v7663_v58 = vpop.permute.xlu0 %4582  ;;  %4827 = vrot.lane.b32.xlu1 %v4826_v16, %s5039_s27  ;;  %v7679_v47 = vmul.f32 %v9151_v62, %v9150_v11  ;;  %v4836_v16 = vpack.i.bf16 %v2024_v38, %v2023_v30  ;;  %v7693_v62 = vmul.f32 %v9157_v19, %v7501_v7  ;;  %v9158_v30 = vld [vmem:[#allocation189_spill] sm:$0xff] }
 0x311   : > { %4902 = vrot.lane.b32.xlu0 %v4901_v52, %s5040_s10  ;;  %v9156_v52 = vld [vmem:[#allocation16_spill] sm:$0xff]  ;;  %v2183_v38 = vmul.f32 %v9158_v30, %v7575_v9  ;;  %v4921_v10 = vpack.i.bf16 %v1846_v20, %v1845_v34  ;;  %v4525_v34 = vunpack.i.h.bf16 %v7533_v49  ;;  %v4524_v20 = vunpack.i.l.bf16 %v7533_v49 }
 0x312   : > { %v1303_v32 = vmul.f32 %v9156_v52, %v7659_v13 }
 0x313   : > { %v4518_v50 = vpop.permute.xlu1 %4517  ;;  %v4846_v19 = vpack.i.bf16 %v2184_v21, %v2183_v38 }
 0x314   : > { %v7697_v18 = vpop.permute.xlu0 %4592  ;;  %v4520_v41 = vunpack.i.h.bf16 %v4518_v50  ;;  %v4519_v53 = vunpack.i.l.bf16 %v4518_v50  ;;  %4837 = vrot.lane.b32.xlu1 %v4836_v16, %s5037_s9  ;;  %v3417_v8 = vsel %vm3405_vm6, %v1303_v32, %v4440_v39  ;;  %v9159_v50 = vld [vmem:[#allocation114_spill] sm:$0xff]  ;;  %v9160_v32 = vld [vmem:[#allocation151_spill] sm:$0xff] }
 0x315   : > { %4912 = vrot.lane.b32.xlu0 %v4911_v37, %s5038_s12  ;;  %v2344_v9 = vmul.f32 %v9159_v50, %v9110_v46  ;;  %v2006_v27 = vmul.f32 %v9160_v32, %v6922_v17  ;;  %v9161_v46 = vld [vmem:[#allocation157_spill] sm:$0xff] }
 0x316   : > { %v3449_v52 = vsel %vm3438_vm7, %v3416_v26, %v4519_v53  ;;  %v3450_v30 = vsel %vm3438_vm7, %v3417_v8, %v4520_v41  ;;  %v4931_v41 = vpack.i.bf16 %v9144_v54, %v9134_v2  ;;  %v2005_v4 = vmul.f32 %v9161_v46, %v6928_v1 }
 0x317   : > { %v4528_v59 = vpop.permute.xlu1 %4527  ;;  %v4856_v16 = vpack.i.bf16 %v2344_v9, %v2343_v60  ;;  %v3482_v49 = vsel %vm3471_vm8, %v3449_v52, %v4524_v20  ;;  %v3483_v37 = vsel %vm3471_vm8, %v3450_v30, %v4525_v34  ;;  %v2490_v8 = vmul.f32 %v7237_v35, %v6965_v23 }
 0x318   : > { %v7713_v42 = vpop.permute.xlu0 %4602  ;;  %v4530_v21 = vunpack.i.h.bf16 %v4528_v59  ;;  %v4529_v39 = vunpack.i.l.bf16 %v4528_v59  ;;  %4847 = vrot.lane.b32.xlu1 %v4846_v19, %s5040_s10  ;;  %v4535_v26 = vunpack.i.h.bf16 %v7555_v12  ;;  %v4534_v19 = vunpack.i.l.bf16 %v7555_v12 }
 0x319   : > { %4922 = vrot.lane.b32.xlu0 %v4921_v10, %s5036_s8  ;;  %v4445_v9 = vunpack.i.h.bf16 %v7357_v40  ;;  %v4444_v52 = vunpack.i.l.bf16 %v7357_v40  ;;  %v4545_v34 = vunpack.i.h.bf16 %v7579_v14  ;;  %v4544_v23 = vunpack.i.l.bf16 %v7579_v14 }
 0x31a   : > { %v3515_v38 = vsel %vm3504_vm9, %v3482_v49, %v4529_v39  ;;  %v3516_v53 = vsel %vm3504_vm9, %v3483_v37, %v4530_v21  ;;  %v4866_v20 = vpack.i.bf16 %v7693_v62, %v7675_v29  ;;  %v4941_v40 = vpack.i.bf16 %v2006_v27, %v2005_v4  ;;  %v9162_v21 = vld [vmem:[#allocation185_spill] sm:$0xff]  ;;  %v9164_v37 = vld [vmem:[#allocation155_spill] sm:$0xff] }
 0x31b   : > { %v4538_v60 = vpop.permute.xlu1 %4537  ;;  %v3548_v35 = vsel %vm3537_vm10, %v3515_v38, %v4534_v19  ;;  %v3549_v12 = vsel %vm3537_vm10, %v3516_v53, %v4535_v26  ;;  %v2166_v39 = vmul.f32 %v9162_v21, %v9150_v11  ;;  %v2489_v14 = vmul.f32 %v7089_v55, %v6953_v36  ;;  %v9165_v11 = vld [vmem:[#allocation177_spill] sm:$0xff] }
 0x31c   : > { %v7731_v10 = vpop.permute.xlu0 %4612  ;;  %v4540_v30 = vunpack.i.h.bf16 %v4538_v60  ;;  %v4539_v50 = vunpack.i.l.bf16 %v4538_v60  ;;  %4857 = vrot.lane.b32.xlu1 %v4856_v16, %s5038_s12  ;;  %v2165_v53 = vmul.f32 %v9165_v11, %v9154_v61  ;;  %v3419_v55 = vsel %vm3405_vm6, %v7679_v47, %v4445_v9  ;;  %v9166_v19 = vld [vmem:[#allocation49_spill] sm:$0xff]  ;;  %v9167_v60 = vld [vmem:[#allocation147_spill] sm:$0xff] }
 0x31d   : > { %4932 = vrot.lane.b32.xlu0 %v4931_v41, %s5039_s27  ;;  %v9163_v41 = vld [vmem:[#allocation87_spill] sm:$0xff]  ;;  %v3649_v26 = vpack.c.bf16 %v2490_v8, %v2489_v14  ;;  %v3418_v36 = vsel %vm3405_vm6, %v7687_v3, %v4444_v52  ;;  %v4876_v61 = vpack.i.bf16 %v9088_v15, %v9094_v28  ;;  %v4555_v9 = vunpack.i.h.bf16 %v7592_v5  ;;  %v9172_v28 = vld [vmem:[#allocation200_spill] sm:$0xff] }
 0x31e   : > { %v3581_v59 = vsel %vm3570_vm11, %v3548_v35, %v4539_v50  ;;  %v3582_v32 = vsel %vm3570_vm11, %v3549_v12, %v4540_v30  ;;  %v2003_v38 = vmul.f32 %v9164_v37, %v9163_v41  ;;  %v2004_v30 = vmul.f32 %v9167_v60, %v9166_v19  ;;  %v9169_v35 = vld [vmem:[#allocation57_spill] sm:$0xff]  ;;  %v9175_v37 = vld [vmem:[#allocation183_spill] sm:$0xff] }
 0x31f   : > { %v4548_v46 = vpop.permute.xlu1 %4547  ;;  %v3614_v16 = vsel %vm3603_vm12, %v3581_v59, %v4544_v23  ;;  %v3615_v49 = vsel %vm3603_vm12, %v3582_v32, %v4545_v34  ;;  %v4951_v8 = vpack.i.bf16 %v2166_v39, %v2165_v53  ;;  %v9168_v23 = vld [vmem:[#allocation202_spill] sm:$0xff]  ;;  %v4554_v3 = vunpack.i.l.bf16 %v7592_v5  ;;  %v9170_v12 = vld [vmem:[#allocation65_spill] sm:$0xff] }
 0x320   : > { %v7751_v29 = vpop.permute.xlu0 %4622  ;;  %v4550_v62 = vunpack.i.h.bf16 %v4548_v46  ;;  %v4549_v27 = vunpack.i.l.bf16 %v4548_v46  ;;  %4867 = vrot.lane.b32.xlu1 %v4866_v20, %s5036_s8  ;;  %v3646_v4 = vpack.c.bf16 %v3615_v49, %v3614_v16  ;;  %v2325_v47 = vmul.f32 %v9169_v35, %v9168_v23  ;;  %v9171_v20 = vld [vmem:[#allocation5_spill] sm:$0xff]  ;;  %v9173_v39 = vld [vmem:[#allocation42_spill] sm:$0xff]  ;;  %v9174_v16 = vld [vmem:[#allocation175_spill] sm:$0xff] }
 0x321   : > { %4942 = vrot.lane.b32.xlu0 %v4941_v40, %s5037_s9  ;;  %v1306_v40 = vmul.f32 %v9171_v20, %v9170_v12  ;;  %v4886_v15 = vpack.i.bf16 %v2004_v30, %v2003_v38  ;;  %v2326_v14 = vmul.f32 %v9173_v39, %v9172_v28  ;;  %v2163_v49 = vmul.f32 %v9174_v16, %v7640_v22  ;;  %v9177_v35 = vld [vmem:[#allocation105_spill] sm:$0xff] }
 0x322   : > { %v3452_v50 = vsel %vm3438_vm7, %v3419_v55, %v4550_v62  ;;  %v3451_v34 = vsel %vm3438_vm7, %v3418_v36, %v4549_v27  ;;  %3866 = vmatmul.mubr.bf16.vlgmr.msra.gmra.mrb[0].mxu1 %v3646_v4  ;;  %v2164_v62 = vmul.f32 %v9175_v37, %v7659_v13  ;;  %v2492_v11 = vmul.f32 %v7260_v6, %v7042_v0  ;;  %v9179_v20 = vld [vmem:[#allocation113_spill] sm:$0xff] }
 0x323   : > { %v4558_v52 = vpop.permute.xlu1 %4557  ;;  %4115 = vmatprep.mubr.msk.bf16.mxu1 %vm3405_vm6, %v3649_v26  ;;  %v3484_v46 = vsel %vm3471_vm8, %v3451_v34, %v4554_v3  ;;  %v3485_v5 = vsel %vm3471_vm8, %v3452_v50, %v4555_v9  ;;  %v4961_v38 = vpack.i.bf16 %v2326_v14, %v2325_v47  ;;  %v4565_v53 = vunpack.i.h.bf16 %v7616_v24  ;;  %v9178_v47 = vld [vmem:[#allocation18_spill] sm:$0xff]  ;;  %v9180_v39 = vld [vmem:[#allocation89_spill] sm:$0xff] }
 0x324   : > { %v7774_v59 = vpop.permute.xlu0 %4632  ;;  %v4560_v32 = vunpack.i.h.bf16 %v4558_v52  ;;  %v4559_v21 = vunpack.i.l.bf16 %v4558_v52  ;;  %4877 = vrot.lane.b32.xlu1 %v4876_v61, %s5039_s27  ;;  %v4564_v26 = vunpack.i.l.bf16 %v7616_v24  ;;  %v4450_v36 = vunpack.i.h.bf16 %v7525_v31  ;;  %v9176_v61 = vld [vmem:[#allocation93_spill] sm:$0xff] }
 0x325   : > { %4952 = vrot.lane.b32.xlu0 %v4951_v8, %s5040_s10  ;;  %v4449_v22 = vunpack.i.l.bf16 %v7525_v31  ;;  %v4575_v50 = vunpack.i.h.bf16 %v7633_v25  ;;  %v4574_v34 = vunpack.i.l.bf16 %v7633_v25  ;;  %v4896_v24 = vpack.i.bf16 %v2164_v62, %v2163_v49 }
 0x326   : > { %v3517_v27 = vsel %vm3504_vm9, %v3484_v46, %v4559_v21  ;;  %v3518_v4 = vsel %vm3504_vm9, %v3485_v5, %v4560_v32  ;;  %v2323_v31 = vmul.f32 %v9176_v61, %v9134_v2  ;;  %v1307_v9 = vmul.f32 %v9178_v47, %v9177_v35  ;;  %v9181_v5 = vld [vmem:[#allocation94_spill] sm:$0xff]  ;;  %v9187_v61 = vld [vmem:[#allocation137_spill] sm:$0xff] }
 0x327   : > { %v4568_v55 = vpop.permute.xlu1 %4567  ;;  %v3550_v0 = vsel %vm3537_vm10, %v3517_v27, %v4564_v26  ;;  %v3551_v6 = vsel %vm3537_vm10, %v3518_v4, %v4565_v53  ;;  %v2491_v25 = vmul.f32 %v7111_v48, %v7030_v43  ;;  %v2324_v32 = vmul.f32 %v9179_v20, %v9144_v54 }
 0x328   : > { %v7794_v60 = vpop.permute.xlu0 %4642  ;;  %v4570_v13 = vunpack.i.h.bf16 %v4568_v55  ;;  %v4569_v30 = vunpack.i.l.bf16 %v4568_v55  ;;  %4887 = vrot.lane.b32.xlu1 %v4886_v15, %s5037_s9  ;;  %v1708_v14 = vmul.f32 %v9180_v39, %v7614_v57  ;;  %v3421_v43 = vsel %vm3405_vm6, %v1307_v9, %v4450_v36  ;;  %v9183_v55 = vld [vmem:[#allocation20_spill] sm:$0xff] }
 0x329   : > { %4962 = vrot.lane.b32.xlu0 %v4961_v38, %s5038_s12  ;;  %v3651_v46 = vpack.c.bf16 %v2492_v11, %v2491_v25  ;;  %v3420_v48 = vsel %vm3405_vm6, %v1306_v40, %v4449_v22  ;;  %v1707_v16 = vmul.f32 %v9181_v5, %v7600_v45  ;;  %v4906_v49 = vpack.i.bf16 %v2324_v32, %v2323_v31  ;;  %v9182_v38 = vld [vmem:[#allocation6_spill] sm:$0xff]  ;;  %v9189_v9 = vld [vmem:[#allocation92_spill] sm:$0xff] }
 0x32a   : > { %v3583_v8 = vsel %vm3570_vm11, %v3550_v0, %v4569_v30  ;;  %v3584_v23 = vsel %vm3570_vm11, %v3551_v6, %v4570_v13  ;;  %v4585_v62 = vunpack.i.h.bf16 %v7663_v58  ;;  %v4584_v27 = vunpack.i.l.bf16 %v7663_v58  ;;  %v9184_v22 = vld [vmem:[#allocation122_spill] sm:$0xff]  ;;  %v9185_v13 = vld [vmem:[#allocation19_spill] sm:$0xff] }
 0x32b   : > { %v4578_v3 = vpop.permute.xlu1 %4577  ;;  %v3616_v52 = vsel %vm3603_vm12, %v3583_v8, %v4574_v34  ;;  %v3617_v12 = vsel %vm3603_vm12, %v3584_v23, %v4575_v50  ;;  %v1308_v11 = vmul.f32 %v9182_v38, %v6937_v44  ;;  %v7835_v36 = vmul.f32 %v9183_v55, %v7014_v51  ;;  %v9186_v34 = vld [vmem:[#allocation146_spill] sm:$0xff]  ;;  %v9188_v51 = vld [vmem:[#allocation132_spill] sm:$0xff] }
 0x32c   : > { %v7814_v21 = vpop.permute.xlu0 %4652  ;;  %v4580_v2 = vunpack.i.h.bf16 %v4578_v3  ;;  %v4579_v15 = vunpack.i.l.bf16 %v4578_v3  ;;  %4897 = vrot.lane.b32.xlu1 %v4896_v24, %s5040_s10  ;;  %v3648_v28 = vpack.c.bf16 %v3617_v12, %v3616_v52  ;;  %v1309_v30 = vmul.f32 %v9185_v13, %v9184_v22  ;;  %v9197_v55 = vld [vmem:[#allocation190_spill] sm:$0xff]  ;;  %v9198_v13 = vld [vmem:[#allocation45_spill] sm:$0xff] }
 0x32d   : > { %v1868_v44 = vmul.f32 %v9186_v34, %v7458_v33  ;;  %v4916_v24 = vpack.i.bf16 %v1708_v14, %v1707_v16  ;;  %v1867_v31 = vmul.f32 %v9187_v61, %v7631_v56  ;;  %v2494_v8 = vmul.f32 %v9188_v51, %v7106_v63  ;;  %v9194_v16 = vld [vmem:[#allocation47_spill] sm:$0xff] }
 0x32e   : > { %v3453_v54 = vsel %vm3438_vm7, %v3420_v48, %v4579_v15  ;;  %v3454_v37 = vsel %vm3438_vm7, %v3421_v43, %v4580_v2  ;;  %3874 = vmatmul.mubr.bf16.gmra.mrb[4].mxu1 %v3648_v28  ;;  %v4595_v23 = vunpack.i.h.bf16 %v7697_v18  ;;  %v4594_v35 = vunpack.i.l.bf16 %v7697_v18  ;;  %v9190_v18 = vld [vmem:[#allocation126_spill] sm:$0xff]  ;;  %v9192_v43 = vld [vmem:[#allocation43_spill] sm:$0xff]  ;;  %v9193_v48 = vld [vmem:[#allocation21_spill] sm:$0xff] }
 0x32f   : > { %v4588_v4 = vpop.permute.xlu1 %4587  ;;  %4116 = vmatprep.mubr.msk.bf16.mxu1 %vm3405_vm6, %v3651_v46  ;;  %v3486_v58 = vsel %vm3471_vm8, %v3453_v54, %v4584_v27  ;;  %v3487_v50 = vsel %vm3471_vm8, %v3454_v37, %v4585_v62  ;;  %v4455_v25 = vunpack.i.h.bf16 %v9189_v9  ;;  %v4454_v33 = vunpack.i.l.bf16 %v9189_v9  ;;  %v9191_v15 = vld [vmem:[#allocation22_spill] sm:$0xff]  ;;  %v9203_v51 = vld [vmem:[#allocation99_spill] sm:$0xff] }
 0x330   : > { %v7830_v40 = vpop.permute.xlu0 %4662  ;;  %v4590_v53 = vunpack.i.h.bf16 %v4588_v4  ;;  %v4589_v26 = vunpack.i.l.bf16 %v4588_v4  ;;  %4907 = vrot.lane.b32.xlu1 %v4906_v49, %s5038_s12  ;;  %v4605_v20 = vunpack.i.h.bf16 %v7713_v42  ;;  %v4604_v32 = vunpack.i.l.bf16 %v7713_v42  ;;  %v9195_v49 = vld [vmem:[#allocation123_spill] sm:$0xff]  ;;  %v9204_v9 = vld [vmem:[#allocation50_spill] sm:$0xff] }
 0x331   : > { %v7862_v28 = vmul.f32 %v9191_v15, %v9190_v18  ;;  %v4926_v39 = vpack.i.bf16 %v1868_v44, %v1867_v31  ;;  %v7868_v5 = vmul.f32 %v9193_v48, %v9192_v43  ;;  %v2493_v42 = vmul.f32 %v9195_v49, %v9194_v16  ;;  %v9202_v31 = vld [vmem:[#allocation109_spill] sm:$0xff]  ;;  %v9210_v18 = vld [vmem:[#allocation48_spill] sm:$0xff]  ;;  %v9211_v15 = vld [vmem:[#allocation46_spill] sm:$0xff] }
 0x332   : > { %v3519_v0 = vsel %vm3504_vm9, %v3486_v58, %v4589_v26  ;;  %v3520_v6 = vsel %vm3504_vm9, %v3487_v50, %v4590_v53  ;;  %v9196_v26 = vld [vmem:[#allocation191_spill] sm:$0xff]  ;;  %v9199_v58 = vld [vmem:[#allocation176_spill] sm:$0xff]  ;;  %v3423_v44 = vsel %vm3405_vm6, %v1309_v30, %v4455_v25  ;;  %v9207_v30 = vld [vmem:[#allocation169_spill] sm:$0xff] }
 0x333   : > { %v4598_v47 = vpop.permute.xlu1 %4597  ;;  %v3552_v63 = vsel %vm3537_vm10, %v3519_v0, %v4594_v35  ;;  %v3553_v2 = vsel %vm3537_vm10, %v3520_v6, %v4595_v23  ;;  %v4936_v22 = vpack.i.bf16 %v9197_v55, %v9196_v26  ;;  %v2027_v50 = vmul.f32 %v9199_v58, %v9198_v13  ;;  %v9200_v6 = vld [vmem:[#allocation156_spill] sm:$0xff]  ;;  %v9215_v55 = vld [vmem:[#allocation63_spill] sm:$0xff] }
 0x334   : > { %v7853_v3 = vpop.permute.xlu0 %4672  ;;  %v4600_v52 = vunpack.i.h.bf16 %v4598_v47  ;;  %v4599_v12 = vunpack.i.l.bf16 %v4598_v47  ;;  %4917 = vrot.lane.b32.xlu1 %v4916_v24, %s5035_s30  ;;  %v3653_v34 = vpack.c.bf16 %v2494_v8, %v2493_v42  ;;  %v3422_v0 = vsel %vm3405_vm6, %v1308_v11, %v4454_v33  ;;  %v9201_v24 = vld [vmem:[#allocation121_spill] sm:$0xff]  ;;  %v9212_v48 = vld [vmem:[#allocation8_spill] sm:$0xff] }
 0x335   : > { %v2188_v61 = vmul.f32 %v9201_v24, %v9200_v6  ;;  %v7887_v23 = vmul.f32 %v9203_v51, %v9202_v31  ;;  %v9206_v8 = vld [vmem:[#allocation117_spill] sm:$0xff]  ;;  %v4615_v11 = vunpack.i.h.bf16 %v7731_v10  ;;  %v4614_v33 = vunpack.i.l.bf16 %v7731_v10 }
 0x336   : > { %v3585_v14 = vsel %vm3570_vm11, %v3552_v63, %v4599_v12  ;;  %v3586_v46 = vsel %vm3570_vm11, %v3553_v2, %v4600_v52  ;;  %v9205_v52 = vld [vmem:[#allocation23_spill] sm:$0xff]  ;;  %v2028_v25 = vmul.f32 %v9207_v30, %v9206_v8  ;;  %v9209_v63 = vld [vmem:[#allocation196_spill] sm:$0xff]  ;;  %v1292_v16 = vmul.f32 %v9212_v48, %v7631_v56 }
 0x337   : > { %v4608_v54 = vpop.permute.xlu1 %4607  ;;  %v3618_v37 = vsel %vm3603_vm12, %v3585_v14, %v4604_v32  ;;  %v3619_v62 = vsel %vm3603_vm12, %v3586_v46, %v4605_v20  ;;  %v7893_v12 = vmul.f32 %v9205_v52, %v9204_v9  ;;  %v9208_v32 = vld [vmem:[#allocation112_spill] sm:$0xff]  ;;  %v4625_v56 = vunpack.i.h.bf16 %v7751_v29  ;;  %v9219_v52 = vld [vmem:[#allocation66_spill] sm:$0xff] }
 0x338   : > { %v7874_v27 = vpop.permute.xlu0 %4682  ;;  %v4610_v4 = vunpack.i.h.bf16 %v4608_v54  ;;  %v4609_v38 = vunpack.i.l.bf16 %v4608_v54  ;;  %4927 = vrot.lane.b32.xlu1 %v4926_v39, %s5036_s8  ;;  %v3650_v53 = vpack.c.bf16 %v3619_v62, %v3618_v37  ;;  %v2187_v2 = vmul.f32 %v9209_v63, %v9208_v32 }
 0x339   : > { %v7904_v39 = vmul.f32 %v9211_v15, %v9210_v18  ;;  %v4946_v10 = vpack.i.bf16 %v2028_v25, %v2027_v50  ;;  %v4624_v50 = vunpack.i.l.bf16 %v7751_v29  ;;  %v9218_v29 = vld [vmem:[#allocation159_spill] sm:$0xff]  ;;  %v9220_v25 = vld [vmem:[#allocation164_spill] sm:$0xff]  ;;  %v9222_v18 = vld [vmem:[#allocation166_spill] sm:$0xff] }
 0x33a   : > { %v3456_v35 = vsel %vm3438_vm7, %v3423_v44, %v4610_v4  ;;  %v3455_v47 = vsel %vm3438_vm7, %v3422_v0, %v4609_v38  ;;  %3882 = vmatmul.mubr.bf16.gmra.mrb[8].mxu1 %v3650_v53  ;;  %v4956_v54 = vpack.i.bf16 %v2188_v61, %v2187_v2  ;;  %v9213_v38 = vld [vmem:[#allocation62_spill] sm:$0xff]  ;;  %v9214_v53 = vld [vmem:[#allocation55_spill] sm:$0xff]  ;;  %v7934_v30 = vmul.f32 %v9219_v52, %v9218_v29  ;;  %v9221_v2 = vld [vmem:[#allocation120_spill] sm:$0xff] }
 0x33b   : > { %v4618_v20 = vpop.permute.xlu1 %4617  ;;  %4117 = vmatprep.mubr.msk.bf16.mxu1 %vm3405_vm6, %v3653_v34  ;;  %v3488_v49 = vsel %vm3471_vm8, %v3455_v47, %v4614_v33  ;;  %v3489_v42 = vsel %vm3471_vm8, %v3456_v35, %v4615_v11  ;;  %v4966_v37 = vpack.i.bf16 %v7904_v39, %v7887_v23  ;;  %v2495_v26 = vmul.f32 %v9214_v53, %v9213_v38  ;;  %v9217_v44 = vld [vmem:[#allocation199_spill] sm:$0xff] }
 0x33c   : > { %v7906_v14 = vpop.permute.xlu0 %4692  ;;  %v4620_v46 = vunpack.i.h.bf16 %v4618_v20  ;;  %v4619_v43 = vunpack.i.l.bf16 %v4618_v20  ;;  %4937 = vrot.lane.b32.xlu1 %v4936_v22, %s5039_s27  ;;  %v9216_v22 = vld [vmem:[#allocation148_spill] sm:$0xff]  ;;  %v4460_v0 = vunpack.i.h.bf16 %v9217_v44  ;;  %v4459_v24 = vunpack.i.l.bf16 %v9217_v44  ;;  %v9224_v38 = vld [vmem:[#allocation171_spill] sm:$0xff] }
 0x33d   : > { %v2496_v58 = vmul.f32 %v9216_v22, %v9215_v55  ;;  %v4635_v23 = vunpack.i.h.bf16 %v7774_v59  ;;  %v4634_v35 = vunpack.i.l.bf16 %v7774_v59  ;;  %v4414_v11 = vunpack.i.l.bf16 %v9220_v25  ;;  %v9225_v22 = vld [vmem:[#allocation110_spill] sm:$0xff] }
 0x33e   : > { %v3521_v62 = vsel %vm3504_vm9, %v3488_v49, %v4619_v43  ;;  %v3522_v4 = vsel %vm3504_vm9, %v3489_v42, %v4620_v46  ;;  %v7941_v15 = vmul.f32 %v9222_v18, %v9221_v2  ;;  %v9223_v43 = vld [vmem:[#allocation145_spill] sm:$0xff]  ;;  %v4494_v53 = vunpack.i.l.bf16 %v9224_v38 }
 0x33f   : > { %v4628_v34 = vpop.permute.xlu1 %4627  ;;  %v3554_v47 = vsel %vm3537_vm10, %v3521_v62, %v4624_v50  ;;  %v3555_v9 = vsel %vm3537_vm10, %v3522_v4, %v4625_v56  ;;  %v3655_v63 = vpack.c.bf16 %v2496_v58, %v2495_v26  ;;  %v4465_v48 = vunpack.i.h.bf16 %v9223_v43  ;;  %v9226_v58 = vld [vmem:[#allocation54_spill] sm:$0xff]  ;;  %v9227_v50 = vld [vmem:[#allocation119_spill] sm:$0xff] }
 0x340   : > { %v4630_v61 = vunpack.i.h.bf16 %v4628_v34  ;;  %v4629_v31 = vunpack.i.l.bf16 %v4628_v34  ;;  %v7925_v51 = vpop.permute.xlu0 %4702  ;;  %4947 = vrot.lane.b32.xlu1 %v4946_v10, %s5037_s9  ;;  %v4464_v4 = vunpack.i.l.bf16 %v9223_v43  ;;  %v3425_v26 = vsel %vm3405_vm6, %v7868_v5, %v4460_v0  ;;  %v9228_v34 = vld [vmem:[#allocation108_spill] sm:$0xff] }
 0x341   : > { %v3424_v55 = vsel %vm3405_vm6, %v7835_v36, %v4459_v24  ;;  %v7955_v56 = vmul.f32 %v9226_v58, %v9225_v22  ;;  %v7959_v44 = vmul.f32 %v9228_v34, %v9227_v50  ;;  %v3657_v5 = vpack.c.bf16 %v7941_v15, %v7934_v30 }
 0x342   : > { %v3587_v33 = vsel %vm3570_vm11, %v3554_v47, %v4629_v31  ;;  %v3588_v20 = vsel %vm3570_vm11, %v3555_v9, %v4630_v61  ;;  %v3406_v31 = vsel %vm3405_vm6, %v1292_v16, %v4414_v11  ;;  %v4645_v36 = vunpack.i.h.bf16 %v7794_v60 }
 0x343   : > { %v4638_v59 = vpop.permute.xlu1 %4637  ;;  %v3620_v39 = vsel %vm3603_vm12, %v3587_v33, %v4634_v35  ;;  %v3621_v46 = vsel %vm3603_vm12, %v3588_v20, %v4635_v23  ;;  %v4644_v0 = vunpack.i.l.bf16 %v7794_v60  ;;  %v3427_v23 = vsel %vm3405_vm6, %v7893_v12, %v4465_v48 }
 0x344   : > { %v4640_v10 = vunpack.i.h.bf16 %v4638_v59  ;;  %v4639_v49 = vunpack.i.l.bf16 %v4638_v59  ;;  %v4713_v42 = vpop.permute.xlu0 %4712  ;;  %4957 = vrot.lane.b32.xlu1 %v4956_v54, %s5040_s10  ;;  %v3652_v62 = vpack.c.bf16 %v3621_v46, %v3620_v39  ;;  %v4704_v35 = vunpack.i.l.bf16 %v7925_v51 }
 0x345   : > { %v3426_v16 = vsel %vm3405_vm6, %v7862_v28, %v4464_v4  ;;  %v3439_v52 = vsel %vm3438_vm7, %v3406_v31, %v4494_v53  ;;  %v4655_v25 = vunpack.i.h.bf16 %v7814_v21  ;;  %v4654_v12 = vunpack.i.l.bf16 %v7814_v21  ;;  %v9229_v4 = vld [vmem:[#allocation75_spill] sm:$0xff] }
 0x346   : > { %v3457_v54 = vsel %vm3438_vm7, %v3424_v55, %v4639_v49  ;;  %v3458_v61 = vsel %vm3438_vm7, %v3425_v26, %v4640_v10  ;;  %3890 = vmatmul.mubr.bf16.gmra.mrb[12].mxu1 %v3652_v62  ;;  %v4665_v20 = vunpack.i.h.bf16 %v7830_v40  ;;  %v4705_v28 = vunpack.i.h.bf16 %v7925_v51 }
 0x347   : > { %v4648_v24 = vpop.permute.xlu1 %4647  ;;  %4118 = vmatprep.mubr.msk.bf16.mxu1 %vm3405_vm6, %v3655_v63  ;;  %v3490_v60 = vsel %vm3471_vm8, %v3457_v54, %v4644_v0  ;;  %v3491_v30 = vsel %vm3471_vm8, %v3458_v61, %v4645_v36  ;;  %v4714_v63 = vunpack.i.l.bf16 %v4713_v42  ;;  %v3472_v18 = vsel %vm3471_vm8, %v3439_v52, %v4704_v35 }
 0x348   : > { %v4650_v47 = vunpack.i.h.bf16 %v4648_v24  ;;  %v4649_v9 = vunpack.i.l.bf16 %v4648_v24  ;;  %v4723_v29 = vpop.permute.xlu0 %4722  ;;  %4967 = vrot.lane.b32.xlu1 %v4966_v37, %s5038_s12  ;;  %v4664_v37 = vunpack.i.l.bf16 %v7830_v40  ;;  %v4715_v15 = vunpack.i.h.bf16 %v4713_v42 }
 0x349   : > { %v4725_v43 = vunpack.i.h.bf16 %v4723_v29  ;;  %v4724_v21 = vunpack.i.l.bf16 %v4723_v29  ;;  %v3473_v38 = vsel %vm3471_vm8, %v9229_v4, %v4705_v28  ;;  %v3505_v42 = vsel %vm3504_vm9, %v3472_v18, %v4714_v63  ;;  %v9230_v18 = vld [vmem:[#allocation182_spill] sm:$0xff] }
 0x34a   : > { %v3523_v11 = vsel %vm3504_vm9, %v3490_v60, %v4649_v9  ;;  %v3524_v33 = vsel %vm3504_vm9, %v3491_v30, %v4650_v47  ;;  %v3506_v22 = vsel %vm3504_vm9, %v3473_v38, %v4715_v15  ;;  %v4675_v29 = vunpack.i.h.bf16 %v7853_v3  ;;  %v9231_v15 = vld [vmem:[#allocation34_spill] sm:$0xff] }
 0x34b   : > { %v4658_v2 = vpop.permute.xlu1 %4657  ;;  %v3556_v48 = vsel %vm3537_vm10, %v3523_v11, %v4654_v12  ;;  %v3557_v10 = vsel %vm3537_vm10, %v3524_v33, %v4655_v25  ;;  %v3538_v61 = vsel %vm3537_vm10, %v3505_v42, %v4724_v21  ;;  %v3539_v31 = vsel %vm3537_vm10, %v3506_v22, %v4725_v43 }
 0x34c   : > { %v4660_v59 = vunpack.i.h.bf16 %v4658_v2  ;;  %v4659_v39 = vunpack.i.l.bf16 %v4658_v2  ;;  %v4733_v46 = vpop.permute.xlu0 %4732  ;;  %v4674_v52 = vunpack.i.l.bf16 %v7853_v3  ;;  %v4685_v63 = vunpack.i.h.bf16 %v7874_v27 }
 0x34d   : > { %v4735_v62 = vunpack.i.h.bf16 %v4733_v46  ;;  %v4734_v51 = vunpack.i.l.bf16 %v4733_v46  ;;  %v4695_v46 = vunpack.i.h.bf16 %v7906_v14  ;;  %v4694_v43 = vunpack.i.l.bf16 %v7906_v14 }
 0x34e   : > { %v3589_v49 = vsel %vm3570_vm11, %v3556_v48, %v4659_v39  ;;  %v3590_v40 = vsel %vm3570_vm11, %v3557_v10, %v4660_v59  ;;  %v2500_v59 = vmul.f32 %v9231_v15, %v9230_v18 }
 0x34f   : > { %v4668_v53 = vpop.permute.xlu1 %4667  ;;  %v3622_v26 = vsel %vm3603_vm12, %v3589_v49, %v4664_v37  ;;  %v3623_v55 = vsel %vm3603_vm12, %v3590_v40, %v4665_v20  ;;  %v3571_v24 = vsel %vm3570_vm11, %v3538_v61, %v4734_v51  ;;  %v3572_v35 = vsel %vm3570_vm11, %v3539_v31, %v4735_v62  ;;  %v9232_v49 = vld [vmem:[#allocation192_spill] sm:$0xff]  ;;  %v9233_v40 = vld [vmem:[#allocation67_spill] sm:$0xff]  ;;  %v9236_v61 = vld [vmem:[#allocation58_spill] sm:$0xff] }
 0x350   : > { %v4670_v58 = vunpack.i.h.bf16 %v4668_v53  ;;  %v4669_v50 = vunpack.i.l.bf16 %v4668_v53  ;;  %v4743_v34 = vpop.permute.xlu0 %4742  ;;  %v3654_v54 = vpack.c.bf16 %v3623_v55, %v3622_v26  ;;  %v2499_v62 = vmul.f32 %v9233_v40, %v9232_v49  ;;  %v9237_v31 = vld [vmem:[#allocation24_spill] sm:$0xff] }
 0x351   : > { %v4745_v36 = vunpack.i.h.bf16 %v4743_v34  ;;  %v4744_v0 = vunpack.i.l.bf16 %v4743_v34  ;;  %v9235_v34 = vld [vmem:[#allocation96_spill] sm:$0xff] }
 0x352   : > { %v3460_v47 = vsel %vm3438_vm7, %v3427_v23, %v4670_v58  ;;  %v3459_v9 = vsel %vm3438_vm7, %v3426_v16, %v4669_v50  ;;  %3898 = vmatmul.mubr.bf16.gmra.mrb[16].mxu1 %v3654_v54  ;;  %v3639_v23 = vpack.c.bf16 %v7959_v44, %v7955_v56  ;;  %v3659_v14 = vpack.c.bf16 %v2500_v59, %v2499_v62  ;;  %v9234_v50 = vld [vmem:[#allocation79_spill] sm:$0xff] }
 0x353   : > { %v3604_v60 = vsel %vm3603_vm12, %v3571_v24, %v4744_v0  ;;  %v3605_v30 = vsel %vm3603_vm12, %v3572_v35, %v4745_v36  ;;  %v4678_v25 = vpop.permute.xlu1 %4677  ;;  %4119 = vmatprep.mubr.msk.bf16.mxu1 %vm3405_vm6, %v3657_v5  ;;  %v3492_v16 = vsel %vm3471_vm8, %v3459_v9, %v4674_v52  ;;  %v3493_v37 = vsel %vm3471_vm8, %v3460_v47, %v4675_v29  ;;  %v9238_v0 = vld [vmem:[#allocation194_spill] sm:$0xff]  ;;  %v9239_v9 = vld [vmem:[#allocation72_spill] sm:$0xff] }
 0x354   : > { %v3636_v12 = vpack.c.bf16 %v3605_v30, %v3604_v60  ;;  %v4680_v11 = vunpack.i.h.bf16 %v4678_v25  ;;  %v4679_v33 = vunpack.i.l.bf16 %v4678_v25  ;;  %v8007_v20 = vpop.permute.xlu0 %4752  ;;  %v4684_v5 = vunpack.i.l.bf16 %v7874_v27  ;;  %v9240_v29 = vld [vmem:[#allocation26_spill] sm:$0xff]  ;;  %v9241_v60 = vld [vmem:[#allocation84_spill] sm:$0xff] }
 0x355   : > { %v8041_v54 = vmul.f32 %v9235_v34, %v9234_v50  ;;  %v1314_v36 = vmul.f32 %v9237_v31, %v9236_v61  ;;  %v4475_v24 = vunpack.i.h.bf16 %v9238_v0  ;;  %v4474_v35 = vunpack.i.l.bf16 %v9238_v0  ;;  %v9242_v30 = vld [vmem:[#allocation130_spill] sm:$0xff] }
 0x356   : > { %v3525_v3 = vsel %vm3504_vm9, %v3492_v16, %v4679_v33  ;;  %v3526_v28 = vsel %vm3504_vm9, %v3493_v37, %v4680_v11  ;;  %3826 = vmatmul.mubr.bf16.vlgmr.msra.gmra.mrb[32].mxu0 %v3636_v12  ;;  %v1316_v52 = vmul.f32 %v9240_v29, %v9239_v9  ;;  %v8051_v25 = vmul.f32 %v9242_v30, %v9241_v60  ;;  %v9243_v12 = vld [vmem:[#allocation186_spill] sm:$0xff]  ;;  %v9244_v16 = vld [vmem:[#allocation51_spill] sm:$0xff]  ;;  %v9245_v37 = vld [vmem:[#allocation25_spill] sm:$0xff] }
 0x357   : > { %4110 = vmatprep.mubr.msk.bf16.mxu0 %vm3405_vm6, %v3639_v23  ;;  %v4688_v2 = vpop.permute.xlu1 %4687  ;;  %v3558_v21 = vsel %vm3537_vm10, %v3525_v3, %v4684_v5  ;;  %v3559_v48 = vsel %vm3537_vm10, %v3526_v28, %v4685_v63  ;;  %v4470_v11 = vunpack.i.h.bf16 %v9243_v12  ;;  %v4469_v33 = vunpack.i.l.bf16 %v9243_v12  ;;  %v9246_v28 = vld [vmem:[#allocation134_spill] sm:$0xff]  ;;  %v9247_v63 = vld [vmem:[#allocation27_spill] sm:$0xff] }
 0x358   : > { %v4690_v56 = vunpack.i.h.bf16 %v4688_v2  ;;  %v4689_v44 = vunpack.i.l.bf16 %v4688_v2  ;;  %v8020_v39 = vpop.permute.xlu0 %4762  ;;  %v1315_v3 = vmul.f32 %v9245_v37, %v9244_v16  ;;  %v1317_v5 = vmul.f32 %v9247_v63, %v9246_v28 }
 0x359   : > { %v3661_v15 = vpack.c.bf16 %v8041_v54, %v8051_v25  ;;  %v4755_v59 = vunpack.i.h.bf16 %v8007_v20  ;;  %v3428_v49 = vsel %vm3405_vm6, %v1314_v36, %v4469_v33  ;;  %v4754_v50 = vunpack.i.l.bf16 %v8007_v20 }
 0x35a   : > { %v3591_v27 = vsel %vm3570_vm11, %v3558_v21, %v4689_v44  ;;  %v3592_v10 = vsel %vm3570_vm11, %v3559_v48, %v4690_v56  ;;  %v4765_v54 = vunpack.i.h.bf16 %v8020_v39  ;;  %v4764_v61 = vunpack.i.l.bf16 %v8020_v39 }
 0x35b   : > { %v4698_v51 = vpop.permute.xlu1 %4697  ;;  %v3624_v4 = vsel %vm3603_vm12, %v3591_v27, %v4694_v43  ;;  %v3625_v38 = vsel %vm3603_vm12, %v3592_v10, %v4695_v46  ;;  %v3431_v46 = vsel %vm3405_vm6, %v1317_v5, %v4475_v24  ;;  %v3430_v43 = vsel %vm3405_vm6, %v1316_v52, %v4474_v35 }
 0x35c   : > { %v8032_v42 = vpop.permute.xlu0 %4772  ;;  %v3656_v53 = vpack.c.bf16 %v3625_v38, %v3624_v4  ;;  %v4700_v2 = vunpack.i.h.bf16 %v4698_v51  ;;  %v4699_v18 = vunpack.i.l.bf16 %v4698_v51  ;;  %v3429_v10 = vsel %vm3405_vm6, %v1315_v3, %v4470_v11 }
 0x35d   : > { %v4775_v29 = vunpack.i.h.bf16 %v8032_v42  ;;  %v4774_v52 = vunpack.i.l.bf16 %v8032_v42  ;;  %v3463_v33 = vsel %vm3438_vm7, %v3430_v43, %v4754_v50 }
 0x35e   : > { %3906 = vmatmul.mubr.bf16.gmra.mrb[20].mxu1 %v3656_v53  ;;  %v3461_v4 = vsel %vm3438_vm7, %v3428_v49, %v4699_v18  ;;  %v3462_v38 = vsel %vm3438_vm7, %v3429_v10, %v4700_v2  ;;  %v3496_v28 = vsel %vm3471_vm8, %v3463_v33, %v4764_v61  ;;  %v9249_v49 = vld [vmem:[#allocation71_spill] sm:$0xff]  ;;  %v9255_v61 = vld [vmem:[#allocation118_spill] sm:$0xff] }
 0x35f   : > { %v4708_v26 = vpop.permute.xlu1 %4707  ;;  %4120 = vmatprep.mubr.msk.bf16.mxu1 %vm3405_vm6, %v3659_v14  ;;  %v3529_v18 = vsel %vm3504_vm9, %v3496_v28, %v4774_v52  ;;  %v9260_v52 = vld [vmem:[#allocation141_spill] sm:$0xff] }
 0x360   : > { %v8035_v55 = vpop.permute.xlu0 %4782  ;;  %v4710_v56 = vunpack.i.h.bf16 %v4708_v26  ;;  %v4709_v44 = vunpack.i.l.bf16 %v4708_v26  ;;  %v3464_v26 = vsel %vm3438_vm7, %v3431_v46, %v4755_v59 }
 0x361   : > { %v4785_v30 = vunpack.i.h.bf16 %v8035_v55  ;;  %v4784_v25 = vunpack.i.l.bf16 %v8035_v55  ;;  %v3497_v63 = vsel %vm3471_vm8, %v3464_v26, %v4765_v54 }
 0x362   : > { %v3495_v34 = vsel %vm3471_vm8, %v3462_v38, %v4710_v56  ;;  %v3530_v59 = vsel %vm3504_vm9, %v3497_v63, %v4775_v29  ;;  %v9252_v38 = vld [vmem:[#allocation116_spill] sm:$0xff] }
 0x363   : > { %v4718_v22 = vpop.permute.xlu1 %4717  ;;  %v3562_v56 = vsel %vm3537_vm10, %v3529_v18, %v4784_v25 }
 0x364   : > { %v8037_v58 = vpop.permute.xlu0 %4792  ;;  %v4720_v21 = vunpack.i.h.bf16 %v4718_v22  ;;  %v4719_v48 = vunpack.i.l.bf16 %v4718_v22  ;;  %v3494_v22 = vsel %vm3471_vm8, %v3461_v4, %v4709_v44  ;;  %v9251_v4 = vld [vmem:[#allocation59_spill] sm:$0xff] }
 0x365   : > { %v4795_v16 = vunpack.i.h.bf16 %v8037_v58  ;;  %v4794_v37 = vunpack.i.l.bf16 %v8037_v58  ;;  %v3563_v58 = vsel %vm3537_vm10, %v3530_v59, %v4785_v30  ;;  %v9261_v30 = vld [vmem:[#allocation78_spill] sm:$0xff] }
 0x366   : > { %v3527_v31 = vsel %vm3504_vm9, %v3494_v22, %v4719_v48  ;;  %v3528_v36 = vsel %vm3504_vm9, %v3495_v34, %v4720_v21  ;;  %v4505_v25 = vunpack.i.h.bf16 %v9261_v30 }
 0x367   : > { %v4728_v47 = vpop.permute.xlu1 %4727  ;;  %v3595_v44 = vsel %vm3570_vm11, %v3562_v56, %v4794_v37  ;;  %v3596_v46 = vsel %vm3570_vm11, %v3563_v58, %v4795_v16 }
 0x368   : > { %v8055_v23 = vpop.permute.xlu0 %4802  ;;  %v4730_v40 = vunpack.i.h.bf16 %v4728_v47  ;;  %v4729_v62 = vunpack.i.l.bf16 %v4728_v47 }
 0x369   : > { %v4805_v5 = vunpack.i.h.bf16 %v8055_v23  ;;  %v4804_v55 = vunpack.i.l.bf16 %v8055_v23  ;;  %v9248_v23 = vld [vmem:[#allocation76_spill] sm:$0xff] }
 0x36a   : > { %v3560_v24 = vsel %vm3537_vm10, %v3527_v31, %v4729_v62  ;;  %v3561_v35 = vsel %vm3537_vm10, %v3528_v36, %v4730_v40  ;;  %v2504_v21 = vmul.f32 %v9248_v23, %v7614_v57  ;;  %v9250_v40 = vld [vmem:[#allocation12_spill] sm:$0xff]  ;;  %v9254_v57 = vld [vmem:[#allocation149_spill] sm:$0xff]  ;;  %v8128_v31 = vmul.f32 %v9255_v61, %v9163_v41 }
 0x36b   : > { %v4738_v27 = vpop.permute.xlu1 %4737  ;;  %v3629_v10 = vsel %vm3603_vm12, %v3596_v46, %v4805_v5  ;;  %v1297_v62 = vmul.f32 %v9250_v40, %v9249_v49  ;;  %v4425_v50 = vunpack.i.h.bf16 %v9254_v57  ;;  %v4424_v22 = vunpack.i.l.bf16 %v9254_v57 }
 0x36c   : > { %v8068_v51 = vpop.permute.xlu0 %4812  ;;  %v4740_v53 = vunpack.i.h.bf16 %v4738_v27  ;;  %v4739_v14 = vunpack.i.l.bf16 %v4738_v27  ;;  %v3628_v27 = vsel %vm3603_vm12, %v3595_v44, %v4804_v55  ;;  %v4504_v46 = vunpack.i.l.bf16 %v9261_v30 }
 0x36d   : > { %v3660_v54 = vpack.c.bf16 %v3629_v10, %v3628_v27  ;;  %v3411_v33 = vsel %vm3405_vm6, %v1297_v62, %v4425_v50  ;;  %v4814_v27 = vunpack.i.l.bf16 %v8068_v51 }
 0x36e   : > { %v3593_v60 = vsel %vm3570_vm11, %v3560_v24, %v4739_v14  ;;  %v3594_v39 = vsel %vm3570_vm11, %v3561_v35, %v4740_v53  ;;  %v2503_v53 = vmul.f32 %v9252_v38, %v7600_v45  ;;  %v9253_v14 = vld [vmem:[#allocation10_spill] sm:$0xff]  ;;  %v3444_v44 = vsel %vm3438_vm7, %v3411_v33, %v4505_v25  ;;  %v9263_v33 = vld [vmem:[#allocation153_spill] sm:$0xff] }
 0x36f   : > { %v4748_v0 = vpop.permute.xlu1 %4747  ;;  %v1295_v26 = vmul.f32 %v9253_v14, %v9200_v6  ;;  %v9257_v45 = vld [vmem:[#allocation162_spill] sm:$0xff] }
 0x370   : > { %v4750_v47 = vunpack.i.h.bf16 %v4748_v0  ;;  %v4749_v9 = vunpack.i.l.bf16 %v4748_v0  ;;  %v8082_v20 = vpop.permute.xlu0 %4822  ;;  %v3663_v36 = vpack.c.bf16 %v2504_v21, %v2503_v53  ;;  %v9256_v0 = vld [vmem:[#allocation184_spill] sm:$0xff]  ;;  %v4815_v21 = vunpack.i.h.bf16 %v8068_v51 }
 0x371   : > { %v4419_v24 = vunpack.i.l.bf16 %v9256_v0  ;;  %v4825_v14 = vunpack.i.h.bf16 %v8082_v20 }
 0x372   : > { %v3626_v12 = vsel %vm3603_vm12, %v3593_v60, %v4749_v9  ;;  %v3627_v11 = vsel %vm3603_vm12, %v3594_v39, %v4750_v47  ;;  %v9258_v47 = vld [vmem:[#allocation11_spill] sm:$0xff]  ;;  %v9259_v9 = vld [vmem:[#allocation9_spill] sm:$0xff]  ;;  %v4500_v60 = vunpack.i.h.bf16 %v9260_v52  ;;  %v4499_v39 = vunpack.i.l.bf16 %v9260_v52 }
 0x373   : > { %v4758_v3 = vpop.permute.xlu1 %4757  ;;  %v3658_v42 = vpack.c.bf16 %v3627_v11, %v3626_v12  ;;  %v1296_v6 = vmul.f32 %v9258_v47, %v9257_v45  ;;  %v1294_v29 = vmul.f32 %v9259_v9, %v9208_v32 }
 0x374   : > { %v8099_v2 = vpop.permute.xlu0 %4832  ;;  %v4760_v12 = vunpack.i.h.bf16 %v4758_v3  ;;  %v4759_v11 = vunpack.i.l.bf16 %v4758_v3 }
 0x375   : > { %3914 = vmatmul.mubr.bf16.gmra.mrb[24].mxu1 %v3658_v42  ;;  %v3410_v16 = vsel %vm3405_vm6, %v1296_v6, %v4424_v22  ;;  %v3408_v28 = vsel %vm3405_vm6, %v1294_v29, %v4419_v24  ;;  %v4835_v50 = vunpack.i.h.bf16 %v8099_v2  ;;  %v4834_v22 = vunpack.i.l.bf16 %v8099_v2 }
 0x376   : > { %4121 = vmatprep.mubr.msk.bf16.mxu1 %vm3405_vm6, %v3661_v15  ;;  %v8118_v15 = vmul.f32 %v9251_v4, %v9166_v19  ;;  %v4420_v19 = vunpack.i.h.bf16 %v9256_v0  ;;  %v3441_v59 = vsel %vm3438_vm7, %v3408_v28, %v4499_v39  ;;  %v3443_v61 = vsel %vm3438_vm7, %v3410_v16, %v4504_v46  ;;  %v9264_v28 = vld [vmem:[#allocation150_spill] sm:$0xff] }
 0x377   : > { %v4768_v43 = vpop.permute.xlu1 %4767  ;;  %v3476_v24 = vsel %vm3471_vm8, %v3443_v61, %v4814_v27  ;;  %v2483_v16 = vmul.f32 %v9263_v33, %v6928_v1 }
 0x378   : > { %v8110_v48 = vpop.permute.xlu0 %4842  ;;  %v3641_v41 = vpack.c.bf16 %v8118_v15, %v8128_v31  ;;  %v4770_v37 = vunpack.i.h.bf16 %v4768_v43  ;;  %v4769_v32 = vunpack.i.l.bf16 %v4768_v43  ;;  %v3409_v63 = vsel %vm3405_vm6, %v1295_v26, %v4420_v19 }
 0x379   : > { %v3442_v3 = vsel %vm3438_vm7, %v3409_v63, %v4500_v60  ;;  %v3474_v43 = vsel %vm3471_vm8, %v3441_v59, %v4759_v11  ;;  %v4824_v26 = vunpack.i.l.bf16 %v8082_v20  ;;  %v4845_v31 = vunpack.i.h.bf16 %v8110_v48  ;;  %v9267_v59 = vld [vmem:[#allocation64_spill] sm:$0xff] }
 0x37a   : > { %v3475_v23 = vsel %vm3471_vm8, %v3442_v3, %v4760_v12  ;;  %v3507_v10 = vsel %vm3504_vm9, %v3474_v43, %v4769_v32  ;;  %v3477_v19 = vsel %vm3471_vm8, %v3444_v44, %v4815_v21  ;;  %v8200_v63 = vmul.f32 %v9264_v28, %v9206_v8  ;;  %v9269_v44 = vld [vmem:[#allocation30_spill] sm:$0xff]  ;;  %v9270_v43 = vld [vmem:[#allocation69_spill] sm:$0xff] }
 0x37b   : > { %v4778_v34 = vpop.permute.xlu1 %4777  ;;  %v3508_v49 = vsel %vm3504_vm9, %v3475_v23, %v4770_v37  ;;  %v3509_v6 = vsel %vm3504_vm9, %v3476_v24, %v4824_v26  ;;  %v3510_v9 = vsel %vm3504_vm9, %v3477_v19, %v4825_v14  ;;  %v4485_v3 = vunpack.i.h.bf16 %v9267_v59  ;;  %v9271_v21 = vld [vmem:[#allocation77_spill] sm:$0xff] }
 0x37c   : > { %v8132_v35 = vpop.permute.xlu0 %4852  ;;  %v4780_v5 = vunpack.i.h.bf16 %v4778_v34  ;;  %v4779_v55 = vunpack.i.l.bf16 %v4778_v34  ;;  %v3542_v29 = vsel %vm3537_vm10, %v3509_v6, %v4834_v22  ;;  %v8211_v23 = vmul.f32 %v9270_v43, %v9198_v13 }
 0x37d   : > { %3922 = vmatmul.mubr.bf16.gmra.mrb[28].mxu1 %v3660_v54  ;;  %v4855_v45 = vunpack.i.h.bf16 %v8132_v35  ;;  %v4854_v2 = vunpack.i.l.bf16 %v8132_v35  ;;  %v9262_v35 = vld [vmem:[#allocation127_spill] sm:$0xff]  ;;  %v4480_v8 = vunpack.i.h.bf16 %v9271_v21  ;;  %v4479_v27 = vunpack.i.l.bf16 %v9271_v21 }
 0x37e   : > { %4122 = vmatprep.mubr.msk.bf16.mxu1 %vm3405_vm6, %v3663_v36  ;;  %v3540_v62 = vsel %vm3537_vm10, %v3507_v10, %v4779_v55  ;;  %v3541_v4 = vsel %vm3537_vm10, %v3508_v49, %v4780_v5  ;;  %v4844_v36 = vunpack.i.l.bf16 %v8110_v48  ;;  %v3543_v48 = vsel %vm3537_vm10, %v3510_v9, %v4835_v50  ;;  %v9266_v5 = vld [vmem:[#allocation28_spill] sm:$0xff] }
 0x37f   : > { %v4788_v42 = vpop.permute.xlu1 %4787  ;;  %v3576_v60 = vsel %vm3570_vm11, %v3543_v48, %v4845_v31  ;;  %v2484_v30 = vmul.f32 %v9262_v35, %v6922_v17  ;;  %v9265_v17 = vld [vmem:[#allocation74_spill] sm:$0xff]  ;;  %v9272_v49 = vld [vmem:[#allocation124_spill] sm:$0xff] }
 0x380   : > { %v8148_v18 = vpop.permute.xlu0 %4862  ;;  %v4790_v56 = vunpack.i.h.bf16 %v4788_v42  ;;  %v4789_v58 = vunpack.i.l.bf16 %v4788_v42  ;;  %v3575_v52 = vsel %vm3570_vm11, %v3542_v29, %v4844_v36  ;;  %v3609_v11 = vsel %vm3603_vm12, %v3576_v60, %v4855_v45 }
 0x381   : > { %v3608_v12 = vsel %vm3603_vm12, %v3575_v52, %v4854_v2  ;;  %v1318_v55 = vmul.f32 %v9266_v5, %v9265_v17  ;;  %v4865_v13 = vunpack.i.h.bf16 %v8148_v18  ;;  %v4864_v48 = vunpack.i.l.bf16 %v8148_v18 }
 0x382   : > { %v3573_v57 = vsel %vm3570_vm11, %v3540_v62, %v4789_v58  ;;  %v3574_v51 = vsel %vm3570_vm11, %v3541_v4, %v4790_v56  ;;  %v3640_v32 = vpack.c.bf16 %v3609_v11, %v3608_v12  ;;  %v4484_v56 = vunpack.i.l.bf16 %v9267_v59  ;;  %v9268_v58 = vld [vmem:[#allocation125_spill] sm:$0xff] }
 0x383   : > { %v4798_v40 = vpop.permute.xlu1 %4797  ;;  %v1320_v46 = vmul.f32 %v9269_v44, %v9268_v58  ;;  %v9274_v4 = vld [vmem:[#allocation73_spill] sm:$0xff] }
 0x384   : > { %v4800_v15 = vunpack.i.h.bf16 %v4798_v40  ;;  %v4799_v38 = vunpack.i.l.bf16 %v4798_v40  ;;  %v8162_v53 = vpop.permute.xlu0 %4872  ;;  %v9273_v40 = vld [vmem:[#allocation29_spill] sm:$0xff] }
 0x385   : > { %v1319_v62 = vmul.f32 %v9273_v40, %v9272_v49  ;;  %v4874_v35 = vunpack.i.l.bf16 %v8162_v53 }
 0x386   : > { %v3606_v34 = vsel %vm3603_vm12, %v3573_v57, %v4799_v38  ;;  %v3607_v54 = vsel %vm3603_vm12, %v3574_v51, %v4800_v15  ;;  %v9275_v15 = vld [vmem:[#allocation31_spill] sm:$0xff]  ;;  %v3665_v57 = vpack.c.bf16 %v8200_v63, %v8211_v23 }
 0x387   : > { %v4808_v0 = vpop.permute.xlu1 %4807  ;;  %v3638_v20 = vpack.c.bf16 %v3607_v54, %v3606_v34  ;;  %v1321_v38 = vmul.f32 %v9275_v15, %v9274_v4  ;;  %v3434_v34 = vsel %vm3405_vm6, %v1320_v46, %v4484_v56  ;;  %v3433_v36 = vsel %vm3405_vm6, %v1319_v62, %v4480_v8  ;;  %v9276_v62 = vld [vmem:[#allocation68_spill] sm:$0xff]  ;;  %v9277_v4 = vld [vmem:[#allocation195_spill] sm:$0xff] }
 0x388   : > { %v8179_v47 = vpop.permute.xlu0 %4882  ;;  %v4810_v14 = vunpack.i.h.bf16 %v4808_v0  ;;  %v4809_v26 = vunpack.i.l.bf16 %v4808_v0  ;;  %v3467_v59 = vsel %vm3438_vm7, %v3434_v34, %v4864_v48  ;;  %v2508_v15 = vmul.f32 %v9277_v4, %v9276_v62  ;;  %v9282_v34 = vld [vmem:[#allocation38_spill] sm:$0xff] }
 0x389   : > { %3834 = vmatmul.mubr.bf16.gmra.mrb[36].mxu0 %v3638_v20  ;;  %v3435_v22 = vsel %vm3405_vm6, %v1321_v38, %v4485_v3  ;;  %v3432_v20 = vsel %vm3405_vm6, %v1318_v55, %v4479_v27  ;;  %v4885_v18 = vunpack.i.h.bf16 %v8179_v47  ;;  %v3500_v44 = vsel %vm3471_vm8, %v3467_v59, %v4874_v35  ;;  %v9289_v35 = vld [vmem:[#allocation201_spill] sm:$0xff] }
 0x38a   : > { %4111 = vmatprep.mubr.msk.bf16.mxu0 %vm3405_vm6, %v3641_v41  ;;  %v3643_v41 = vpack.c.bf16 %v2484_v30, %v2483_v16  ;;  %v3465_v24 = vsel %vm3438_vm7, %v3432_v20, %v4809_v26  ;;  %v3466_v45 = vsel %vm3438_vm7, %v3433_v36, %v4810_v14  ;;  %v3468_v29 = vsel %vm3438_vm7, %v3435_v22, %v4865_v13  ;;  %v9278_v26 = vld [vmem:[#allocation178_spill] sm:$0xff]  ;;  %v9279_v13 = vld [vmem:[#allocation13_spill] sm:$0xff]  ;;  %v9285_v20 = vld [vmem:[#allocation160_spill] sm:$0xff] }
 0x38b   : > { %v4818_v39 = vpop.permute.xlu1 %4817  ;;  %v9281_v22 = vld [vmem:[#allocation70_spill] sm:$0xff] }
 0x38c   : > { %v8190_v25 = vpop.permute.xlu0 %4892  ;;  %v4820_v51 = vunpack.i.h.bf16 %v4818_v39  ;;  %v4819_v50 = vunpack.i.l.bf16 %v4818_v39  ;;  %v4875_v39 = vunpack.i.h.bf16 %v8162_v53 }
 0x38d   : > { %v4895_v53 = vunpack.i.h.bf16 %v8190_v25  ;;  %v4894_v17 = vunpack.i.l.bf16 %v8190_v25 }
 0x38e   : > { %v3498_v52 = vsel %vm3471_vm8, %v3465_v24, %v4819_v50  ;;  %v3499_v60 = vsel %vm3471_vm8, %v3466_v45, %v4820_v51  ;;  %v3501_v46 = vsel %vm3471_vm8, %v3468_v29, %v4875_v39  ;;  %v1298_v51 = vmul.f32 %v9279_v13, %v9278_v26  ;;  %v9280_v50 = vld [vmem:[#allocation37_spill] sm:$0xff] }
 0x38f   : > { %v4828_v37 = vpop.permute.xlu1 %4827  ;;  %v3534_v21 = vsel %vm3504_vm9, %v3501_v46, %v4885_v18 }
 0x390   : > { %v8196_v42 = vpop.permute.xlu0 %4902  ;;  %v4830_v54 = vunpack.i.h.bf16 %v4828_v37  ;;  %v4829_v61 = vunpack.i.l.bf16 %v4828_v37 }
 0x391   : > { %3842 = vmatmul.mubr.bf16.gmra.mrb[40].mxu0 %v3640_v32  ;;  %v4905_v3 = vunpack.i.h.bf16 %v8196_v42  ;;  %v4904_v56 = vunpack.i.l.bf16 %v8196_v42  ;;  %v3567_v42 = vsel %vm3537_vm10, %v3534_v21, %v4895_v53 }
 0x392   : > { %4112 = vmatprep.mubr.msk.bf16.mxu0 %vm3405_vm6, %v3643_v41  ;;  %v3531_v30 = vsel %vm3504_vm9, %v3498_v52, %v4829_v61  ;;  %v3532_v12 = vsel %vm3504_vm9, %v3499_v60, %v4830_v54  ;;  %v4884_v41 = vunpack.i.l.bf16 %v8179_v47  ;;  %v9283_v54 = vld [vmem:[#allocation158_spill] sm:$0xff]  ;;  %v9288_v52 = vld [vmem:[#allocation81_spill] sm:$0xff] }
 0x393   : > { %v4838_v1 = vpop.permute.xlu1 %4837  ;;  %v3600_v49 = vsel %vm3570_vm11, %v3567_v42, %v4905_v3  ;;  %v2507_v61 = vmul.f32 %v9283_v54, %v9282_v34  ;;  %v4430_v60 = vunpack.i.h.bf16 %v9288_v52  ;;  %v4429_v39 = vunpack.i.l.bf16 %v9288_v52 }
 0x394   : > { %v8215_v10 = vpop.permute.xlu0 %4912  ;;  %v4840_v19 = vunpack.i.h.bf16 %v4838_v1  ;;  %v4839_v0 = vunpack.i.l.bf16 %v4838_v1  ;;  %v3533_v23 = vsel %vm3504_vm9, %v3500_v44, %v4884_v41  ;;  %v9294_v41 = vld [vmem:[#allocation61_spill] sm:$0xff] }
 0x395   : > { %v4915_v25 = vunpack.i.h.bf16 %v8215_v10  ;;  %v4914_v43 = vunpack.i.l.bf16 %v8215_v10  ;;  %v3566_v8 = vsel %vm3537_vm10, %v3533_v23, %v4894_v17  ;;  %v3667_v48 = vpack.c.bf16 %v2508_v15, %v2507_v61 }
 0x396   : > { %v3564_v33 = vsel %vm3537_vm10, %v3531_v30, %v4839_v0  ;;  %v3565_v16 = vsel %vm3537_vm10, %v3532_v12, %v4840_v19  ;;  %v3599_v27 = vsel %vm3570_vm11, %v3566_v8, %v4904_v56  ;;  %v4435_v19 = vunpack.i.h.bf16 %v9285_v20  ;;  %v9290_v30 = vld [vmem:[#allocation4_spill] sm:$0xff] }
 0x397   : > { %v4848_v31 = vpop.permute.xlu1 %4847  ;;  %v3632_v10 = vsel %vm3603_vm12, %v3599_v27, %v4914_v43  ;;  %v3633_v38 = vsel %vm3603_vm12, %v3600_v49, %v4915_v25  ;;  %v4434_v0 = vunpack.i.l.bf16 %v9285_v20  ;;  %v1300_v12 = vmul.f32 %v9290_v30, %v9289_v35 }
 0x398   : > { %v4850_v2 = vunpack.i.h.bf16 %v4848_v31  ;;  %v4849_v6 = vunpack.i.l.bf16 %v4848_v31  ;;  %v8230_v9 = vpop.permute.xlu0 %4922  ;;  %v9284_v31 = vld [vmem:[#allocation15_spill] sm:$0xff]  ;;  %v3664_v45 = vpack.c.bf16 %v3633_v38, %v3632_v10  ;;  %v3412_v44 = vsel %vm3405_vm6, %v1298_v51, %v4429_v39 }
 0x399   : > { %v1301_v36 = vmul.f32 %v9284_v31, %v7501_v7  ;;  %v9292_v7 = vld [vmem:[#allocation14_spill] sm:$0xff]  ;;  %v4514_v42 = vunpack.i.l.bf16 %v9294_v41  ;;  %v4924_v62 = vunpack.i.l.bf16 %v8230_v9 }
 0x39a   : > { %v3597_v28 = vsel %vm3570_vm11, %v3564_v33, %v4849_v6  ;;  %v3598_v63 = vsel %vm3570_vm11, %v3565_v16, %v4850_v2  ;;  %v9286_v2 = vld [vmem:[#allocation60_spill] sm:$0xff]  ;;  %v9287_v6 = vld [vmem:[#allocation129_spill] sm:$0xff] }
 0x39b   : > { %v4858_v11 = vpop.permute.xlu1 %4857  ;;  %v8286_v29 = vmul.f32 %v9287_v6, %v9286_v2  ;;  %v9293_v16 = vld [vmem:[#allocation136_spill] sm:$0xff]  ;;  %v3415_v17 = vsel %vm3405_vm6, %v1301_v36, %v4435_v19 }
 0x39c   : > { %v4860_v37 = vunpack.i.h.bf16 %v4858_v11  ;;  %v4859_v32 = vunpack.i.l.bf16 %v4858_v11  ;;  %v8253_v1 = vpop.permute.xlu0 %4932  ;;  %v9291_v11 = vld [vmem:[#allocation139_spill] sm:$0xff] }
 0x39d   : > { %v1299_v33 = vmul.f32 %v9292_v7, %v9291_v11 }
 0x39e   : > { %v3630_v5 = vsel %vm3603_vm12, %v3597_v28, %v4859_v32  ;;  %v3631_v55 = vsel %vm3603_vm12, %v3598_v63, %v4860_v37  ;;  %v4510_v37 = vunpack.i.h.bf16 %v9293_v16  ;;  %v4509_v32 = vunpack.i.l.bf16 %v9293_v16 }
 0x39f   : > { %v4868_v47 = vpop.permute.xlu1 %4867  ;;  %v3662_v58 = vpack.c.bf16 %v3631_v55, %v3630_v5  ;;  %v4515_v28 = vunpack.i.h.bf16 %v9294_v41  ;;  %v3414_v5 = vsel %vm3405_vm6, %v1300_v12, %v4434_v0 }
 0x3a0   : > { %v8270_v14 = vpop.permute.xlu0 %4942  ;;  %v4870_v63 = vunpack.i.h.bf16 %v4868_v47  ;;  %v4869_v53 = vunpack.i.l.bf16 %v4868_v47  ;;  %v3445_v43 = vsel %vm3438_vm7, %v3412_v44, %v4509_v32  ;;  %v3447_v20 = vsel %vm3438_vm7, %v3414_v5, %v4514_v42  ;;  %v9298_v5 = vld [vmem:[#allocation138_spill] sm:$0xff] }
 0x3a1   : > { %3930 = vmatmul.mubr.bf16.gmra.mrb[32].mxu1 %v3662_v58  ;;  %v3413_v58 = vsel %vm3405_vm6, %v1299_v33, %v4430_v60  ;;  %v3448_v8 = vsel %vm3438_vm7, %v3415_v17, %v4515_v28  ;;  %v4945_v54 = vunpack.i.h.bf16 %v8270_v14  ;;  %v4944_v61 = vunpack.i.l.bf16 %v8270_v14 }
 0x3a2   : > { %4123 = vmatprep.mubr.msk.bf16.mxu1 %vm3405_vm6, %v3665_v57  ;;  %v8276_v57 = vmul.f32 %v9281_v22, %v9280_v50  ;;  %v3446_v47 = vsel %vm3438_vm7, %v3413_v58, %v4510_v37  ;;  %v3478_v27 = vsel %vm3471_vm8, %v3445_v43, %v4869_v53  ;;  %v4935_v50 = vunpack.i.h.bf16 %v8253_v1  ;;  %v9295_v37 = vld [vmem:[#allocation82_spill] sm:$0xff]  ;;  %v9297_v53 = vld [vmem:[#allocation32_spill] sm:$0xff] }
 0x3a3   : > { %v4878_v40 = vpop.permute.xlu1 %4877  ;;  %v3479_v49 = vsel %vm3471_vm8, %v3446_v47, %v4870_v63  ;;  %v4934_v22 = vunpack.i.l.bf16 %v8253_v1  ;;  %v3480_v2 = vsel %vm3471_vm8, %v3447_v20, %v4924_v62  ;;  %v4490_v32 = vunpack.i.h.bf16 %v9295_v37 }
 0x3a4   : > { %v3645_v18 = vpack.c.bf16 %v8276_v57, %v8286_v29  ;;  %v4880_v55 = vunpack.i.h.bf16 %v4878_v40  ;;  %v4879_v59 = vunpack.i.l.bf16 %v4878_v40  ;;  %v4953_v3 = vpop.permute.xlu0 %4952  ;;  %v4925_v40 = vunpack.i.h.bf16 %v8230_v9 }
 0x3a5   : > { %v4955_v19 = vunpack.i.h.bf16 %v4953_v3  ;;  %v4954_v0 = vunpack.i.l.bf16 %v4953_v3  ;;  %v4489_v41 = vunpack.i.l.bf16 %v9295_v37 }
 0x3a6   : > { %v3511_v4 = vsel %vm3504_vm9, %v3478_v27, %v4879_v59  ;;  %v3512_v15 = vsel %vm3504_vm9, %v3479_v49, %v4880_v55  ;;  %v3481_v1 = vsel %vm3471_vm8, %v3448_v8, %v4925_v40  ;;  %v9299_v55 = vld [vmem:[#allocation33_spill] sm:$0xff] }
 0x3a7   : > { %v4888_v24 = vpop.permute.xlu1 %4887  ;;  %v3514_v14 = vsel %vm3504_vm9, %v3481_v1, %v4935_v50  ;;  %v1323_v59 = vmul.f32 %v9299_v55, %v9298_v5 }
 0x3a8   : > { %v4890_v46 = vunpack.i.h.bf16 %v4888_v24  ;;  %v4889_v25 = vunpack.i.l.bf16 %v4888_v24  ;;  %v4963_v57 = vpop.permute.xlu0 %4962  ;;  %v3547_v60 = vsel %vm3537_vm10, %v3514_v14, %v4945_v54 }
 0x3a9   : > { %3938 = vmatmul.mubr.bf16.gmra.mrb[36].mxu1 %v3664_v45  ;;  %v4965_v6 = vunpack.i.h.bf16 %v4963_v57  ;;  %v4964_v29 = vunpack.i.l.bf16 %v4963_v57  ;;  %v3580_v35 = vsel %vm3570_vm11, %v3547_v60, %v4955_v19 }
 0x3aa   : > { %4124 = vmatprep.mubr.msk.bf16.mxu1 %vm3405_vm6, %v3667_v48  ;;  %v3544_v38 = vsel %vm3537_vm10, %v3511_v4, %v4889_v25  ;;  %v3545_v26 = vsel %vm3537_vm10, %v3512_v15, %v4890_v46  ;;  %v3513_v48 = vsel %vm3504_vm9, %v3480_v2, %v4934_v22  ;;  %v3437_v25 = vsel %vm3405_vm6, %v1323_v59, %v4490_v32 }
 0x3ab   : > { %v4898_v56 = vpop.permute.xlu1 %4897  ;;  %v3546_v52 = vsel %vm3537_vm10, %v3513_v48, %v4944_v61  ;;  %v3613_v11 = vsel %vm3603_vm12, %v3580_v35, %v4965_v6 }
 0x3ac   : > { %v4900_v23 = vunpack.i.h.bf16 %v4898_v56  ;;  %v4899_v21 = vunpack.i.l.bf16 %v4898_v56  ;;  %v3579_v39 = vsel %vm3570_vm11, %v3546_v52, %v4954_v0 }
 0x3ad   : > { %v3612_v12 = vsel %vm3603_vm12, %v3579_v39, %v4964_v29 }
 0x3ae   : > { %v3577_v34 = vsel %vm3570_vm11, %v3544_v38, %v4899_v21  ;;  %v3578_v9 = vsel %vm3570_vm11, %v3545_v26, %v4900_v23  ;;  %v3644_v33 = vpack.c.bf16 %v3613_v11, %v3612_v12 }
 0x3af   : > { %v4908_v10 = vpop.permute.xlu1 %4907 }
 0x3b0   : > { %v4910_v13 = vunpack.i.h.bf16 %v4908_v10  ;;  %v4909_v51 = vunpack.i.l.bf16 %v4908_v10 }
 0x3b2   : > { %v3610_v31 = vsel %vm3603_vm12, %v3577_v34, %v4909_v51  ;;  %v3611_v36 = vsel %vm3603_vm12, %v3578_v9, %v4910_v13  ;;  %v8359_v9 = vld [vmem:[%s8471_s5 + $0x1] ss:$0 sm:$0xff] }
 0x3b3   : > { %v4918_v24 = vpop.permute.xlu1 %4917  ;;  %v3642_v45 = vpack.c.bf16 %v3611_v36, %v3610_v31 }
 0x3b4   : > { %v4920_v28 = vunpack.i.h.bf16 %v4918_v24  ;;  %v4919_v63 = vunpack.i.l.bf16 %v4918_v24 }
 0x3b5   : > { %3850 = vmatmul.mubr.bf16.gmra.mrb[44].mxu0 %v3642_v45 }
 0x3b6   : > { %4113 = vmatprep.mubr.msk.bf16.mxu0 %vm3405_vm6, %v3645_v18  ;;  %v9296_v18 = vld [vmem:[#allocation131_spill] sm:$0xff]  ;;  %v3470_v8 = vsel %vm3438_vm7, %v3437_v25, %v4920_v28 }
 0x3b7   : > { %v4928_v30 = vpop.permute.xlu1 %4927  ;;  %v1322_v17 = vmul.f32 %v9297_v53, %v9296_v18 }
 0x3b8   : > { %v4930_v3 = vunpack.i.h.bf16 %v4928_v30  ;;  %v4929_v56 = vunpack.i.l.bf16 %v4928_v30 }
 0x3b9   : > { %v3436_v43 = vsel %vm3405_vm6, %v1322_v17, %v4489_v41 }
 0x3ba   : > { %v3469_v21 = vsel %vm3438_vm7, %v3436_v43, %v4919_v63  ;;  %v3503_v40 = vsel %vm3471_vm8, %v3470_v8, %v4930_v3 }
 0x3bb   : > { %v4938_v7 = vpop.permute.xlu1 %4937  ;;  %v3502_v49 = vsel %vm3471_vm8, %v3469_v21, %v4929_v56 }
 0x3bc   : > { %v4940_v58 = vunpack.i.h.bf16 %v4938_v7  ;;  %v4939_v44 = vunpack.i.l.bf16 %v4938_v7 }
 0x3bd   : > { %3858 = vmatmul.mubr.bf16.gmra.mrb[48].mxu0 %v3644_v33 }
 0x3be   : > { %v3535_v62 = vsel %vm3504_vm9, %v3502_v49, %v4939_v44  ;;  %v3536_v4 = vsel %vm3504_vm9, %v3503_v40, %v4940_v58 }
 0x3bf   : > { %v4948_v16 = vpop.permute.xlu1 %4947 }
 0x3c0   : > { %v4950_v47 = vunpack.i.h.bf16 %v4948_v16  ;;  %v4949_v23 = vunpack.i.l.bf16 %v4948_v16 }
 0x3c2   : > { %v3568_v10 = vsel %vm3537_vm10, %v3535_v62, %v4949_v23  ;;  %v3569_v38 = vsel %vm3537_vm10, %v3536_v4, %v4950_v47 }
 0x3c3   : > { %v4958_v46 = vpop.permute.xlu1 %4957 }
 0x3c4   : > { %v4960_v42 = vunpack.i.h.bf16 %v4958_v46  ;;  %v4959_v27 = vunpack.i.l.bf16 %v4958_v46 }
 0x3c6   : > { %v3602_v51 = vsel %vm3570_vm11, %v3569_v38, %v4960_v42  ;;  %v3601_v50 = vsel %vm3570_vm11, %v3568_v10, %v4959_v27 }
 0x3c7   : > { %v4968_v15 = vpop.permute.xlu1 %4967 }
 0x3c8   : > { %v4970_v26 = vunpack.i.h.bf16 %v4968_v15  ;;  %v4969_v13 = vunpack.i.l.bf16 %v4968_v15 }
 0x3ca   : > { %v3634_v22 = vsel %vm3603_vm12, %v3601_v50, %v4969_v13  ;;  %v3635_v57 = vsel %vm3603_vm12, %v3602_v51, %v4970_v26 }
 0x3cb   : > { %v3666_v34 = vpack.c.bf16 %v3635_v57, %v3634_v22 }
 0x3cd   : > { %3946 = vmatmul.mubr.bf16.gmra.mrb[40].mxu1 %v3666_v34 }
 0x3f5   : > { %v3867_v54 = vpop.f32.mrb[0].mxu1 }
 0x3f6   : > { %v3868_v61 = vadd.f32 %v8359_v9, %v3867_v54  ;;  %v3869_v31 = vpop.f32.mrb[1].mxu1 }
 0x3f7   : > { %v3870_v36 = vpop.f32.mrb[2].mxu1 }
 0x3f8   : > { %3964 = vst.msk [vmem:[%s8365_s14 + $0x50] sm:$0xff] %vm3405_vm6, %v3868_v61  ;;  %v3871_v20 = vadd.f32 %v8359_v9, %v3870_v36  ;;  %v3872_v19 = vpop.f32.mrb[3].mxu1 }
 0x3fa   : > { %3965 = vst.msk [vmem:[%s8365_s14 + $0x58] sm:$0xff] %vm3405_vm6, %v3871_v20 }
 0x401   : > { %v3875_v0 = vpop.f32.mrb[4].mxu1 }
 0x402   : > { %v3876_v24 = vadd.f32 %v8359_v9, %v3875_v0  ;;  %v3877_v45 = vpop.f32.mrb[5].mxu1 }
 0x403   : > { %v3878_v1 = vpop.f32.mrb[6].mxu1 }
 0x404   : > { %3966 = vst.msk [vmem:[%s8365_s14 + $0x60] sm:$0xff] %vm3405_vm6, %v3876_v24  ;;  %v3879_v2 = vadd.f32 %v8359_v9, %v3878_v1  ;;  %v3880_v6 = vpop.f32.mrb[7].mxu1 }
 0x406   : > { %3967 = vst.msk [vmem:[%s8365_s14 + $0x68] sm:$0xff] %vm3405_vm6, %v3879_v2 }
 0x40d   : > { %v3883_v29 = vpop.f32.mrb[8].mxu1 }
 0x40e   : > { %v3884_v48 = vadd.f32 %v8359_v9, %v3883_v29  ;;  %v3885_v14 = vpop.f32.mrb[9].mxu1 }
 0x40f   : > { %v3886_v52 = vpop.f32.mrb[10].mxu1 }
 0x410   : > { %3968 = vst.msk [vmem:[%s8365_s14 + $0x70] sm:$0xff] %vm3405_vm6, %v3884_v48  ;;  %v3887_v60 = vadd.f32 %v8359_v9, %v3886_v52  ;;  %v3888_v39 = vpop.f32.mrb[11].mxu1 }
 0x412   : > { %3969 = vst.msk [vmem:[%s8365_s14 + $0x78] sm:$0xff] %vm3405_vm6, %v3887_v60 }
 0x419   : > { %v3891_v35 = vpop.f32.mrb[12].mxu1 }
 0x41a   : > { %v3892_v30 = vadd.f32 %v8359_v9, %v3891_v35  ;;  %v3893_v12 = vpop.f32.mrb[13].mxu1 }
 0x41b   : > { %v3894_v11 = vpop.f32.mrb[14].mxu1 }
 0x41c   : > { %3970 = vst.msk [vmem:[%s8365_s14 + $0x80] sm:$0xff] %vm3405_vm6, %v3892_v30  ;;  %v3895_v7 = vadd.f32 %v8359_v9, %v3894_v11  ;;  %v3896_v33 = vpop.f32.mrb[15].mxu1 }
 0x41e   : > { %3971 = vst.msk [vmem:[%s8365_s14 + $0x88] sm:$0xff] %vm3405_vm6, %v3895_v7 }
 0x425   : > { %v3899_v16 = vpop.f32.mrb[16].mxu1 }
 0x426   : > { %v3900_v37 = vadd.f32 %v8359_v9, %v3899_v16  ;;  %v3901_v32 = vpop.f32.mrb[17].mxu1 }
 0x427   : > { %v3902_v41 = vpop.f32.mrb[18].mxu1 }
 0x428   : > { %3972 = vst.msk [vmem:[%s8365_s14 + $0x90] sm:$0xff] %vm3405_vm6, %v3900_v37  ;;  %v3903_v28 = vadd.f32 %v8359_v9, %v3902_v41  ;;  %v3904_v63 = vpop.f32.mrb[19].mxu1 }
 0x429   : > { %v3827_v18 = vpop.f32.mrb[32].mxu0 }
 0x42a   : > { %3973 = vst.msk [vmem:[%s8365_s14 + $0x98] sm:$0xff] %vm3405_vm6, %v3903_v28  ;;  %v3828_v53 = vadd.f32 %v8359_v9, %v3827_v18  ;;  %v3829_v17 = vpop.f32.mrb[33].mxu0 }
 0x42b   : > { %v3830_v5 = vpop.f32.mrb[34].mxu0 }
 0x42c   : > { %3954 = vst.msk [vmem:[%s8365_s14] sm:$0xff] %vm3405_vm6, %v3828_v53  ;;  %v3831_v55 = vadd.f32 %v8359_v9, %v3830_v5  ;;  %v3832_v59 = vpop.f32.mrb[35].mxu0 }
 0x42e   : > { %3955 = vst.msk [vmem:[%s8365_s14 + $0x8] sm:$0xff] %vm3405_vm6, %v3831_v55 }
 0x431   : > { %v3907_v3 = vpop.f32.mrb[20].mxu1 }
 0x432   : > { %v3908_v56 = vadd.f32 %v8359_v9, %v3907_v3  ;;  %v3909_v58 = vpop.f32.mrb[21].mxu1 }
 0x433   : > { %v3910_v44 = vpop.f32.mrb[22].mxu1 }
 0x434   : > { %3974 = vst.msk [vmem:[%s8365_s14 + $0xa0] sm:$0xff] %vm3405_vm6, %v3908_v56  ;;  %v3911_v46 = vadd.f32 %v8359_v9, %v3910_v44  ;;  %v3912_v25 = vpop.f32.mrb[23].mxu1 }
 0x436   : > { %3975 = vst.msk [vmem:[%s8365_s14 + $0xa8] sm:$0xff] %vm3405_vm6, %v3911_v46 }
 0x448   : > { %v3915_v43 = vpop.f32.mrb[24].mxu1 }
 0x449   : > { %v3916_v47 = vadd.f32 %v8359_v9, %v3915_v43  ;;  %v3917_v23 = vpop.f32.mrb[25].mxu1 }
 0x44a   : > { %v3918_v21 = vpop.f32.mrb[26].mxu1 }
 0x44b   : > { %3976 = vst.msk [vmem:[%s8365_s14 + $0xb0] sm:$0xff] %vm3405_vm6, %v3916_v47  ;;  %v3919_v8 = vadd.f32 %v8359_v9, %v3918_v21  ;;  %v3920_v42 = vpop.f32.mrb[27].mxu1 }
 0x44d   : > { %3977 = vst.msk [vmem:[%s8365_s14 + $0xb8] sm:$0xff] %vm3405_vm6, %v3919_v8 }
 0x450   : > { %v3923_v27 = vpop.f32.mrb[28].mxu1 }
 0x451   : > { %v3924_v49 = vadd.f32 %v8359_v9, %v3923_v27  ;;  %v3925_v40 = vpop.f32.mrb[29].mxu1 }
 0x452   : > { %v3926_v62 = vpop.f32.mrb[30].mxu1 }
 0x453   : > { %3978 = vst.msk [vmem:[%s8365_s14 + $0xc0] sm:$0xff] %vm3405_vm6, %v3924_v49  ;;  %v3927_v4 = vadd.f32 %v8359_v9, %v3926_v62  ;;  %v3928_v15 = vpop.f32.mrb[31].mxu1 }
 0x455   : > { %3979 = vst.msk [vmem:[%s8365_s14 + $0xc8] sm:$0xff] %vm3405_vm6, %v3927_v4 }
 0x45c   : > { %v3835_v10 = vpop.f32.mrb[36].mxu0 }
 0x45d   : > { %v3836_v38 = vadd.f32 %v8359_v9, %v3835_v10  ;;  %v3837_v26 = vpop.f32.mrb[37].mxu0 }
 0x45e   : > { %v3838_v13 = vpop.f32.mrb[38].mxu0 }
 0x45f   : > { %3956 = vst.msk [vmem:[%s8365_s14 + $0x10] sm:$0xff] %vm3405_vm6, %v3836_v38  ;;  %v3839_v51 = vadd.f32 %v8359_v9, %v3838_v13  ;;  %v3840_v50 = vpop.f32.mrb[39].mxu0 }
 0x461   : > { %3957 = vst.msk [vmem:[%s8365_s14 + $0x18] sm:$0xff] %vm3405_vm6, %v3839_v51 }
 0x464   : > { %v3843_v22 = vpop.f32.mrb[40].mxu0 }
 0x465   : > { %v3844_v57 = vadd.f32 %v8359_v9, %v3843_v22  ;;  %v3845_v34 = vpop.f32.mrb[41].mxu0 }
 0x466   : > { %v3846_v54 = vpop.f32.mrb[42].mxu0 }
 0x467   : > { %3958 = vst.msk [vmem:[%s8365_s14 + $0x20] sm:$0xff] %vm3405_vm6, %v3844_v57  ;;  %v3847_v61 = vadd.f32 %v8359_v9, %v3846_v54  ;;  %v3848_v31 = vpop.f32.mrb[43].mxu0 }
 0x469   : > { %3959 = vst.msk [vmem:[%s8365_s14 + $0x28] sm:$0xff] %vm3405_vm6, %v3847_v61 }
 0x474   : > { %v3931_v36 = vpop.f32.mrb[32].mxu1 }
 0x475   : > { %v3932_v20 = vadd.f32 %v8359_v9, %v3931_v36  ;;  %v3933_v19 = vpop.f32.mrb[33].mxu1 }
 0x476   : > { %v3934_v0 = vpop.f32.mrb[34].mxu1 }
 0x477   : > { %3980 = vst.msk [vmem:[%s8365_s14 + $0xd0] sm:$0xff] %vm3405_vm6, %v3932_v20  ;;  %v3935_v24 = vadd.f32 %v8359_v9, %v3934_v0  ;;  %v3936_v45 = vpop.f32.mrb[35].mxu1 }
 0x479   : > { %3981 = vst.msk [vmem:[%s8365_s14 + $0xd8] sm:$0xff] %vm3405_vm6, %v3935_v24 }
 0x47c   : > { %v3939_v1 = vpop.f32.mrb[36].mxu1 }
 0x47d   : > { %v3940_v2 = vadd.f32 %v8359_v9, %v3939_v1  ;;  %v3941_v6 = vpop.f32.mrb[37].mxu1 }
 0x47e   : > { %v3942_v29 = vpop.f32.mrb[38].mxu1 }
 0x47f   : > { %3982 = vst.msk [vmem:[%s8365_s14 + $0xe0] sm:$0xff] %vm3405_vm6, %v3940_v2  ;;  %v3943_v48 = vadd.f32 %v8359_v9, %v3942_v29  ;;  %v3944_v14 = vpop.f32.mrb[39].mxu1 }
 0x481   : > { %3983 = vst.msk [vmem:[%s8365_s14 + $0xe8] sm:$0xff] %vm3405_vm6, %v3943_v48 }
 0x488   : > { %v3851_v52 = vpop.f32.mrb[44].mxu0 }
 0x489   : > { %v3852_v60 = vadd.f32 %v8359_v9, %v3851_v52  ;;  %v3853_v39 = vpop.f32.mrb[45].mxu0 }
 0x48a   : > { %v3854_v35 = vpop.f32.mrb[46].mxu0 }
 0x48b   : > { %3960 = vst.msk [vmem:[%s8365_s14 + $0x30] sm:$0xff] %vm3405_vm6, %v3852_v60  ;;  %v3855_v30 = vadd.f32 %v8359_v9, %v3854_v35  ;;  %v3856_v12 = vpop.f32.mrb[47].mxu0 }
 0x48d   : > { %3961 = vst.msk [vmem:[%s8365_s14 + $0x38] sm:$0xff] %vm3405_vm6, %v3855_v30 }
 0x490   : > { %v3859_v11 = vpop.f32.mrb[48].mxu0 }
 0x491   : > { %v3860_v7 = vadd.f32 %v8359_v9, %v3859_v11  ;;  %v3861_v33 = vpop.f32.mrb[49].mxu0 }
 0x492   : > { %v3862_v16 = vpop.f32.mrb[50].mxu0 }
 0x493   : > { %3962 = vst.msk [vmem:[%s8365_s14 + $0x40] sm:$0xff] %vm3405_vm6, %v3860_v7  ;;  %v3863_v37 = vadd.f32 %v8359_v9, %v3862_v16  ;;  %v3864_v32 = vpop.f32.mrb[51].mxu0 }
 0x495   : > { %3963 = vst.msk [vmem:[%s8365_s14 + $0x48] sm:$0xff] %vm3405_vm6, %v3863_v37 }
 0x4a0   : > { %v3947_v41 = vpop.f32.mrb[40].mxu1 }
 0x4a1   : > { %v3948_v28 = vadd.f32 %v8359_v9, %v3947_v41  ;;  %v3949_v63 = vpop.f32.mrb[41].mxu1 }
 0x4a2   : > { %v3950_v18 = vpop.f32.mrb[42].mxu1 }
 0x4a3   : > { %3984 = vst.msk [vmem:[%s8365_s14 + $0xf0] sm:$0xff] %vm3405_vm6, %v3948_v28  ;;  %v3951_v53 = vadd.f32 %v8359_v9, %v3950_v18  ;;  %v3952_v17 = vpop.f32.mrb[43].mxu1 }
 0x4a5   : > { %3985 = vst.msk [vmem:[%s8365_s14 + $0xf8] sm:$0xff] %vm3405_vm6, %v3951_v53 }
 0x4a6 PF: > { %s17_s24 = sadd.s32 1, %s5022_s24  }
 0x4a7   : > { %p14_p4 = scmp.ge.s32.totalorder %s17_s24, 4  }
 0x4a9   :  { %16 = sbr.rel (!%p14_p4) target bundleno = 1 (0x1), region = 84 }

</bundles_post_ra>
